<compile_context>
chip_gen: v6e
topology: v6e:2x2x1
jax: 0.10.0
libtpu: 0.0.40
codegen_flags: <defaults>
</compile_context>

<pallas_src>
import functools

import numpy as np
import jax
import jax.numpy as jnp
from jax import lax
from jax.experimental import pallas as pl
from jax.experimental.pallas import tpu as pltpu

CHANNELS = [60, 120, 240, 480]    # groups = CHANNELS[0] // 4 = 15, as in the PyTorch code
NEG_SLOPE = 0.01                  # F.leaky_relu default
GN_EPS = 1e-5                     # nn.GroupNorm default
LANE = 128                        # lane-dense channel padding


def _round_up(x, m):
    return ((x + m - 1) // m) * m


def _vmem_limit_bytes():
    """Generation-aware scoped VMEM cap (v7x has 64 MiB physical, v5e/v6e 128 MiB)."""
    try:
        cap = int(pltpu.get_tpu_info().vmem_capacity_bytes)
    except Exception:
        cap = 64 * 1024 * 1024
    return max(16 * 1024 * 1024, min((cap * 3) // 4, 100 * 1024 * 1024))


VMEM_LIMIT = _vmem_limit_bytes()


# --------------------------- GroupNorm statistics ----------------------------

def _gn_stats_kernel(x_ref, a_ref, at_ref, mean_ref, scale_ref, s1_ref, s2_ref,
                     *, inv_count):
    """Accumulate per-channel sum / sumsq over d-slices; finalize per-group stats."""
    di = pl.program_id(1)

    @pl.when(di == 0)
    def _():
        s1_ref[...] = jnp.zeros_like(s1_ref)
        s2_ref[...] = jnp.zeros_like(s2_ref)

    x = x_ref[0, 0].astype(jnp.float32)                      # (HpWp, Cp); ring rows are 0
    ones = jnp.ones((1, x.shape[0]), jnp.float32)
    s1_ref[...] += jnp.dot(ones, x, preferred_element_type=jnp.float32)
    s2_ref[...] += jnp.dot(ones, x * x, preferred_element_type=jnp.float32)

    @pl.when(di == pl.num_programs(1) - 1)
    def _():
        # channel sums -> group sums via one-hot membership matmul (MXU)
        gsum = jnp.dot(s1_ref[...], a_ref[...], preferred_element_type=jnp.float32)
        gsq = jnp.dot(s2_ref[...], a_ref[...], preferred_element_type=jnp.float32)
        gmean = gsum * inv_count
        gvar = jnp.maximum(gsq * inv_count - gmean * gmean, 0.0)
        ginv = lax.rsqrt(gvar + GN_EPS)
        mean_ref[0] = jnp.dot(gmean, at_ref[...], preferred_element_type=jnp.float32)
        scale_ref[0] = jnp.dot(ginv, at_ref[...], preferred_element_type=jnp.float32)


def group_norm_stats(x_p, a_mat, at_mat, inv_count):
    """x_p: (N, D, Hp*Wp, Cp) bf16 with exact-zero H/W ring and zero padded channels."""
    n, d, hpwp, cp = x_p.shape
    g = a_mat.shape[1]
    kern = functools.partial(_gn_stats_kernel, inv_count=inv_count)
    return pl.pallas_call(
        kern,
        out_shape=(jax.ShapeDtypeStruct((n, 1, cp), jnp.float32),
                   jax.ShapeDtypeStruct((n, 1, cp), jnp.float32)),
        grid_spec=pltpu.PrefetchScalarGridSpec(
            num_scalar_prefetch=0,
            grid=(n, d),
            in_specs=[
                pl.BlockSpec((1, 1, hpwp, cp), lambda i, j: (i, j, 0, 0)),
                pl.BlockSpec((cp, g), lambda i, j: (0, 0)),
                pl.BlockSpec((g, cp), lambda i, j: (0, 0)),
            ],
            out_specs=[
                pl.BlockSpec((1, 1, cp), lambda i, j: (i, 0, 0)),
                pl.BlockSpec((1, 1, cp), lambda i, j: (i, 0, 0)),
            ],
            scratch_shapes=[pltpu.VMEM((1, cp), jnp.float32),
                            pltpu.VMEM((1, cp), jnp.float32)],
        ),
        compiler_params=pltpu.CompilerParams(
            dimension_semantics=("parallel", "arbitrary"),
            vmem_limit_bytes=VMEM_LIMIT),
    )(x_p, a_mat, at_mat)


# ---------------- fused GroupNorm-apply + LeakyReLU + 3x3x3 conv --------------

def _gn_conv_kernel(x_ref, mean_ref, scale_ref, gamma_ref, beta_ref,
                    hw_mask_ref, out_mask_ref, w_ref, o_ref, xn_ref, acc_ref,
                    *, d_total, wp, h, w, w_resident):
    """Grid (N, D, 3); kd = program_id(2) selects the depth tap.

    x_ref   : (1, 1, HpWp, Cp) bf16  raw padded activation slice at clamped depth di+kd-1
    w_ref   : (3, 9, Cp, Cp) or (1, 9, Cp, Cp) bf16  conv tap matrices (resident / per-kd)
    o_ref   : (1, 1, HpWp, Cp) bf16  padded output slice (ring written as zeros)
    xn_ref  : (HpWp, Cp) bf16        normalized+masked activation scratch
    acc_ref : (Macc, Cp) f32         flat conv accumulator, Macc = (H-1)*Wp + W
    """
    di = pl.program_id(1)
    kd = pl.program_id(2)
    macc = (h - 1) * wp + w

    @pl.when(kd == 0)
    def _():
        acc_ref[...] = jnp.zeros_like(acc_ref)

    d_in = di + kd - 1
    d_ok = jnp.logical_and(d_in >= 0, d_in <= d_total - 1)

    @pl.when(d_ok)
    def _():
        # fused GroupNorm apply + LeakyReLU; hw_mask zeroes the padded ring (emulating
        # the conv's zero padding of the *normalized* activation).
        x = x_ref[0, 0].astype(jnp.float32)
        y = (x - mean_ref[0]) * scale_ref[0] * gamma_ref[...] + beta_ref[...]
        y = jnp.where(y > 0, y, NEG_SLOPE * y)
        xn_ref[...] = (y * hw_mask_ref[...]).astype(xn_ref.dtype)
        # 9 (kh,kw) taps: one slab matmul per tap on a statically shifted slice.
        for t in range(9):
            kh, kw = divmod(t, 3)
            off = kh * wp + kw
            w_t = w_ref[kd, t] if w_resident else w_ref[0, t]
            acc_ref[...] += jnp.dot(xn_ref[pl.ds(off, macc), :], w_t,
                                    preferred_element_type=jnp.float32)

    @pl.when(kd == pl.num_programs(2) - 1)
    def _():
        # write ring zeros, then overwrite the interior rows with the masked accumulator
        o_ref[0, 0] = jnp.zeros(o_ref.shape[2:], o_ref.dtype)
        o_ref[0, 0, pl.ds(wp + 1, macc), :] = (
            acc_ref[...] * out_mask_ref[...]).astype(o_ref.dtype)


def gn_leaky_conv(x_p, mean_c, scale_c, gamma, beta, w_taps, hw_mask, out_mask,
                  d, h, w):
    """conv3x3x3(leaky_relu(group_norm(x))) in padded layout; output ring is zero."""
    n, _, hpwp, cp = x_p.shape
    wp = w + 2
    macc = (h - 1) * wp + w

    # VMEM budget: double-buffered in/out activation blocks + scratches + weights.
    act_block = hpwp * cp * 2
    base = 4 * act_block + hpwp * cp * 2 + macc * cp * 4
    w_resident = (base + 2 * 27 * cp * cp * 2) <= int(VMEM_LIMIT * 0.9)
    if w_resident:
        w_in = w_taps
        w_spec = pl.BlockSpec((3, 9, cp, cp), lambda ni, di, kd: (0, 0, 0, 0))
    else:
        w_in = w_taps
        w_spec = pl.BlockSpec((1, 9, cp, cp), lambda ni, di, kd: (kd, 0, 0, 0))

    kern = functools.partial(_gn_conv_kernel, d_total=d, wp=wp, h=h, w=w,
                             w_resident=w_resident)
    flops = 2 * n * d * 27 * macc * cp * cp
    bytes_accessed = (n * d * 3 * hpwp * cp * 2      # activation slices (read up to 3x)
                      + 27 * cp * cp * 2             # resident conv weights
                      + n * d * hpwp * cp * 2)       # output
    return pl.pallas_call(
        kern,
        out_shape=jax.ShapeDtypeStruct((n, d, hpwp, cp), jnp.bfloat16),
        grid_spec=pltpu.PrefetchScalarGridSpec(
            num_scalar_prefetch=0,
            grid=(n, d, 3),
            in_specs=[
                # depth tap kd shifts the d-slice; clamp + in-kernel d_ok gate handle the
                # depth padding without materializing a d-padded tensor.
                pl.BlockSpec((1, 1, hpwp, cp),
                             lambda ni, di, kd: (ni, jnp.clip(di + kd - 1, 0, d - 1), 0, 0)),
                pl.BlockSpec((1, 1, cp), lambda ni, di, kd: (ni, 0, 0)),
                pl.BlockSpec((1, 1, cp), lambda ni, di, kd: (ni, 0, 0)),
                pl.BlockSpec((1, cp), lambda ni, di, kd: (0, 0)),
                pl.BlockSpec((1, cp), lambda ni, di, kd: (0, 0)),
                pl.BlockSpec((hpwp, 1), lambda ni, di, kd: (0, 0)),
                pl.BlockSpec((macc, 1), lambda ni, di, kd: (0, 0)),
                w_spec,
            ],
            out_specs=pl.BlockSpec((1, 1, hpwp, cp), lambda ni, di, kd: (ni, di, 0, 0)),
            scratch_shapes=[pltpu.VMEM((hpwp, cp), jnp.bfloat16),
                            pltpu.VMEM((macc, cp), jnp.float32)],
        ),
        compiler_params=pltpu.CompilerParams(
            dimension_semantics=("parallel", "parallel", "arbitrary"),
            vmem_limit_bytes=VMEM_LIMIT),
        cost_estimate=pl.CostEstimate(flops=flops, transcendentals=0,
                                      bytes_accessed=bytes_accessed),
    )(x_p, mean_c, scale_c, gamma, beta, hw_mask, out_mask, w_in)


# ------------------------------ 1x1x1 conv (+bias) ---------------------------

def _matmul_bias_kernel(x_ref, w_ref, b_ref, o_ref):
    acc = jnp.dot(x_ref[...], w_ref[...], preferred_element_type=jnp.float32)
    o_ref[...] = (acc + b_ref[...]).astype(o_ref.dtype)


def matmul_bias(x, w_mat, b):
    """(M, K) bf16 @ (K, N) bf16 + b -> bf16, f32 accumulate; M tiled with a cdiv grid."""
    m, k = x.shape
    _, n_out = w_mat.shape
    tm = 512 if m >= 512 else _round_up(m, 8)
    gm = pl.cdiv(m, tm)
    flops = 2 * m * k * n_out
    bytes_accessed = m * k * 2 + k * n_out * 2 + m * n_out * 2
    return pl.pallas_call(
        _matmul_bias_kernel,
        out_shape=jax.ShapeDtypeStruct((m, n_out), jnp.bfloat16),
        grid_spec=pltpu.PrefetchScalarGridSpec(
            num_scalar_prefetch=0,
            grid=(gm,),
            in_specs=[
                pl.BlockSpec((tm, k), lambda i: (i, 0)),
                pl.BlockSpec((k, n_out), lambda i: (0, 0)),
                pl.BlockSpec((1, n_out), lambda i: (0, 0)),
            ],
            out_specs=pl.BlockSpec((tm, n_out), lambda i: (i, 0)),
        ),
        compiler_params=pltpu.CompilerParams(
            dimension_semantics=("parallel",),
            vmem_limit_bytes=VMEM_LIMIT),
        cost_estimate=pl.CostEstimate(flops=flops, transcendentals=0,
                                      bytes_accessed=bytes_accessed),
    )(x, w_mat, b)


# ------------------------------- JAX glue -----------------------------------

def _up2_axis(x, axis):
    """PyTorch linear x2 upsample (align_corners=False) along one axis via 2-tap lerp."""
    length = x.shape[axis]
    first = lax.slice_in_dim(x, 0, 1, axis=axis)
    last = lax.slice_in_dim(x, length - 1, length, axis=axis)
    left = jnp.concatenate([first, lax.slice_in_dim(x, 0, length - 1, axis=axis)], axis=axis)
    right = jnp.concatenate([lax.slice_in_dim(x, 1, length, axis=axis), last], axis=axis)
    even = 0.25 * left + 0.75 * x          # out[2j]   = 0.25*x[j-1] + 0.75*x[j]
    odd = 0.75 * x + 0.25 * right          # out[2j+1] = 0.75*x[j]   + 0.25*x[j+1]
    out = jnp.stack([even, odd], axis=axis + 1)
    new_shape = x.shape[:axis] + (2 * length,) + x.shape[axis + 1:]
    return out.reshape(new_shape)


def _make_conv_masks(h, w):
    """hw_mask (HpWp,1): 1 on interior rows of the padded (Hp,Wp) plane, 0 on the ring.
       out_mask (Macc,1): 1 on valid flat accumulator rows ((m % Wp) < W), 0 on junk."""
    wp = w + 2
    hpwp = (h + 2) * wp
    macc = (h - 1) * wp + w
    r = np.arange(hpwp)
    hw = (((r // wp) >= 1) & ((r // wp) <= h)
          & ((r % wp) >= 1) & ((r % wp) <= w)).astype(np.float32)
    om = ((np.arange(macc) % wp) < w).astype(np.float32)
    return jnp.asarray(hw.reshape(hpwp, 1)), jnp.asarray(om.reshape(macc, 1))


def _make_group_onehot(cp, c_real, groups):
    cg = c_real // groups
    a = np.zeros((cp, groups), np.float32)                   # padded channels -> no group
    for ch in range(c_real):
        a[ch, ch // cg] = 1.0
    return jnp.asarray(a), jnp.asarray(a.T)


# ----------------------------- module forward -------------------------------

def decoder_forward(x_ncdhw, params, *, out_channels, upsample=True):
    n, c, d, h, w = x_ncdhw.shape
    groups = CHANNELS[0] // 4                                 # = 15, as in makeSequence
    assert c % groups == 0, "inChannels must be divisible by groups=15"
    cp = _round_up(c, LANE)
    hp, wp = h + 2, w + 2
    hpwp = hp * wp

    # NCDHW -> channels-last, zero H/W ring, lane-dense channel padding, bf16
    x = jnp.transpose(x_ncdhw, (0, 2, 3, 4, 1)).astype(jnp.bfloat16)
    x = jnp.pad(x, ((0, 0), (0, 0), (1, 1), (1, 1), (0, cp - c)))
    x = x.reshape(n, d, hpwp, cp)

    hw_mask, out_mask = _make_conv_masks(h, w)
    a_mat, at_mat = _make_group_onehot(cp, c, groups)
    inv_count = 1.0 / float(d * h * w * (c // groups))

    for blk in params['blocks']:                              # 2 * depth ResidualInners
        mean_c, scale_c = group_norm_stats(x, a_mat, at_mat, inv_count)
        x = gn_leaky_conv(x, mean_c, scale_c, blk['gn_gamma'], blk['gn_beta'],
                          blk['conv_w'], hw_mask, out_mask, d, h, w)

    if upsample:
        y = matmul_bias(x.reshape(n * d * hpwp, cp), params['up_w'], params['up_b'])
        cout_p = params['up_w'].shape[1]
        y = y.reshape(n, d, hp, wp, cout_p)[:, :, 1:1 + h, 1:1 + w, :out_channels]
        # move channels off the lane axis before upsampling (small real-channel tensor)
        y = jnp.transpose(y, (0, 4, 1, 2, 3)).astype(jnp.float32)   # NCDHW
        # TODO(synk): the trilinear x2 upsample stays as shifted-slice lerps in plain JAX.
        y = _up2_axis(y, 2)
        y = _up2_axis(y, 3)
        y = _up2_axis(y, 4)
        return y

    y = x.reshape(n, d, hp, wp, cp)[:, :, 1:1 + h, 1:1 + w, :c].astype(jnp.float32)
    return jnp.transpose(y, (0, 4, 1, 2, 3))


# ------------------------- deterministic parameters -------------------------

def init_params(key, in_channels, out_channels, depth):
    c = in_channels
    cp = _round_up(c, LANE)
    cout_p = _round_up(out_channels, LANE)
    n_inner = 2 * depth                                       # fBlock + gBlock per sequence
    keys = jax.random.split(key, 3 * n_inner + 2)
    blocks = []
    for i in range(n_inner):
        kg, kb, kw = keys[3 * i], keys[3 * i + 1], keys[3 * i + 2]
        gamma = 1.0 + 0.1 * jax.random.normal(kg, (c,), jnp.float32)
        beta = 0.1 * jax.random.normal(kb, (c,), jnp.float32)
        gamma = jnp.pad(gamma, (0, cp - c)).reshape(1, cp)    # padded channels: gamma=0
        beta = jnp.pad(beta, (0, cp - c)).reshape(1, cp)
        # PyTorch Conv3d weight (Cout, Cin, kd, kh, kw) -> taps (3, 9, Cp_in, Cp_out)
        w_torch = 0.1 * jax.random.normal(kw, (c, c, 3, 3, 3), jnp.float32)
        w_taps = jnp.transpose(w_torch, (2, 3, 4, 1, 0)).reshape(3, 9, c, c)
        w_taps = jnp.pad(w_taps, ((0, 0), (0, 0), (0, cp - c), (0, cp - c)))
        blocks.append({'gn_gamma': gamma, 'gn_beta': beta,
                       'conv_w': w_taps.astype(jnp.bfloat16)})
    kuw, kub = keys[-2], keys[-1]
    up_torch = 0.1 * jax.random.normal(kuw, (out_channels, c, 1, 1, 1), jnp.float32)
    up_w = jnp.transpose(up_torch[:, :, 0, 0, 0], (1, 0))     # (Cin, Cout)
    up_w = jnp.pad(up_w, ((0, cp - c), (0, cout_p - out_channels))).astype(jnp.bfloat16)
    up_b = 0.1 * jax.random.normal(kub, (out_channels,), jnp.float32)
    up_b = jnp.pad(up_b, (0, cout_p - out_channels)).reshape(1, cout_p)
    return {'blocks': blocks, 'up_w': up_w, 'up_b': up_b}


if __name__ == "__main__":
    # inChannels must be a multiple of groups=15 (as required by the PyTorch code).
    N, CIN, COUT, D, H, W, DEPTH = 2, 30, 16, 4, 4, 4, 1
    key = jax.random.PRNGKey(0)
    kx, kp = jax.random.split(key)
    x = jax.random.normal(kx, (N, CIN, D, H, W), jnp.float32)   # NCDHW, like PyTorch
    params = init_params(kp, CIN, COUT, DEPTH)

    fwd = jax.jit(functools.partial(decoder_forward, out_channels=COUT, upsample=True))
    out = fwd(x, params)
    jax.block_until_ready(out)
    assert out.shape == (N, COUT, 2 * D, 2 * H, 2 * W), out.shape
    assert bool(jnp.all(jnp.isfinite(out)))
    print("KERNEL_OK")
</pallas_src>

<mosaic_0001>
module attributes {stable_mosaic.version = 11 : i64} {
  func.func @_gn_stats_kernel(%arg0: i32, %arg1: i32, %arg2: memref<1x1x36x128xbf16, #tpu.memory_space<vmem>>, %arg3: memref<128x15xf32, #tpu.memory_space<vmem>>, %arg4: memref<15x128xf32, #tpu.memory_space<vmem>>, %arg5: memref<1x1x128xf32, #tpu.memory_space<vmem>>, %arg6: memref<1x1x128xf32, #tpu.memory_space<vmem>>, %arg7: memref<1x128xf32, #tpu.memory_space<vmem>>, %arg8: memref<1x128xf32, #tpu.memory_space<vmem>>) attributes {dimension_semantics = [#tpu.dimension_semantics<parallel>, #tpu.dimension_semantics<arbitrary>], iteration_bounds = array<i64: 2, 4>, scalar_prefetch = 0 : i64, scratch_operands = 2 : i64, tpu.core_type = #tpu.core_type<tc>, window_params = [{transform_indices = @transform_0, window_bounds = array<i64: 1, 1, 36, 128>}, {pipeline_mode = #tpu.pipeline_mode<synchronous>, transform_indices = @transform_1, window_bounds = array<i64: 128, 15>}, {pipeline_mode = #tpu.pipeline_mode<synchronous>, transform_indices = @transform_2, window_bounds = array<i64: 15, 128>}, {transform_indices = @transform_3, window_bounds = array<i64: 1, 1, 128>}, {transform_indices = @transform_4, window_bounds = array<i64: 1, 1, 128>}]} {
    %c0_i32 = arith.constant 0 : i32
    %0 = arith.cmpi eq, %arg1, %c0_i32 : i32
    %1 = arith.extui %0 : i1 to i32
    %c0_i32_0 = arith.constant 0 : i32
    %2 = arith.cmpi ne, %1, %c0_i32_0 : i32
    scf.if %2 {
      %cst_15 = arith.constant 0.000000e+00 : f32
      %19 = vector.broadcast %cst_15 : f32 to vector<1x128xf32>
      %c0_16 = arith.constant 0 : index
      %c0_17 = arith.constant 0 : index
      %20 = vector.load %arg7[%c0_16, %c0_17] : memref<1x128xf32, #tpu.memory_space<vmem>>, vector<1x128xf32>
      tpu.vector_store %arg7[%c0_16, %c0_17], %19 {strides = array<i32>} : memref<1x128xf32, #tpu.memory_space<vmem>>, vector<1x128xf32>,
      %cst_18 = arith.constant 0.000000e+00 : f32
      %21 = vector.broadcast %cst_18 : f32 to vector<1x128xf32>
      %c0_19 = arith.constant 0 : index
      %c0_20 = arith.constant 0 : index
      %22 = vector.load %arg8[%c0_19, %c0_20] : memref<1x128xf32, #tpu.memory_space<vmem>>, vector<1x128xf32>
      tpu.vector_store %arg8[%c0_19, %c0_20], %21 {strides = array<i32>} : memref<1x128xf32, #tpu.memory_space<vmem>>, vector<1x128xf32>,
    } else {
    }
    %c0 = arith.constant 0 : index
    %c0_1 = arith.constant 0 : index
    %c0_2 = arith.constant 0 : index
    %c0_3 = arith.constant 0 : index
    %3 = vector.load %arg2[%c0, %c0_1, %c0_2, %c0_3] : memref<1x1x36x128xbf16, #tpu.memory_space<vmem>>, vector<1x1x36x128xbf16>
    %4 = vector.shape_cast %3 : vector<1x1x36x128xbf16> to vector<36x128xbf16>
    %5 = arith.extf %4 : vector<36x128xbf16> to vector<36x128xf32>
    %cst = arith.constant 1.000000e+00 : f32
    %6 = vector.broadcast %cst : f32 to vector<1x36xf32>
    %c0_4 = arith.constant 0 : index
    %c0_5 = arith.constant 0 : index
    %7 = vector.load %arg7[%c0_4, %c0_5] : memref<1x128xf32, #tpu.memory_space<vmem>>, vector<1x128xf32>
    %cst_6 = arith.constant dense<0.000000e+00> : vector<1x128xf32>
    %8 = tpu.matmul %6, %5, %cst_6 {dimension_numbers = #tpu.dot_dimension_numbers<[1], [0], [0], [1], [0, 0, 1, 1], [], []>} : vector<1x36xf32>, vector<36x128xf32>, vector<1x128xf32> -> vector<1x128xf32>
    %9 = arith.addf %7, %8 : vector<1x128xf32>
    %c0_7 = arith.constant 0 : index
    %c0_8 = arith.constant 0 : index
    %10 = vector.load %arg7[%c0_7, %c0_8] : memref<1x128xf32, #tpu.memory_space<vmem>>, vector<1x128xf32>
    tpu.vector_store %arg7[%c0_7, %c0_8], %9 {strides = array<i32>} : memref<1x128xf32, #tpu.memory_space<vmem>>, vector<1x128xf32>,
    %c0_9 = arith.constant 0 : index
    %c0_10 = arith.constant 0 : index
    %11 = vector.load %arg8[%c0_9, %c0_10] : memref<1x128xf32, #tpu.memory_space<vmem>>, vector<1x128xf32>
    %12 = arith.mulf %5, %5 : vector<36x128xf32>
    %cst_11 = arith.constant dense<0.000000e+00> : vector<1x128xf32>
    %13 = tpu.matmul %6, %12, %cst_11 {dimension_numbers = #tpu.dot_dimension_numbers<[1], [0], [0], [1], [0, 0, 1, 1], [], []>} : vector<1x36xf32>, vector<36x128xf32>, vector<1x128xf32> -> vector<1x128xf32>
    %14 = arith.addf %11, %13 : vector<1x128xf32>
    %c0_12 = arith.constant 0 : index
    %c0_13 = arith.constant 0 : index
    %15 = vector.load %arg8[%c0_12, %c0_13] : memref<1x128xf32, #tpu.memory_space<vmem>>, vector<1x128xf32>
    tpu.vector_store %arg8[%c0_12, %c0_13], %14 {strides = array<i32>} : memref<1x128xf32, #tpu.memory_space<vmem>>, vector<1x128xf32>,
    %c3_i32 = arith.constant 3 : i32
    %16 = arith.cmpi eq, %arg1, %c3_i32 : i32
    %17 = arith.extui %16 : i1 to i32
    %c0_i32_14 = arith.constant 0 : i32
    %18 = arith.cmpi ne, %17, %c0_i32_14 : i32
    scf.if %18 {
      %c0_15 = arith.constant 0 : index
      %c0_16 = arith.constant 0 : index
      %19 = vector.load %arg7[%c0_15, %c0_16] : memref<1x128xf32, #tpu.memory_space<vmem>>, vector<1x128xf32>
      %c0_17 = arith.constant 0 : index
      %c0_18 = arith.constant 0 : index
      %20 = vector.load %arg3[%c0_17, %c0_18] : memref<128x15xf32, #tpu.memory_space<vmem>>, vector<128x15xf32>
      %cst_19 = arith.constant dense<0.000000e+00> : vector<1x15xf32>
      %21 = tpu.matmul %19, %20, %cst_19 {dimension_numbers = #tpu.dot_dimension_numbers<[1], [0], [0], [1], [0, 0, 1, 1], [], []>} : vector<1x128xf32>, vector<128x15xf32>, vector<1x15xf32> -> vector<1x15xf32>
      %c0_20 = arith.constant 0 : index
      %c0_21 = arith.constant 0 : index
      %22 = vector.load %arg8[%c0_20, %c0_21] : memref<1x128xf32, #tpu.memory_space<vmem>>, vector<1x128xf32>
      %c0_22 = arith.constant 0 : index
      %c0_23 = arith.constant 0 : index
      %23 = vector.load %arg3[%c0_22, %c0_23] : memref<128x15xf32, #tpu.memory_space<vmem>>, vector<128x15xf32>
      %cst_24 = arith.constant dense<0.000000e+00> : vector<1x15xf32>
      %24 = tpu.matmul %22, %23, %cst_24 {dimension_numbers = #tpu.dot_dimension_numbers<[1], [0], [0], [1], [0, 0, 1, 1], [], []>} : vector<1x128xf32>, vector<128x15xf32>, vector<1x15xf32> -> vector<1x15xf32>
      %cst_25 = arith.constant 7.812500e-03 : f32
      %25 = vector.broadcast %cst_25 : f32 to vector<1x15xf32>
      %26 = arith.mulf %21, %25 : vector<1x15xf32>
      %cst_26 = arith.constant 7.812500e-03 : f32
      %27 = vector.broadcast %cst_26 : f32 to vector<1x15xf32>
      %28 = arith.mulf %24, %27 : vector<1x15xf32>
      %29 = arith.mulf %26, %26 : vector<1x15xf32>
      %30 = arith.subf %28, %29 : vector<1x15xf32>
      %cst_27 = arith.constant 0.000000e+00 : f32
      %31 = vector.broadcast %cst_27 : f32 to vector<1x15xf32>
      %32 = arith.maximumf %30, %31 : vector<1x15xf32>
      %cst_28 = arith.constant 9.99999974E-6 : f32
      %33 = vector.broadcast %cst_28 : f32 to vector<1x15xf32>
      %34 = arith.addf %32, %33 : vector<1x15xf32>
      %35 = math.rsqrt %34 : vector<1x15xf32>
      %c0_29 = arith.constant 0 : index
      %c0_30 = arith.constant 0 : index
      %36 = vector.load %arg4[%c0_29, %c0_30] : memref<15x128xf32, #tpu.memory_space<vmem>>, vector<15x128xf32>
      %cst_31 = arith.constant dense<0.000000e+00> : vector<1x128xf32>
      %37 = tpu.matmul %26, %36, %cst_31 {dimension_numbers = #tpu.dot_dimension_numbers<[1], [0], [0], [1], [0, 0, 1, 1], [], []>} : vector<1x15xf32>, vector<15x128xf32>, vector<1x128xf32> -> vector<1x128xf32>
      %c0_32 = arith.constant 0 : index
      %c0_33 = arith.constant 0 : index
      %c0_34 = arith.constant 0 : index
      %38 = vector.load %arg5[%c0_32, %c0_33, %c0_34] : memref<1x1x128xf32, #tpu.memory_space<vmem>>, vector<1x1x128xf32>
      %39 = vector.shape_cast %38 : vector<1x1x128xf32> to vector<1x128xf32>
      %40 = vector.shape_cast %37 : vector<1x128xf32> to vector<1x1x128xf32>
      tpu.vector_store %arg5[%c0_32, %c0_33, %c0_34], %40 {strides = array<i32>} : memref<1x1x128xf32, #tpu.memory_space<vmem>>, vector<1x1x128xf32>,
      %c0_35 = arith.constant 0 : index
      %c0_36 = arith.constant 0 : index
      %41 = vector.load %arg4[%c0_35, %c0_36] : memref<15x128xf32, #tpu.memory_space<vmem>>, vector<15x128xf32>
      %cst_37 = arith.constant dense<0.000000e+00> : vector<1x128xf32>
      %42 = tpu.matmul %35, %41, %cst_37 {dimension_numbers = #tpu.dot_dimension_numbers<[1], [0], [0], [1], [0, 0, 1, 1], [], []>} : vector<1x15xf32>, vector<15x128xf32>, vector<1x128xf32> -> vector<1x128xf32>
      %c0_38 = arith.constant 0 : index
      %c0_39 = arith.constant 0 : index
      %c0_40 = arith.constant 0 : index
      %43 = vector.load %arg6[%c0_38, %c0_39, %c0_40] : memref<1x1x128xf32, #tpu.memory_space<vmem>>, vector<1x1x128xf32>
      %44 = vector.shape_cast %43 : vector<1x1x128xf32> to vector<1x128xf32>
      %45 = vector.shape_cast %42 : vector<1x128xf32> to vector<1x1x128xf32>
      tpu.vector_store %arg6[%c0_38, %c0_39, %c0_40], %45 {strides = array<i32>} : memref<1x1x128xf32, #tpu.memory_space<vmem>>, vector<1x1x128xf32>,
    } else {
    }
    return
  }
  func.func @transform_0(%arg0: i32, %arg1: i32) -> (i32, i32, i32, i32) {
    %c0_i32 = arith.constant 0 : i32
    %c0_i32_0 = arith.constant 0 : i32
    %c0_i32_1 = arith.constant 0 : i32
    return %arg0, %arg1, %c0_i32, %c0_i32_0 : i32, i32, i32, i32
  }
  func.func @transform_1(%arg0: i32, %arg1: i32) -> (i32, i32) {
    %c0_i32 = arith.constant 0 : i32
    %c0_i32_0 = arith.constant 0 : i32
    %c0_i32_1 = arith.constant 0 : i32
    return %c0_i32, %c0_i32_0 : i32, i32
  }
  func.func @transform_2(%arg0: i32, %arg1: i32) -> (i32, i32) {
    %c0_i32 = arith.constant 0 : i32
    %c0_i32_0 = arith.constant 0 : i32
    %c0_i32_1 = arith.constant 0 : i32
    return %c0_i32, %c0_i32_0 : i32, i32
  }
  func.func @transform_3(%arg0: i32, %arg1: i32) -> (i32, i32, i32) {
    %c0_i32 = arith.constant 0 : i32
    %c0_i32_0 = arith.constant 0 : i32
    %c0_i32_1 = arith.constant 0 : i32
    return %arg0, %c0_i32, %c0_i32_0 : i32, i32, i32
  }
  func.func @transform_4(%arg0: i32, %arg1: i32) -> (i32, i32, i32) {
    %c0_i32 = arith.constant 0 : i32
    %c0_i32_0 = arith.constant 0 : i32
    %c0_i32_1 = arith.constant 0 : i32
    return %arg0, %c0_i32, %c0_i32_0 : i32, i32, i32
  }
}

module attributes {stable_mosaic.version = 11 : i64} {
  func.func @_gn_conv_kernel(%arg0: i32, %arg1: i32, %arg2: i32, %arg3: memref<1x1x36x128xbf16, #tpu.memory_space<vmem>>, %arg4: memref<1x1x128xf32, #tpu.memory_space<vmem>>, %arg5: memref<1x1x128xf32, #tpu.memory_space<vmem>>, %arg6: memref<1x128xf32, #tpu.memory_space<vmem>>, %arg7: memref<1x128xf32, #tpu.memory_space<vmem>>, %arg8: memref<36x1xf32, #tpu.memory_space<vmem>>, %arg9: memref<22x1xf32, #tpu.memory_space<vmem>>, %arg10: memref<3x9x128x128xbf16, #tpu.memory_space<vmem>>, %arg11: memref<1x1x36x128xbf16, #tpu.memory_space<vmem>>, %arg12: memref<36x128xbf16, #tpu.memory_space<vmem>>, %arg13: memref<22x128xf32, #tpu.memory_space<vmem>>) attributes {dimension_semantics = [#tpu.dimension_semantics<parallel>, #tpu.dimension_semantics<parallel>, #tpu.dimension_semantics<arbitrary>], iteration_bounds = array<i64: 2, 4, 3>, scalar_prefetch = 0 : i64, scratch_operands = 2 : i64, tpu.core_type = #tpu.core_type<tc>, window_params = [{transform_indices = @transform_0, window_bounds = array<i64: 1, 1, 36, 128>}, {transform_indices = @transform_1, window_bounds = array<i64: 1, 1, 128>}, {transform_indices = @transform_2, window_bounds = array<i64: 1, 1, 128>}, {pipeline_mode = #tpu.pipeline_mode<synchronous>, transform_indices = @transform_3, window_bounds = array<i64: 1, 128>}, {pipeline_mode = #tpu.pipeline_mode<synchronous>, transform_indices = @transform_4, window_bounds = array<i64: 1, 128>}, {pipeline_mode = #tpu.pipeline_mode<synchronous>, transform_indices = @transform_5, window_bounds = array<i64: 36, 1>}, {pipeline_mode = #tpu.pipeline_mode<synchronous>, transform_indices = @transform_6, window_bounds = array<i64: 22, 1>}, {pipeline_mode = #tpu.pipeline_mode<synchronous>, transform_indices = @transform_7, window_bounds = array<i64: 3, 9, 128, 128>}, {transform_indices = @transform_8, window_bounds = array<i64: 1, 1, 36, 128>}]} {
    %c0_i32 = arith.constant 0 : i32
    %0 = arith.cmpi eq, %arg2, %c0_i32 : i32
    %1 = arith.extui %0 : i1 to i32
    %c0_i32_0 = arith.constant 0 : i32
    %2 = arith.cmpi ne, %1, %c0_i32_0 : i32
    scf.if %2 {
      %cst = arith.constant 0.000000e+00 : f32
      %13 = vector.broadcast %cst : f32 to vector<22x128xf32>
      %c0 = arith.constant 0 : index
      %c0_4 = arith.constant 0 : index
      %14 = vector.load %arg13[%c0, %c0_4] : memref<22x128xf32, #tpu.memory_space<vmem>>, vector<22x128xf32>
      tpu.vector_store %arg13[%c0, %c0_4], %13 {strides = array<i32>} : memref<22x128xf32, #tpu.memory_space<vmem>>, vector<22x128xf32>,
    } else {
    }
    %3 = arith.addi %arg1, %arg2 : i32
    %c1_i32 = arith.constant 1 : i32
    %4 = arith.subi %3, %c1_i32 : i32
    %c0_i32_1 = arith.constant 0 : i32
    %5 = arith.cmpi sge, %4, %c0_i32_1 : i32
    %c3_i32 = arith.constant 3 : i32
    %6 = arith.cmpi sle, %4, %c3_i32 : i32
    %7 = arith.andi %5, %6 : i1
    %8 = arith.extui %7 : i1 to i32
    %c0_i32_2 = arith.constant 0 : i32
    %9 = arith.cmpi ne, %8, %c0_i32_2 : i32
    scf.if %9 {
      %c0 = arith.constant 0 : index
      %c0_4 = arith.constant 0 : index
      %c0_5 = arith.constant 0 : index
      %c0_6 = arith.constant 0 : index
      %13 = vector.load %arg3[%c0, %c0_4, %c0_5, %c0_6] : memref<1x1x36x128xbf16, #tpu.memory_space<vmem>>, vector<1x1x36x128xbf16>
      %14 = vector.shape_cast %13 : vector<1x1x36x128xbf16> to vector<36x128xbf16>
      %15 = arith.extf %14 : vector<36x128xbf16> to vector<36x128xf32>
      %c0_7 = arith.constant 0 : index
      %c0_8 = arith.constant 0 : index
      %c0_9 = arith.constant 0 : index
      %16 = vector.load %arg4[%c0_7, %c0_8, %c0_9] : memref<1x1x128xf32, #tpu.memory_space<vmem>>, vector<1x1x128xf32>
      %17 = vector.shape_cast %16 : vector<1x1x128xf32> to vector<1x128xf32>
      %18 = vector.broadcast %17 : vector<1x128xf32> to vector<36x128xf32>
      %19 = arith.subf %15, %18 : vector<36x128xf32>
      %c0_10 = arith.constant 0 : index
      %c0_11 = arith.constant 0 : index
      %c0_12 = arith.constant 0 : index
      %20 = vector.load %arg5[%c0_10, %c0_11, %c0_12] : memref<1x1x128xf32, #tpu.memory_space<vmem>>, vector<1x1x128xf32>
      %21 = vector.shape_cast %20 : vector<1x1x128xf32> to vector<1x128xf32>
      %22 = vector.broadcast %21 : vector<1x128xf32> to vector<36x128xf32>
      %23 = arith.mulf %19, %22 : vector<36x128xf32>
      %c0_13 = arith.constant 0 : index
      %c0_14 = arith.constant 0 : index
      %24 = vector.load %arg6[%c0_13, %c0_14] : memref<1x128xf32, #tpu.memory_space<vmem>>, vector<1x128xf32>
      %25 = vector.broadcast %24 : vector<1x128xf32> to vector<36x128xf32>
      %26 = arith.mulf %23, %25 : vector<36x128xf32>
      %c0_15 = arith.constant 0 : index
      %c0_16 = arith.constant 0 : index
      %27 = vector.load %arg7[%c0_15, %c0_16] : memref<1x128xf32, #tpu.memory_space<vmem>>, vector<1x128xf32>
      %28 = vector.broadcast %27 : vector<1x128xf32> to vector<36x128xf32>
      %29 = arith.addf %26, %28 : vector<36x128xf32>
      %cst = arith.constant 0.000000e+00 : f32
      %30 = vector.broadcast %cst : f32 to vector<36x128xf32>
      %31 = arith.cmpf ogt, %29, %30 : vector<36x128xf32>
      %cst_17 = arith.constant 0.00999999977 : f32
      %32 = vector.broadcast %cst_17 : f32 to vector<36x128xf32>
      %33 = arith.mulf %32, %29 : vector<36x128xf32>
      %34 = arith.select %31, %29, %33 : vector<36x128xi1>, vector<36x128xf32>
      %c0_18 = arith.constant 0 : index
      %c0_19 = arith.constant 0 : index
      %35 = vector.load %arg8[%c0_18, %c0_19] : memref<36x1xf32, #tpu.memory_space<vmem>>, vector<36x1xf32>
      %36 = vector.broadcast %35 : vector<36x1xf32> to vector<36x128xf32>
      %37 = arith.mulf %34, %36 : vector<36x128xf32>
      %38 = arith.truncf %37 : vector<36x128xf32> to vector<36x128xbf16>
      %c0_20 = arith.constant 0 : index
      %c0_21 = arith.constant 0 : index
      %39 = vector.load %arg12[%c0_20, %c0_21] : memref<36x128xbf16, #tpu.memory_space<vmem>>, vector<36x128xbf16>
      tpu.vector_store %arg12[%c0_20, %c0_21], %38 {strides = array<i32>} : memref<36x128xbf16, #tpu.memory_space<vmem>>, vector<36x128xbf16>,
      %40 = arith.index_cast %arg2 : i32 to index
      %c0_22 = arith.constant 0 : index
      %c0_23 = arith.constant 0 : index
      %c0_24 = arith.constant 0 : index
      %41 = vector.load %arg10[%40, %c0_22, %c0_23, %c0_24] : memref<3x9x128x128xbf16, #tpu.memory_space<vmem>>, vector<1x1x128x128xbf16>
      %42 = vector.shape_cast %41 : vector<1x1x128x128xbf16> to vector<128x128xbf16>
      %c0_25 = arith.constant 0 : index
      %c0_26 = arith.constant 0 : index
      %43 = vector.load %arg13[%c0_25, %c0_26] : memref<22x128xf32, #tpu.memory_space<vmem>>, vector<22x128xf32>
      %c0_27 = arith.constant 0 : index
      %c0_28 = arith.constant 0 : index
      %44 = vector.load %arg12[%c0_27, %c0_28] : memref<36x128xbf16, #tpu.memory_space<vmem>>, vector<22x128xbf16>
      %cst_29 = arith.constant dense<0.000000e+00> : vector<22x128xf32>
      %45 = tpu.matmul %44, %42, %cst_29 {dimension_numbers = #tpu.dot_dimension_numbers<[1], [0], [0], [1], [0, 0, 1, 1], [], []>} : vector<22x128xbf16>, vector<128x128xbf16>, vector<22x128xf32> -> vector<22x128xf32>
      %46 = arith.addf %43, %45 : vector<22x128xf32>
      %c0_30 = arith.constant 0 : index
      %c0_31 = arith.constant 0 : index
      %47 = vector.load %arg13[%c0_30, %c0_31] : memref<22x128xf32, #tpu.memory_space<vmem>>, vector<22x128xf32>
      tpu.vector_store %arg13[%c0_30, %c0_31], %46 {strides = array<i32>} : memref<22x128xf32, #tpu.memory_space<vmem>>, vector<22x128xf32>,
      %48 = arith.index_cast %arg2 : i32 to index
      %c1 = arith.constant 1 : index
      %c0_32 = arith.constant 0 : index
      %c0_33 = arith.constant 0 : index
      %49 = vector.load %arg10[%48, %c1, %c0_32, %c0_33] : memref<3x9x128x128xbf16, #tpu.memory_space<vmem>>, vector<1x1x128x128xbf16>
      %50 = vector.shape_cast %49 : vector<1x1x128x128xbf16> to vector<128x128xbf16>
      %c0_34 = arith.constant 0 : index
      %c0_35 = arith.constant 0 : index
      %51 = vector.load %arg13[%c0_34, %c0_35] : memref<22x128xf32, #tpu.memory_space<vmem>>, vector<22x128xf32>
      %c1_36 = arith.constant 1 : index
      %c0_37 = arith.constant 0 : index
      %52 = vector.load %arg12[%c1_36, %c0_37] : memref<36x128xbf16, #tpu.memory_space<vmem>>, vector<22x128xbf16>
      %cst_38 = arith.constant dense<0.000000e+00> : vector<22x128xf32>
      %53 = tpu.matmul %52, %50, %cst_38 {dimension_numbers = #tpu.dot_dimension_numbers<[1], [0], [0], [1], [0, 0, 1, 1], [], []>} : vector<22x128xbf16>, vector<128x128xbf16>, vector<22x128xf32> -> vector<22x128xf32>
      %54 = arith.addf %51, %53 : vector<22x128xf32>
      %c0_39 = arith.constant 0 : index
      %c0_40 = arith.constant 0 : index
      %55 = vector.load %arg13[%c0_39, %c0_40] : memref<22x128xf32, #tpu.memory_space<vmem>>, vector<22x128xf32>
      tpu.vector_store %arg13[%c0_39, %c0_40], %54 {strides = array<i32>} : memref<22x128xf32, #tpu.memory_space<vmem>>, vector<22x128xf32>,
      %56 = arith.index_cast %arg2 : i32 to index
      %c2 = arith.constant 2 : index
      %c0_41 = arith.constant 0 : index
      %c0_42 = arith.constant 0 : index
      %57 = vector.load %arg10[%56, %c2, %c0_41, %c0_42] : memref<3x9x128x128xbf16, #tpu.memory_space<vmem>>, vector<1x1x128x128xbf16>
      %58 = vector.shape_cast %57 : vector<1x1x128x128xbf16> to vector<128x128xbf16>
      %c0_43 = arith.constant 0 : index
      %c0_44 = arith.constant 0 : index
      %59 = vector.load %arg13[%c0_43, %c0_44] : memref<22x128xf32, #tpu.memory_space<vmem>>, vector<22x128xf32>
      %c2_45 = arith.constant 2 : index
      %c0_46 = arith.constant 0 : index
      %60 = vector.load %arg12[%c2_45, %c0_46] : memref<36x128xbf16, #tpu.memory_space<vmem>>, vector<22x128xbf16>
      %cst_47 = arith.constant dense<0.000000e+00> : vector<22x128xf32>
      %61 = tpu.matmul %60, %58, %cst_47 {dimension_numbers = #tpu.dot_dimension_numbers<[1], [0], [0], [1], [0, 0, 1, 1], [], []>} : vector<22x128xbf16>, vector<128x128xbf16>, vector<22x128xf32> -> vector<22x128xf32>
      %62 = arith.addf %59, %61 : vector<22x128xf32>
      %c0_48 = arith.constant 0 : index
      %c0_49 = arith.constant 0 : index
      %63 = vector.load %arg13[%c0_48, %c0_49] : memref<22x128xf32, #tpu.memory_space<vmem>>, vector<22x128xf32>
      tpu.vector_store %arg13[%c0_48, %c0_49], %62 {strides = array<i32>} : memref<22x128xf32, #tpu.memory_space<vmem>>, vector<22x128xf32>,
      %64 = arith.index_cast %arg2 : i32 to index
      %c3 = arith.constant 3 : index
      %c0_50 = arith.constant 0 : index
      %c0_51 = arith.constant 0 : index
      %65 = vector.load %arg10[%64, %c3, %c0_50, %c0_51] : memref<3x9x128x128xbf16, #tpu.memory_space<vmem>>, vector<1x1x128x128xbf16>
      %66 = vector.shape_cast %65 : vector<1x1x128x128xbf16> to vector<128x128xbf16>
      %c0_52 = arith.constant 0 : index
      %c0_53 = arith.constant 0 : index
      %67 = vector.load %arg13[%c0_52, %c0_53] : memref<22x128xf32, #tpu.memory_space<vmem>>, vector<22x128xf32>
      %c6 = arith.constant 6 : index
      %c0_54 = arith.constant 0 : index
      %68 = vector.load %arg12[%c6, %c0_54] : memref<36x128xbf16, #tpu.memory_space<vmem>>, vector<22x128xbf16>
      %cst_55 = arith.constant dense<0.000000e+00> : vector<22x128xf32>
      %69 = tpu.matmul %68, %66, %cst_55 {dimension_numbers = #tpu.dot_dimension_numbers<[1], [0], [0], [1], [0, 0, 1, 1], [], []>} : vector<22x128xbf16>, vector<128x128xbf16>, vector<22x128xf32> -> vector<22x128xf32>
      %70 = arith.addf %67, %69 : vector<22x128xf32>
      %c0_56 = arith.constant 0 : index
      %c0_57 = arith.constant 0 : index
      %71 = vector.load %arg13[%c0_56, %c0_57] : memref<22x128xf32, #tpu.memory_space<vmem>>, vector<22x128xf32>
      tpu.vector_store %arg13[%c0_56, %c0_57], %70 {strides = array<i32>} : memref<22x128xf32, #tpu.memory_space<vmem>>, vector<22x128xf32>,
      %72 = arith.index_cast %arg2 : i32 to index
      %c4 = arith.constant 4 : index
      %c0_58 = arith.constant 0 : index
      %c0_59 = arith.constant 0 : index
      %73 = vector.load %arg10[%72, %c4, %c0_58, %c0_59] : memref<3x9x128x128xbf16, #tpu.memory_space<vmem>>, vector<1x1x128x128xbf16>
      %74 = vector.shape_cast %73 : vector<1x1x128x128xbf16> to vector<128x128xbf16>
      %c0_60 = arith.constant 0 : index
      %c0_61 = arith.constant 0 : index
      %75 = vector.load %arg13[%c0_60, %c0_61] : memref<22x128xf32, #tpu.memory_space<vmem>>, vector<22x128xf32>
      %c7 = arith.constant 7 : index
      %c0_62 = arith.constant 0 : index
      %76 = vector.load %arg12[%c7, %c0_62] : memref<36x128xbf16, #tpu.memory_space<vmem>>, vector<22x128xbf16>
      %cst_63 = arith.constant dense<0.000000e+00> : vector<22x128xf32>
      %77 = tpu.matmul %76, %74, %cst_63 {dimension_numbers = #tpu.dot_dimension_numbers<[1], [0], [0], [1], [0, 0, 1, 1], [], []>} : vector<22x128xbf16>, vector<128x128xbf16>, vector<22x128xf32> -> vector<22x128xf32>
      %78 = arith.addf %75, %77 : vector<22x128xf32>
      %c0_64 = arith.constant 0 : index
      %c0_65 = arith.constant 0 : index
      %79 = vector.load %arg13[%c0_64, %c0_65] : memref<22x128xf32, #tpu.memory_space<vmem>>, vector<22x128xf32>
      tpu.vector_store %arg13[%c0_64, %c0_65], %78 {strides = array<i32>} : memref<22x128xf32, #tpu.memory_space<vmem>>, vector<22x128xf32>,
      %80 = arith.index_cast %arg2 : i32 to index
      %c5 = arith.constant 5 : index
      %c0_66 = arith.constant 0 : index
      %c0_67 = arith.constant 0 : index
      %81 = vector.load %arg10[%80, %c5, %c0_66, %c0_67] : memref<3x9x128x128xbf16, #tpu.memory_space<vmem>>, vector<1x1x128x128xbf16>
      %82 = vector.shape_cast %81 : vector<1x1x128x128xbf16> to vector<128x128xbf16>
      %c0_68 = arith.constant 0 : index
      %c0_69 = arith.constant 0 : index
      %83 = vector.load %arg13[%c0_68, %c0_69] : memref<22x128xf32, #tpu.memory_space<vmem>>, vector<22x128xf32>
      %c8 = arith.constant 8 : index
      %c0_70 = arith.constant 0 : index
      %84 = vector.load %arg12[%c8, %c0_70] : memref<36x128xbf16, #tpu.memory_space<vmem>>, vector<22x128xbf16>
      %cst_71 = arith.constant dense<0.000000e+00> : vector<22x128xf32>
      %85 = tpu.matmul %84, %82, %cst_71 {dimension_numbers = #tpu.dot_dimension_numbers<[1], [0], [0], [1], [0, 0, 1, 1], [], []>} : vector<22x128xbf16>, vector<128x128xbf16>, vector<22x128xf32> -> vector<22x128xf32>
      %86 = arith.addf %83, %85 : vector<22x128xf32>
      %c0_72 = arith.constant 0 : index
      %c0_73 = arith.constant 0 : index
      %87 = vector.load %arg13[%c0_72, %c0_73] : memref<22x128xf32, #tpu.memory_space<vmem>>, vector<22x128xf32>
      tpu.vector_store %arg13[%c0_72, %c0_73], %86 {strides = array<i32>} : memref<22x128xf32, #tpu.memory_space<vmem>>, vector<22x128xf32>,
      %88 = arith.index_cast %arg2 : i32 to index
      %c6_74 = arith.constant 6 : index
      %c0_75 = arith.constant 0 : index
      %c0_76 = arith.constant 0 : index
      %89 = vector.load %arg10[%88, %c6_74, %c0_75, %c0_76] : memref<3x9x128x128xbf16, #tpu.memory_space<vmem>>, vector<1x1x128x128xbf16>
      %90 = vector.shape_cast %89 : vector<1x1x128x128xbf16> to vector<128x128xbf16>
      %c0_77 = arith.constant 0 : index
      %c0_78 = arith.constant 0 : index
      %91 = vector.load %arg13[%c0_77, %c0_78] : memref<22x128xf32, #tpu.memory_space<vmem>>, vector<22x128xf32>
      %c12 = arith.constant 12 : index
      %c0_79 = arith.constant 0 : index
      %92 = vector.load %arg12[%c12, %c0_79] : memref<36x128xbf16, #tpu.memory_space<vmem>>, vector<22x128xbf16>
      %cst_80 = arith.constant dense<0.000000e+00> : vector<22x128xf32>
      %93 = tpu.matmul %92, %90, %cst_80 {dimension_numbers = #tpu.dot_dimension_numbers<[1], [0], [0], [1], [0, 0, 1, 1], [], []>} : vector<22x128xbf16>, vector<128x128xbf16>, vector<22x128xf32> -> vector<22x128xf32>
      %94 = arith.addf %91, %93 : vector<22x128xf32>
      %c0_81 = arith.constant 0 : index
      %c0_82 = arith.constant 0 : index
      %95 = vector.load %arg13[%c0_81, %c0_82] : memref<22x128xf32, #tpu.memory_space<vmem>>, vector<22x128xf32>
      tpu.vector_store %arg13[%c0_81, %c0_82], %94 {strides = array<i32>} : memref<22x128xf32, #tpu.memory_space<vmem>>, vector<22x128xf32>,
      %96 = arith.index_cast %arg2 : i32 to index
      %c7_83 = arith.constant 7 : index
      %c0_84 = arith.constant 0 : index
      %c0_85 = arith.constant 0 : index
      %97 = vector.load %arg10[%96, %c7_83, %c0_84, %c0_85] : memref<3x9x128x128xbf16, #tpu.memory_space<vmem>>, vector<1x1x128x128xbf16>
      %98 = vector.shape_cast %97 : vector<1x1x128x128xbf16> to vector<128x128xbf16>
      %c0_86 = arith.constant 0 : index
      %c0_87 = arith.constant 0 : index
      %99 = vector.load %arg13[%c0_86, %c0_87] : memref<22x128xf32, #tpu.memory_space<vmem>>, vector<22x128xf32>
      %c13 = arith.constant 13 : index
      %c0_88 = arith.constant 0 : index
      %100 = vector.load %arg12[%c13, %c0_88] : memref<36x128xbf16, #tpu.memory_space<vmem>>, vector<22x128xbf16>
      %cst_89 = arith.constant dense<0.000000e+00> : vector<22x128xf32>
      %101 = tpu.matmul %100, %98, %cst_89 {dimension_numbers = #tpu.dot_dimension_numbers<[1], [0], [0], [1], [0, 0, 1, 1], [], []>} : vector<22x128xbf16>, vector<128x128xbf16>, vector<22x128xf32> -> vector<22x128xf32>
      %102 = arith.addf %99, %101 : vector<22x128xf32>
      %c0_90 = arith.constant 0 : index
      %c0_91 = arith.constant 0 : index
      %103 = vector.load %arg13[%c0_90, %c0_91] : memref<22x128xf32, #tpu.memory_space<vmem>>, vector<22x128xf32>
      tpu.vector_store %arg13[%c0_90, %c0_91], %102 {strides = array<i32>} : memref<22x128xf32, #tpu.memory_space<vmem>>, vector<22x128xf32>,
      %104 = arith.index_cast %arg2 : i32 to index
      %c8_92 = arith.constant 8 : index
      %c0_93 = arith.constant 0 : index
      %c0_94 = arith.constant 0 : index
      %105 = vector.load %arg10[%104, %c8_92, %c0_93, %c0_94] : memref<3x9x128x128xbf16, #tpu.memory_space<vmem>>, vector<1x1x128x128xbf16>
      %106 = vector.shape_cast %105 : vector<1x1x128x128xbf16> to vector<128x128xbf16>
      %c0_95 = arith.constant 0 : index
      %c0_96 = arith.constant 0 : index
      %107 = vector.load %arg13[%c0_95, %c0_96] : memref<22x128xf32, #tpu.memory_space<vmem>>, vector<22x128xf32>
      %c14 = arith.constant 14 : index
      %c0_97 = arith.constant 0 : index
      %108 = vector.load %arg12[%c14, %c0_97] : memref<36x128xbf16, #tpu.memory_space<vmem>>, vector<22x128xbf16>
      %cst_98 = arith.constant dense<0.000000e+00> : vector<22x128xf32>
      %109 = tpu.matmul %108, %106, %cst_98 {dimension_numbers = #tpu.dot_dimension_numbers<[1], [0], [0], [1], [0, 0, 1, 1], [], []>} : vector<22x128xbf16>, vector<128x128xbf16>, vector<22x128xf32> -> vector<22x128xf32>
      %110 = arith.addf %107, %109 : vector<22x128xf32>
      %c0_99 = arith.constant 0 : index
      %c0_100 = arith.constant 0 : index
      %111 = vector.load %arg13[%c0_99, %c0_100] : memref<22x128xf32, #tpu.memory_space<vmem>>, vector<22x128xf32>
      tpu.vector_store %arg13[%c0_99, %c0_100], %110 {strides = array<i32>} : memref<22x128xf32, #tpu.memory_space<vmem>>, vector<22x128xf32>,
    } else {
    }
    %c2_i32 = arith.constant 2 : i32
    %10 = arith.cmpi eq, %arg2, %c2_i32 : i32
    %11 = arith.extui %10 : i1 to i32
    %c0_i32_3 = arith.constant 0 : i32
    %12 = arith.cmpi ne, %11, %c0_i32_3 : i32
    scf.if %12 {
      %cst = arith.constant 0.000000e+00 : bf16
      %13 = vector.broadcast %cst : bf16 to vector<36x128xbf16>
      %c0 = arith.constant 0 : index
      %c0_4 = arith.constant 0 : index
      %c0_5 = arith.constant 0 : index
      %c0_6 = arith.constant 0 : index
      %14 = vector.load %arg11[%c0, %c0_4, %c0_5, %c0_6] : memref<1x1x36x128xbf16, #tpu.memory_space<vmem>>, vector<1x1x36x128xbf16>
      %15 = vector.shape_cast %14 : vector<1x1x36x128xbf16> to vector<36x128xbf16>
      %16 = vector.shape_cast %13 : vector<36x128xbf16> to vector<1x1x36x128xbf16>
      tpu.vector_store %arg11[%c0, %c0_4, %c0_5, %c0_6], %16 {strides = array<i32>} : memref<1x1x36x128xbf16, #tpu.memory_space<vmem>>, vector<1x1x36x128xbf16>,
      %c0_7 = arith.constant 0 : index
      %c0_8 = arith.constant 0 : index
      %17 = vector.load %arg13[%c0_7, %c0_8] : memref<22x128xf32, #tpu.memory_space<vmem>>, vector<22x128xf32>
      %c0_9 = arith.constant 0 : index
      %c0_10 = arith.constant 0 : index
      %18 = vector.load %arg9[%c0_9, %c0_10] : memref<22x1xf32, #tpu.memory_space<vmem>>, vector<22x1xf32>
      %19 = vector.broadcast %18 : vector<22x1xf32> to vector<22x128xf32>
      %20 = arith.mulf %17, %19 : vector<22x128xf32>
      %21 = arith.truncf %20 : vector<22x128xf32> to vector<22x128xbf16>
      %c0_11 = arith.constant 0 : index
      %c0_12 = arith.constant 0 : index
      %c7 = arith.constant 7 : index
      %c0_13 = arith.constant 0 : index
      %22 = vector.load %arg11[%c0_11, %c0_12, %c7, %c0_13] : memref<1x1x36x128xbf16, #tpu.memory_space<vmem>>, vector<1x1x22x128xbf16>
      %23 = vector.shape_cast %22 : vector<1x1x22x128xbf16> to vector<22x128xbf16>
      %24 = vector.shape_cast %21 : vector<22x128xbf16> to vector<1x1x22x128xbf16>
      tpu.vector_store %arg11[%c0_11, %c0_12, %c7, %c0_13], %24 {strides = array<i32>} : memref<1x1x36x128xbf16, #tpu.memory_space<vmem>>, vector<1x1x22x128xbf16>,
    } else {
    }
    return
  }
  func.func @transform_0(%arg0: i32, %arg1: i32, %arg2: i32) -> (i32, i32, i32, i32) {
    %0 = arith.addi %arg1, %arg2 : i32
    %c1_i32 = arith.constant 1 : i32
    %1 = arith.subi %0, %c1_i32 : i32
    %c0_i32 = arith.constant 0 : i32
    %c3_i32 = arith.constant 3 : i32
    %2 = arith.maxsi %c0_i32, %1 : i32
    %3 = arith.minsi %c3_i32, %2 : i32
    %c0_i32_0 = arith.constant 0 : i32
    %c0_i32_1 = arith.constant 0 : i32
    %c0_i32_2 = arith.constant 0 : i32
    return %arg0, %3, %c0_i32_0, %c0_i32_1 : i32, i32, i32, i32
  }
  func.func @transform_1(%arg0: i32, %arg1: i32, %arg2: i32) -> (i32, i32, i32) {
    %c0_i32 = arith.constant 0 : i32
    %c0_i32_0 = arith.constant 0 : i32
    %c0_i32_1 = arith.constant 0 : i32
    return %arg0, %c0_i32, %c0_i32_0 : i32, i32, i32
  }
  func.func @transform_2(%arg0: i32, %arg1: i32, %arg2: i32) -> (i32, i32, i32) {
    %c0_i32 = arith.constant 0 : i32
    %c0_i32_0 = arith.constant 0 : i32
    %c0_i32_1 = arith.constant 0 : i32
    return %arg0, %c0_i32, %c0_i32_0 : i32, i32, i32
  }
  func.func @transform_3(%arg0: i32, %arg1: i32, %arg2: i32) -> (i32, i32) {
    %c0_i32 = arith.constant 0 : i32
    %c0_i32_0 = arith.constant 0 : i32
    %c0_i32_1 = arith.constant 0 : i32
    return %c0_i32, %c0_i32_0 : i32, i32
  }
  func.func @transform_4(%arg0: i32, %arg1: i32, %arg2: i32) -> (i32, i32) {
    %c0_i32 = arith.constant 0 : i32
    %c0_i32_0 = arith.constant 0 : i32
    %c0_i32_1 = arith.constant 0 : i32
    return %c0_i32, %c0_i32_0 : i32, i32
  }
  func.func @transform_5(%arg0: i32, %arg1: i32, %arg2: i32) -> (i32, i32) {
    %c0_i32 = arith.constant 0 : i32
    %c0_i32_0 = arith.constant 0 : i32
    %c0_i32_1 = arith.constant 0 : i32
    return %c0_i32, %c0_i32_0 : i32, i32
  }
  func.func @transform_6(%arg0: i32, %arg1: i32, %arg2: i32) -> (i32, i32) {
    %c0_i32 = arith.constant 0 : i32
    %c0_i32_0 = arith.constant 0 : i32
    %c0_i32_1 = arith.constant 0 : i32
    return %c0_i32, %c0_i32_0 : i32, i32
  }
  func.func @transform_7(%arg0: i32, %arg1: i32, %arg2: i32) -> (i32, i32, i32, i32) {
    %c0_i32 = arith.constant 0 : i32
    %c0_i32_0 = arith.constant 0 : i32
    %c0_i32_1 = arith.constant 0 : i32
    %c0_i32_2 = arith.constant 0 : i32
    %c0_i32_3 = arith.constant 0 : i32
    return %c0_i32, %c0_i32_0, %c0_i32_1, %c0_i32_2 : i32, i32, i32, i32
  }
  func.func @transform_8(%arg0: i32, %arg1: i32, %arg2: i32) -> (i32, i32, i32, i32) {
    %c0_i32 = arith.constant 0 : i32
    %c0_i32_0 = arith.constant 0 : i32
    %c0_i32_1 = arith.constant 0 : i32
    return %arg0, %arg1, %c0_i32, %c0_i32_0 : i32, i32, i32, i32
  }
}

module attributes {stable_mosaic.version = 11 : i64} {
  func.func @_gn_conv_kernel(%arg0: i32, %arg1: i32, %arg2: i32, %arg3: memref<1x1x36x128xbf16, #tpu.memory_space<vmem>>, %arg4: memref<1x1x128xf32, #tpu.memory_space<vmem>>, %arg5: memref<1x1x128xf32, #tpu.memory_space<vmem>>, %arg6: memref<1x128xf32, #tpu.memory_space<vmem>>, %arg7: memref<1x128xf32, #tpu.memory_space<vmem>>, %arg8: memref<36x1xf32, #tpu.memory_space<vmem>>, %arg9: memref<22x1xf32, #tpu.memory_space<vmem>>, %arg10: memref<3x9x128x128xbf16, #tpu.memory_space<vmem>>, %arg11: memref<1x1x36x128xbf16, #tpu.memory_space<vmem>>, %arg12: memref<36x128xbf16, #tpu.memory_space<vmem>>, %arg13: memref<22x128xf32, #tpu.memory_space<vmem>>) attributes {dimension_semantics = [#tpu.dimension_semantics<parallel>, #tpu.dimension_semantics<parallel>, #tpu.dimension_semantics<arbitrary>], iteration_bounds = array<i64: 2, 4, 3>, scalar_prefetch = 0 : i64, scratch_operands = 2 : i64, tpu.core_type = #tpu.core_type<tc>, window_params = [{transform_indices = @transform_0, window_bounds = array<i64: 1, 1, 36, 128>}, {transform_indices = @transform_1, window_bounds = array<i64: 1, 1, 128>}, {transform_indices = @transform_2, window_bounds = array<i64: 1, 1, 128>}, {pipeline_mode = #tpu.pipeline_mode<synchronous>, transform_indices = @transform_3, window_bounds = array<i64: 1, 128>}, {pipeline_mode = #tpu.pipeline_mode<synchronous>, transform_indices = @transform_4, window_bounds = array<i64: 1, 128>}, {pipeline_mode = #tpu.pipeline_mode<synchronous>, transform_indices = @transform_5, window_bounds = array<i64: 36, 1>}, {pipeline_mode = #tpu.pipeline_mode<synchronous>, transform_indices = @transform_6, window_bounds = array<i64: 22, 1>}, {pipeline_mode = #tpu.pipeline_mode<synchronous>, transform_indices = @transform_7, window_bounds = array<i64: 3, 9, 128, 128>}, {transform_indices = @transform_8, window_bounds = array<i64: 1, 1, 36, 128>}]} {
    %c0_i32 = arith.constant 0 : i32
    %0 = arith.cmpi eq, %arg2, %c0_i32 : i32
    %1 = arith.extui %0 : i1 to i32
    %c0_i32_0 = arith.constant 0 : i32
    %2 = arith.cmpi ne, %1, %c0_i32_0 : i32
    scf.if %2 {
      %cst = arith.constant 0.000000e+00 : f32
      %13 = vector.broadcast %cst : f32 to vector<22x128xf32>
      %c0 = arith.constant 0 : index
      %c0_4 = arith.constant 0 : index
      %14 = vector.load %arg13[%c0, %c0_4] : memref<22x128xf32, #tpu.memory_space<vmem>>, vector<22x128xf32>
      tpu.vector_store %arg13[%c0, %c0_4], %13 {strides = array<i32>} : memref<22x128xf32, #tpu.memory_space<vmem>>, vector<22x128xf32>,
    } else {
    }
    %3 = arith.addi %arg1, %arg2 : i32
    %c1_i32 = arith.constant 1 : i32
    %4 = arith.subi %3, %c1_i32 : i32
    %c0_i32_1 = arith.constant 0 : i32
    %5 = arith.cmpi sge, %4, %c0_i32_1 : i32
    %c3_i32 = arith.constant 3 : i32
    %6 = arith.cmpi sle, %4, %c3_i32 : i32
    %7 = arith.andi %5, %6 : i1
    %8 = arith.extui %7 : i1 to i32
    %c0_i32_2 = arith.constant 0 : i32
    %9 = arith.cmpi ne, %8, %c0_i32_2 : i32
    scf.if %9 {
      %c0 = arith.constant 0 : index
      %c0_4 = arith.constant 0 : index
      %c0_5 = arith.constant 0 : index
      %c0_6 = arith.constant 0 : index
      %13 = vector.load %arg3[%c0, %c0_4, %c0_5, %c0_6] : memref<1x1x36x128xbf16, #tpu.memory_space<vmem>>, vector<1x1x36x128xbf16>
      %14 = vector.shape_cast %13 : vector<1x1x36x128xbf16> to vector<36x128xbf16>
      %15 = arith.extf %14 : vector<36x128xbf16> to vector<36x128xf32>
      %c0_7 = arith.constant 0 : index
      %c0_8 = arith.constant 0 : index
      %c0_9 = arith.constant 0 : index
      %16 = vector.load %arg4[%c0_7, %c0_8, %c0_9] : memref<1x1x128xf32, #tpu.memory_space<vmem>>, vector<1x1x128xf32>
      %17 = vector.shape_cast %16 : vector<1x1x128xf32> to vector<1x128xf32>
      %18 = vector.broadcast %17 : vector<1x128xf32> to vector<36x128xf32>
      %19 = arith.subf %15, %18 : vector<36x128xf32>
      %c0_10 = arith.constant 0 : index
      %c0_11 = arith.constant 0 : index
      %c0_12 = arith.constant 0 : index
      %20 = vector.load %arg5[%c0_10, %c0_11, %c0_12] : memref<1x1x128xf32, #tpu.memory_space<vmem>>, vector<1x1x128xf32>
      %21 = vector.shape_cast %20 : vector<1x1x128xf32> to vector<1x128xf32>
      %22 = vector.broadcast %21 : vector<1x128xf32> to vector<36x128xf32>
      %23 = arith.mulf %19, %22 : vector<36x128xf32>
      %c0_13 = arith.constant 0 : index
      %c0_14 = arith.constant 0 : index
      %24 = vector.load %arg6[%c0_13, %c0_14] : memref<1x128xf32, #tpu.memory_space<vmem>>, vector<1x128xf32>
      %25 = vector.broadcast %24 : vector<1x128xf32> to vector<36x128xf32>
      %26 = arith.mulf %23, %25 : vector<36x128xf32>
      %c0_15 = arith.constant 0 : index
      %c0_16 = arith.constant 0 : index
      %27 = vector.load %arg7[%c0_15, %c0_16] : memref<1x128xf32, #tpu.memory_space<vmem>>, vector<1x128xf32>
      %28 = vector.broadcast %27 : vector<1x128xf32> to vector<36x128xf32>
      %29 = arith.addf %26, %28 : vector<36x128xf32>
      %cst = arith.constant 0.000000e+00 : f32
      %30 = vector.broadcast %cst : f32 to vector<36x128xf32>
      %31 = arith.cmpf ogt, %29, %30 : vector<36x128xf32>
      %cst_17 = arith.constant 0.00999999977 : f32
      %32 = vector.broadcast %cst_17 : f32 to vector<36x128xf32>
      %33 = arith.mulf %32, %29 : vector<36x128xf32>
      %34 = arith.select %31, %29, %33 : vector<36x128xi1>, vector<36x128xf32>
      %c0_18 = arith.constant 0 : index
      %c0_19 = arith.constant 0 : index
      %35 = vector.load %arg8[%c0_18, %c0_19] : memref<36x1xf32, #tpu.memory_space<vmem>>, vector<36x1xf32>
      %36 = vector.broadcast %35 : vector<36x1xf32> to vector<36x128xf32>
      %37 = arith.mulf %34, %36 : vector<36x128xf32>
      %38 = arith.truncf %37 : vector<36x128xf32> to vector<36x128xbf16>
      %c0_20 = arith.constant 0 : index
      %c0_21 = arith.constant 0 : index
      %39 = vector.load %arg12[%c0_20, %c0_21] : memref<36x128xbf16, #tpu.memory_space<vmem>>, vector<36x128xbf16>
      tpu.vector_store %arg12[%c0_20, %c0_21], %38 {strides = array<i32>} : memref<36x128xbf16, #tpu.memory_space<vmem>>, vector<36x128xbf16>,
      %40 = arith.index_cast %arg2 : i32 to index
      %c0_22 = arith.constant 0 : index
      %c0_23 = arith.constant 0 : index
      %c0_24 = arith.constant 0 : index
      %41 = vector.load %arg10[%40, %c0_22, %c0_23, %c0_24] : memref<3x9x128x128xbf16, #tpu.memory_space<vmem>>, vector<1x1x128x128xbf16>
      %42 = vector.shape_cast %41 : vector<1x1x128x128xbf16> to vector<128x128xbf16>
      %c0_25 = arith.constant 0 : index
      %c0_26 = arith.constant 0 : index
      %43 = vector.load %arg13[%c0_25, %c0_26] : memref<22x128xf32, #tpu.memory_space<vmem>>, vector<22x128xf32>
      %c0_27 = arith.constant 0 : index
      %c0_28 = arith.constant 0 : index
      %44 = vector.load %arg12[%c0_27, %c0_28] : memref<36x128xbf16, #tpu.memory_space<vmem>>, vector<22x128xbf16>
      %cst_29 = arith.constant dense<0.000000e+00> : vector<22x128xf32>
      %45 = tpu.matmul %44, %42, %cst_29 {dimension_numbers = #tpu.dot_dimension_numbers<[1], [0], [0], [1], [0, 0, 1, 1], [], []>} : vector<22x128xbf16>, vector<128x128xbf16>, vector<22x128xf32> -> vector<22x128xf32>
      %46 = arith.addf %43, %45 : vector<22x128xf32>
      %c0_30 = arith.constant 0 : index
      %c0_31 = arith.constant 0 : index
      %47 = vector.load %arg13[%c0_30, %c0_31] : memref<22x128xf32, #tpu.memory_space<vmem>>, vector<22x128xf32>
      tpu.vector_store %arg13[%c0_30, %c0_31], %46 {strides = array<i32>} : memref<22x128xf32, #tpu.memory_space<vmem>>, vector<22x128xf32>,
      %48 = arith.index_cast %arg2 : i32 to index
      %c1 = arith.constant 1 : index
      %c0_32 = arith.constant 0 : index
      %c0_33 = arith.constant 0 : index
      %49 = vector.load %arg10[%48, %c1, %c0_32, %c0_33] : memref<3x9x128x128xbf16, #tpu.memory_space<vmem>>, vector<1x1x128x128xbf16>
      %50 = vector.shape_cast %49 : vector<1x1x128x128xbf16> to vector<128x128xbf16>
      %c0_34 = arith.constant 0 : index
      %c0_35 = arith.constant 0 : index
      %51 = vector.load %arg13[%c0_34, %c0_35] : memref<22x128xf32, #tpu.memory_space<vmem>>, vector<22x128xf32>
      %c1_36 = arith.constant 1 : index
      %c0_37 = arith.constant 0 : index
      %52 = vector.load %arg12[%c1_36, %c0_37] : memref<36x128xbf16, #tpu.memory_space<vmem>>, vector<22x128xbf16>
      %cst_38 = arith.constant dense<0.000000e+00> : vector<22x128xf32>
      %53 = tpu.matmul %52, %50, %cst_38 {dimension_numbers = #tpu.dot_dimension_numbers<[1], [0], [0], [1], [0, 0, 1, 1], [], []>} : vector<22x128xbf16>, vector<128x128xbf16>, vector<22x128xf32> -> vector<22x128xf32>
      %54 = arith.addf %51, %53 : vector<22x128xf32>
      %c0_39 = arith.constant 0 : index
      %c0_40 = arith.constant 0 : index
      %55 = vector.load %arg13[%c0_39, %c0_40] : memref<22x128xf32, #tpu.memory_space<vmem>>, vector<22x128xf32>
      tpu.vector_store %arg13[%c0_39, %c0_40], %54 {strides = array<i32>} : memref<22x128xf32, #tpu.memory_space<vmem>>, vector<22x128xf32>,
      %56 = arith.index_cast %arg2 : i32 to index
      %c2 = arith.constant 2 : index
      %c0_41 = arith.constant 0 : index
      %c0_42 = arith.constant 0 : index
      %57 = vector.load %arg10[%56, %c2, %c0_41, %c0_42] : memref<3x9x128x128xbf16, #tpu.memory_space<vmem>>, vector<1x1x128x128xbf16>
      %58 = vector.shape_cast %57 : vector<1x1x128x128xbf16> to vector<128x128xbf16>
      %c0_43 = arith.constant 0 : index
      %c0_44 = arith.constant 0 : index
      %59 = vector.load %arg13[%c0_43, %c0_44] : memref<22x128xf32, #tpu.memory_space<vmem>>, vector<22x128xf32>
      %c2_45 = arith.constant 2 : index
      %c0_46 = arith.constant 0 : index
      %60 = vector.load %arg12[%c2_45, %c0_46] : memref<36x128xbf16, #tpu.memory_space<vmem>>, vector<22x128xbf16>
      %cst_47 = arith.constant dense<0.000000e+00> : vector<22x128xf32>
      %61 = tpu.matmul %60, %58, %cst_47 {dimension_numbers = #tpu.dot_dimension_numbers<[1], [0], [0], [1], [0, 0, 1, 1], [], []>} : vector<22x128xbf16>, vector<128x128xbf16>, vector<22x128xf32> -> vector<22x128xf32>
      %62 = arith.addf %59, %61 : vector<22x128xf32>
      %c0_48 = arith.constant 0 : index
      %c0_49 = arith.constant 0 : index
      %63 = vector.load %arg13[%c0_48, %c0_49] : memref<22x128xf32, #tpu.memory_space<vmem>>, vector<22x128xf32>
      tpu.vector_store %arg13[%c0_48, %c0_49], %62 {strides = array<i32>} : memref<22x128xf32, #tpu.memory_space<vmem>>, vector<22x128xf32>,
      %64 = arith.index_cast %arg2 : i32 to index
      %c3 = arith.constant 3 : index
      %c0_50 = arith.constant 0 : index
      %c0_51 = arith.constant 0 : index
      %65 = vector.load %arg10[%64, %c3, %c0_50, %c0_51] : memref<3x9x128x128xbf16, #tpu.memory_space<vmem>>, vector<1x1x128x128xbf16>
      %66 = vector.shape_cast %65 : vector<1x1x128x128xbf16> to vector<128x128xbf16>
      %c0_52 = arith.constant 0 : index
      %c0_53 = arith.constant 0 : index
      %67 = vector.load %arg13[%c0_52, %c0_53] : memref<22x128xf32, #tpu.memory_space<vmem>>, vector<22x128xf32>
      %c6 = arith.constant 6 : index
      %c0_54 = arith.constant 0 : index
      %68 = vector.load %arg12[%c6, %c0_54] : memref<36x128xbf16, #tpu.memory_space<vmem>>, vector<22x128xbf16>
      %cst_55 = arith.constant dense<0.000000e+00> : vector<22x128xf32>
      %69 = tpu.matmul %68, %66, %cst_55 {dimension_numbers = #tpu.dot_dimension_numbers<[1], [0], [0], [1], [0, 0, 1, 1], [], []>} : vector<22x128xbf16>, vector<128x128xbf16>, vector<22x128xf32> -> vector<22x128xf32>
      %70 = arith.addf %67, %69 : vector<22x128xf32>
      %c0_56 = arith.constant 0 : index
      %c0_57 = arith.constant 0 : index
      %71 = vector.load %arg13[%c0_56, %c0_57] : memref<22x128xf32, #tpu.memory_space<vmem>>, vector<22x128xf32>
      tpu.vector_store %arg13[%c0_56, %c0_57], %70 {strides = array<i32>} : memref<22x128xf32, #tpu.memory_space<vmem>>, vector<22x128xf32>,
      %72 = arith.index_cast %arg2 : i32 to index
      %c4 = arith.constant 4 : index
      %c0_58 = arith.constant 0 : index
      %c0_59 = arith.constant 0 : index
      %73 = vector.load %arg10[%72, %c4, %c0_58, %c0_59] : memref<3x9x128x128xbf16, #tpu.memory_space<vmem>>, vector<1x1x128x128xbf16>
      %74 = vector.shape_cast %73 : vector<1x1x128x128xbf16> to vector<128x128xbf16>
      %c0_60 = arith.constant 0 : index
      %c0_61 = arith.constant 0 : index
      %75 = vector.load %arg13[%c0_60, %c0_61] : memref<22x128xf32, #tpu.memory_space<vmem>>, vector<22x128xf32>
      %c7 = arith.constant 7 : index
      %c0_62 = arith.constant 0 : index
      %76 = vector.load %arg12[%c7, %c0_62] : memref<36x128xbf16, #tpu.memory_space<vmem>>, vector<22x128xbf16>
      %cst_63 = arith.constant dense<0.000000e+00> : vector<22x128xf32>
      %77 = tpu.matmul %76, %74, %cst_63 {dimension_numbers = #tpu.dot_dimension_numbers<[1], [0], [0], [1], [0, 0, 1, 1], [], []>} : vector<22x128xbf16>, vector<128x128xbf16>, vector<22x128xf32> -> vector<22x128xf32>
      %78 = arith.addf %75, %77 : vector<22x128xf32>
      %c0_64 = arith.constant 0 : index
      %c0_65 = arith.constant 0 : index
      %79 = vector.load %arg13[%c0_64, %c0_65] : memref<22x128xf32, #tpu.memory_space<vmem>>, vector<22x128xf32>
      tpu.vector_store %arg13[%c0_64, %c0_65], %78 {strides = array<i32>} : memref<22x128xf32, #tpu.memory_space<vmem>>, vector<22x128xf32>,
      %80 = arith.index_cast %arg2 : i32 to index
      %c5 = arith.constant 5 : index
      %c0_66 = arith.constant 0 : index
      %c0_67 = arith.constant 0 : index
      %81 = vector.load %arg10[%80, %c5, %c0_66, %c0_67] : memref<3x9x128x128xbf16, #tpu.memory_space<vmem>>, vector<1x1x128x128xbf16>
      %82 = vector.shape_cast %81 : vector<1x1x128x128xbf16> to vector<128x128xbf16>
      %c0_68 = arith.constant 0 : index
      %c0_69 = arith.constant 0 : index
      %83 = vector.load %arg13[%c0_68, %c0_69] : memref<22x128xf32, #tpu.memory_space<vmem>>, vector<22x128xf32>
      %c8 = arith.constant 8 : index
      %c0_70 = arith.constant 0 : index
      %84 = vector.load %arg12[%c8, %c0_70] : memref<36x128xbf16, #tpu.memory_space<vmem>>, vector<22x128xbf16>
      %cst_71 = arith.constant dense<0.000000e+00> : vector<22x128xf32>
      %85 = tpu.matmul %84, %82, %cst_71 {dimension_numbers = #tpu.dot_dimension_numbers<[1], [0], [0], [1], [0, 0, 1, 1], [], []>} : vector<22x128xbf16>, vector<128x128xbf16>, vector<22x128xf32> -> vector<22x128xf32>
      %86 = arith.addf %83, %85 : vector<22x128xf32>
      %c0_72 = arith.constant 0 : index
      %c0_73 = arith.constant 0 : index
      %87 = vector.load %arg13[%c0_72, %c0_73] : memref<22x128xf32, #tpu.memory_space<vmem>>, vector<22x128xf32>
      tpu.vector_store %arg13[%c0_72, %c0_73], %86 {strides = array<i32>} : memref<22x128xf32, #tpu.memory_space<vmem>>, vector<22x128xf32>,
      %88 = arith.index_cast %arg2 : i32 to index
      %c6_74 = arith.constant 6 : index
      %c0_75 = arith.constant 0 : index
      %c0_76 = arith.constant 0 : index
      %89 = vector.load %arg10[%88, %c6_74, %c0_75, %c0_76] : memref<3x9x128x128xbf16, #tpu.memory_space<vmem>>, vector<1x1x128x128xbf16>
      %90 = vector.shape_cast %89 : vector<1x1x128x128xbf16> to vector<128x128xbf16>
      %c0_77 = arith.constant 0 : index
      %c0_78 = arith.constant 0 : index
      %91 = vector.load %arg13[%c0_77, %c0_78] : memref<22x128xf32, #tpu.memory_space<vmem>>, vector<22x128xf32>
      %c12 = arith.constant 12 : index
      %c0_79 = arith.constant 0 : index
      %92 = vector.load %arg12[%c12, %c0_79] : memref<36x128xbf16, #tpu.memory_space<vmem>>, vector<22x128xbf16>
      %cst_80 = arith.constant dense<0.000000e+00> : vector<22x128xf32>
      %93 = tpu.matmul %92, %90, %cst_80 {dimension_numbers = #tpu.dot_dimension_numbers<[1], [0], [0], [1], [0, 0, 1, 1], [], []>} : vector<22x128xbf16>, vector<128x128xbf16>, vector<22x128xf32> -> vector<22x128xf32>
      %94 = arith.addf %91, %93 : vector<22x128xf32>
      %c0_81 = arith.constant 0 : index
      %c0_82 = arith.constant 0 : index
      %95 = vector.load %arg13[%c0_81, %c0_82] : memref<22x128xf32, #tpu.memory_space<vmem>>, vector<22x128xf32>
      tpu.vector_store %arg13[%c0_81, %c0_82], %94 {strides = array<i32>} : memref<22x128xf32, #tpu.memory_space<vmem>>, vector<22x128xf32>,
      %96 = arith.index_cast %arg2 : i32 to index
      %c7_83 = arith.constant 7 : index
      %c0_84 = arith.constant 0 : index
      %c0_85 = arith.constant 0 : index
      %97 = vector.load %arg10[%96, %c7_83, %c0_84, %c0_85] : memref<3x9x128x128xbf16, #tpu.memory_space<vmem>>, vector<1x1x128x128xbf16>
      %98 = vector.shape_cast %97 : vector<1x1x128x128xbf16> to vector<128x128xbf16>
      %c0_86 = arith.constant 0 : index
      %c0_87 = arith.constant 0 : index
      %99 = vector.load %arg13[%c0_86, %c0_87] : memref<22x128xf32, #tpu.memory_space<vmem>>, vector<22x128xf32>
      %c13 = arith.constant 13 : index
      %c0_88 = arith.constant 0 : index
      %100 = vector.load %arg12[%c13, %c0_88] : memref<36x128xbf16, #tpu.memory_space<vmem>>, vector<22x128xbf16>
      %cst_89 = arith.constant dense<0.000000e+00> : vector<22x128xf32>
      %101 = tpu.matmul %100, %98, %cst_89 {dimension_numbers = #tpu.dot_dimension_numbers<[1], [0], [0], [1], [0, 0, 1, 1], [], []>} : vector<22x128xbf16>, vector<128x128xbf16>, vector<22x128xf32> -> vector<22x128xf32>
      %102 = arith.addf %99, %101 : vector<22x128xf32>
      %c0_90 = arith.constant 0 : index
      %c0_91 = arith.constant 0 : index
      %103 = vector.load %arg13[%c0_90, %c0_91] : memref<22x128xf32, #tpu.memory_space<vmem>>, vector<22x128xf32>
      tpu.vector_store %arg13[%c0_90, %c0_91], %102 {strides = array<i32>} : memref<22x128xf32, #tpu.memory_space<vmem>>, vector<22x128xf32>,
      %104 = arith.index_cast %arg2 : i32 to index
      %c8_92 = arith.constant 8 : index
      %c0_93 = arith.constant 0 : index
      %c0_94 = arith.constant 0 : index
      %105 = vector.load %arg10[%104, %c8_92, %c0_93, %c0_94] : memref<3x9x128x128xbf16, #tpu.memory_space<vmem>>, vector<1x1x128x128xbf16>
      %106 = vector.shape_cast %105 : vector<1x1x128x128xbf16> to vector<128x128xbf16>
      %c0_95 = arith.constant 0 : index
      %c0_96 = arith.constant 0 : index
      %107 = vector.load %arg13[%c0_95, %c0_96] : memref<22x128xf32, #tpu.memory_space<vmem>>, vector<22x128xf32>
      %c14 = arith.constant 14 : index
      %c0_97 = arith.constant 0 : index
      %108 = vector.load %arg12[%c14, %c0_97] : memref<36x128xbf16, #tpu.memory_space<vmem>>, vector<22x128xbf16>
      %cst_98 = arith.constant dense<0.000000e+00> : vector<22x128xf32>
      %109 = tpu.matmul %108, %106, %cst_98 {dimension_numbers = #tpu.dot_dimension_numbers<[1], [0], [0], [1], [0, 0, 1, 1], [], []>} : vector<22x128xbf16>, vector<128x128xbf16>, vector<22x128xf32> -> vector<22x128xf32>
      %110 = arith.addf %107, %109 : vector<22x128xf32>
      %c0_99 = arith.constant 0 : index
      %c0_100 = arith.constant 0 : index
      %111 = vector.load %arg13[%c0_99, %c0_100] : memref<22x128xf32, #tpu.memory_space<vmem>>, vector<22x128xf32>
      tpu.vector_store %arg13[%c0_99, %c0_100], %110 {strides = array<i32>} : memref<22x128xf32, #tpu.memory_space<vmem>>, vector<22x128xf32>,
    } else {
    }
    %c2_i32 = arith.constant 2 : i32
    %10 = arith.cmpi eq, %arg2, %c2_i32 : i32
    %11 = arith.extui %10 : i1 to i32
    %c0_i32_3 = arith.constant 0 : i32
    %12 = arith.cmpi ne, %11, %c0_i32_3 : i32
    scf.if %12 {
      %cst = arith.constant 0.000000e+00 : bf16
      %13 = vector.broadcast %cst : bf16 to vector<36x128xbf16>
      %c0 = arith.constant 0 : index
      %c0_4 = arith.constant 0 : index
      %c0_5 = arith.constant 0 : index
      %c0_6 = arith.constant 0 : index
      %14 = vector.load %arg11[%c0, %c0_4, %c0_5, %c0_6] : memref<1x1x36x128xbf16, #tpu.memory_space<vmem>>, vector<1x1x36x128xbf16>
      %15 = vector.shape_cast %14 : vector<1x1x36x128xbf16> to vector<36x128xbf16>
      %16 = vector.shape_cast %13 : vector<36x128xbf16> to vector<1x1x36x128xbf16>
      tpu.vector_store %arg11[%c0, %c0_4, %c0_5, %c0_6], %16 {strides = array<i32>} : memref<1x1x36x128xbf16, #tpu.memory_space<vmem>>, vector<1x1x36x128xbf16>,
      %c0_7 = arith.constant 0 : index
      %c0_8 = arith.constant 0 : index
      %17 = vector.load %arg13[%c0_7, %c0_8] : memref<22x128xf32, #tpu.memory_space<vmem>>, vector<22x128xf32>
      %c0_9 = arith.constant 0 : index
      %c0_10 = arith.constant 0 : index
      %18 = vector.load %arg9[%c0_9, %c0_10] : memref<22x1xf32, #tpu.memory_space<vmem>>, vector<22x1xf32>
      %19 = vector.broadcast %18 : vector<22x1xf32> to vector<22x128xf32>
      %20 = arith.mulf %17, %19 : vector<22x128xf32>
      %21 = arith.truncf %20 : vector<22x128xf32> to vector<22x128xbf16>
      %c0_11 = arith.constant 0 : index
      %c0_12 = arith.constant 0 : index
      %c7 = arith.constant 7 : index
      %c0_13 = arith.constant 0 : index
      %22 = vector.load %arg11[%c0_11, %c0_12, %c7, %c0_13] : memref<1x1x36x128xbf16, #tpu.memory_space<vmem>>, vector<1x1x22x128xbf16>
      %23 = vector.shape_cast %22 : vector<1x1x22x128xbf16> to vector<22x128xbf16>
      %24 = vector.shape_cast %21 : vector<22x128xbf16> to vector<1x1x22x128xbf16>
      tpu.vector_store %arg11[%c0_11, %c0_12, %c7, %c0_13], %24 {strides = array<i32>} : memref<1x1x36x128xbf16, #tpu.memory_space<vmem>>, vector<1x1x22x128xbf16>,
    } else {
    }
    return
  }
  func.func @transform_0(%arg0: i32, %arg1: i32, %arg2: i32) -> (i32, i32, i32, i32) {
    %0 = arith.addi %arg1, %arg2 : i32
    %c1_i32 = arith.constant 1 : i32
    %1 = arith.subi %0, %c1_i32 : i32
    %c0_i32 = arith.constant 0 : i32
    %c3_i32 = arith.constant 3 : i32
    %2 = arith.maxsi %c0_i32, %1 : i32
    %3 = arith.minsi %c3_i32, %2 : i32
    %c0_i32_0 = arith.constant 0 : i32
    %c0_i32_1 = arith.constant 0 : i32
    %c0_i32_2 = arith.constant 0 : i32
    return %arg0, %3, %c0_i32_0, %c0_i32_1 : i32, i32, i32, i32
  }
  func.func @transform_1(%arg0: i32, %arg1: i32, %arg2: i32) -> (i32, i32, i32) {
    %c0_i32 = arith.constant 0 : i32
    %c0_i32_0 = arith.constant 0 : i32
    %c0_i32_1 = arith.constant 0 : i32
    return %arg0, %c0_i32, %c0_i32_0 : i32, i32, i32
  }
  func.func @transform_2(%arg0: i32, %arg1: i32, %arg2: i32) -> (i32, i32, i32) {
    %c0_i32 = arith.constant 0 : i32
    %c0_i32_0 = arith.constant 0 : i32
    %c0_i32_1 = arith.constant 0 : i32
    return %arg0, %c0_i32, %c0_i32_0 : i32, i32, i32
  }
  func.func @transform_3(%arg0: i32, %arg1: i32, %arg2: i32) -> (i32, i32) {
    %c0_i32 = arith.constant 0 : i32
    %c0_i32_0 = arith.constant 0 : i32
    %c0_i32_1 = arith.constant 0 : i32
    return %c0_i32, %c0_i32_0 : i32, i32
  }
  func.func @transform_4(%arg0: i32, %arg1: i32, %arg2: i32) -> (i32, i32) {
    %c0_i32 = arith.constant 0 : i32
    %c0_i32_0 = arith.constant 0 : i32
    %c0_i32_1 = arith.constant 0 : i32
    return %c0_i32, %c0_i32_0 : i32, i32
  }
  func.func @transform_5(%arg0: i32, %arg1: i32, %arg2: i32) -> (i32, i32) {
    %c0_i32 = arith.constant 0 : i32
    %c0_i32_0 = arith.constant 0 : i32
    %c0_i32_1 = arith.constant 0 : i32
    return %c0_i32, %c0_i32_0 : i32, i32
  }
  func.func @transform_6(%arg0: i32, %arg1: i32, %arg2: i32) -> (i32, i32) {
    %c0_i32 = arith.constant 0 : i32
    %c0_i32_0 = arith.constant 0 : i32
    %c0_i32_1 = arith.constant 0 : i32
    return %c0_i32, %c0_i32_0 : i32, i32
  }
  func.func @transform_7(%arg0: i32, %arg1: i32, %arg2: i32) -> (i32, i32, i32, i32) {
    %c0_i32 = arith.constant 0 : i32
    %c0_i32_0 = arith.constant 0 : i32
    %c0_i32_1 = arith.constant 0 : i32
    %c0_i32_2 = arith.constant 0 : i32
    %c0_i32_3 = arith.constant 0 : i32
    return %c0_i32, %c0_i32_0, %c0_i32_1, %c0_i32_2 : i32, i32, i32, i32
  }
  func.func @transform_8(%arg0: i32, %arg1: i32, %arg2: i32) -> (i32, i32, i32, i32) {
    %c0_i32 = arith.constant 0 : i32
    %c0_i32_0 = arith.constant 0 : i32
    %c0_i32_1 = arith.constant 0 : i32
    return %arg0, %arg1, %c0_i32, %c0_i32_0 : i32, i32, i32, i32
  }
}

module attributes {stable_mosaic.version = 11 : i64} {
  func.func @_matmul_bias_kernel(%arg0: i32, %arg1: memref<288x128xbf16, #tpu.memory_space<vmem>>, %arg2: memref<128x128xbf16, #tpu.memory_space<vmem>>, %arg3: memref<1x128xf32, #tpu.memory_space<vmem>>, %arg4: memref<288x128xbf16, #tpu.memory_space<vmem>>) attributes {dimension_semantics = [#tpu.dimension_semantics<parallel>], iteration_bounds = array<i64: 1>, scalar_prefetch = 0 : i64, scratch_operands = 0 : i64, tpu.core_type = #tpu.core_type<tc>, window_params = [{transform_indices = @transform_0, window_bounds = array<i64: 288, 128>}, {pipeline_mode = #tpu.pipeline_mode<synchronous>, transform_indices = @transform_1, window_bounds = array<i64: 128, 128>}, {pipeline_mode = #tpu.pipeline_mode<synchronous>, transform_indices = @transform_2, window_bounds = array<i64: 1, 128>}, {transform_indices = @transform_3, window_bounds = array<i64: 288, 128>}]} {
    %c0 = arith.constant 0 : index
    %c0_0 = arith.constant 0 : index
    %0 = vector.load %arg1[%c0, %c0_0] : memref<288x128xbf16, #tpu.memory_space<vmem>>, vector<288x128xbf16>
    %c0_1 = arith.constant 0 : index
    %c0_2 = arith.constant 0 : index
    %1 = vector.load %arg2[%c0_1, %c0_2] : memref<128x128xbf16, #tpu.memory_space<vmem>>, vector<128x128xbf16>
    %cst = arith.constant dense<0.000000e+00> : vector<288x128xf32>
    %2 = tpu.matmul %0, %1, %cst {dimension_numbers = #tpu.dot_dimension_numbers<[1], [0], [0], [1], [0, 0, 1, 1], [], []>} : vector<288x128xbf16>, vector<128x128xbf16>, vector<288x128xf32> -> vector<288x128xf32>
    %c0_3 = arith.constant 0 : index
    %c0_4 = arith.constant 0 : index
    %3 = vector.load %arg3[%c0_3, %c0_4] : memref<1x128xf32, #tpu.memory_space<vmem>>, vector<1x128xf32>
    %4 = vector.broadcast %3 : vector<1x128xf32> to vector<288x128xf32>
    %5 = arith.addf %2, %4 : vector<288x128xf32>
    %6 = arith.truncf %5 : vector<288x128xf32> to vector<288x128xbf16>
    %c0_5 = arith.constant 0 : index
    %c0_6 = arith.constant 0 : index
    %7 = vector.load %arg4[%c0_5, %c0_6] : memref<288x128xbf16, #tpu.memory_space<vmem>>, vector<288x128xbf16>
    tpu.vector_store %arg4[%c0_5, %c0_6], %6 {strides = array<i32>} : memref<288x128xbf16, #tpu.memory_space<vmem>>, vector<288x128xbf16>,
    return
  }
  func.func @transform_0(%arg0: i32) -> (i32, i32) {
    %c0_i32 = arith.constant 0 : i32
    %c0_i32_0 = arith.constant 0 : i32
    return %arg0, %c0_i32 : i32, i32
  }
  func.func @transform_1(%arg0: i32) -> (i32, i32) {
    %c0_i32 = arith.constant 0 : i32
    %c0_i32_0 = arith.constant 0 : i32
    %c0_i32_1 = arith.constant 0 : i32
    return %c0_i32, %c0_i32_0 : i32, i32
  }
  func.func @transform_2(%arg0: i32) -> (i32, i32) {
    %c0_i32 = arith.constant 0 : i32
    %c0_i32_0 = arith.constant 0 : i32
    %c0_i32_1 = arith.constant 0 : i32
    return %c0_i32, %c0_i32_0 : i32, i32
  }
  func.func @transform_3(%arg0: i32) -> (i32, i32) {
    %c0_i32 = arith.constant 0 : i32
    %c0_i32_0 = arith.constant 0 : i32
    return %arg0, %c0_i32 : i32, i32
  }
}

</mosaic_0001>

<bundles_post_ra>
// kernel: decoder_forward.5
= control target key start
LH: loop header
LB: loop body
LE: loop exit
PB: predicated region body
PF: predicated region fallthrough
CT: control target
= control target key end

     0   :  { %s1138_s15 = smov 0   ;;  %s1140_s16 = smov 0   ;;  %s1312_s0 = inlined_call_operand.vmem [shape: bf16[2,4,36,128], index: 0, kind: input, shape index: {}]   ;;  %s1313_s1 = inlined_call_operand.vmem [shape: f32[128,15], index: 1, kind: input, shape index: {}]   ;;  %s1314_s2 = inlined_call_operand.vmem [shape: f32[15,128], index: 2, kind: input, shape index: {}]   ;;  %s1315_s3 = inlined_call_operand.vmem [shape: f32[2,1,128], index: 3, kind: output, shape index: {0}]   ;;  %s1316_s4 = inlined_call_operand.vmem [shape: f32[2,1,128], index: 4, kind: output, shape index: {1}]  }
   0x1   :  { %s1142_s17 = smov 0   ;;  %s1144_s18 = smov 0  }
   0x2   :  { %s1146_s19 = smov 0  }
   0x3 LB: > { %s24_s20 = sadd.s32 1, %s1097_s17  ;;  %s27_s21 = sadd.s32 1, %s1101_s18  ;;  %s1105_s19 = sphi %s1146_s19, %s15_s19   ;;  %s1101_s18 = sphi %s1144_s18, %s1320_s18   ;;  %s1097_s17 = sphi %s1142_s17, %s1319_s17   ;;  %s1093_s16 = sphi %s1140_s16, %s1318_s16   ;;  %s1089_s15 = sphi %s1138_s15, %s1317_s15  }
   0x4   : > { %p25_p0 = scmp.ge.s32.totalorder %s24_s20, 4  ;;  %p832_p1 = scmp.ge.s32.totalorder %s1105_s19, 1 }
   0x5   : > { %p183_p2 = scmp.lt.s32.totalorder %s1105_s19, 9 }
   0x6   : > { %s1322_s20 = smov (%p25_p0, %s24_s20), 0  ;;  %s1324_s21 = smov (!%p25_p0, %s27_s21), %s1101_s18 }
   0x7   : > { %p184_p3 = pnand %p832_p1, %p183_p2  ;;  %p29_p4 = scmp.ge.s32.totalorder %s1324_s21, 2 }
   0x8   : > { %p214_p5 = scmp.lt.s32.totalorder (!%p184_p3), %s1093_s16, 1  ;;  %p216_p6 = scmp.lt.s32.totalorder (!%p184_p3), %s1089_s15, 3 }
   0x9   : > { %s1326_s21 = smov (%p29_p4, %s1324_s21), 0  ;;  %187 = sbr.rel (%p184_p3) target bundleno = 681 (0x2a9), region = 32 }
   0xa   : > { %p834_p7 = scmp.ne.s32.totalorder (!%p184_p3), %s1089_s15, 0 }
   0xe   : > { %s1328_s16 = smov (!%p214_p5, %s1093_s16), 1 }
   0xf   : > { %s217_s22 = scalar_select %p216_p6, %s1089_s15, 3 }
  0x10   : > { %s1018_s23 = smul.u32 20, %s1328_s16  ;;  %s225_s26 = scalar_lea.vmem %s1315_s3, %s1328_s16 }
  0x11   : > { %s1017_s27 = smul.u32 5, %s217_s22  ;;  %s228_s30 = scalar_lea.vmem %s1316_s4, %s1328_s16 }
  0x12   : > { %232 = sbr.rel (%p834_p7) target bundleno = 25 (0x19), region = 36 }
  0x13   : > { %s220_s5 = sadd.s32 %s1018_s23, %s1017_s27 }
  0x14   : > { %s833_s6 = sshll.u32 %s220_s5, 2 }
  0x15   : > { %s222_s9 = scalar_lea.vmem %s1312_s0, %s833_s6 }
  0x17   : > { %v1107_v0 = vmov 0.0  }
  0x18   : > { %233 = vst [vmem:[#allocation2] sm:$0x1] %v1107_v0  ;;  %234 = vst [vmem:[#allocation3] sm:$0x1] %v1107_v0 }
  0x19 PF: > { %v239_v1 = vld [vmem:[%s222_s9 + $0x10] sm:$0x3]  ;;  %vm250_vm0 = vcmask 1043456   ;;  %v854_v2 = vld [vmem:[%s222_s9 + $0x8] sm:$0xff]   ;;  %v847_v3 = vld [vmem:[%s222_s9] sm:$0xff]   ;;  %v1108_v4 = vmov 0.0  }
  0x1a   : > { %907 = vmatprep.subr.mxu0 %v1108_v4  ;;  %v244_v5 = vunpack.c.l.bf16 %v239_v1  ;;  %920 = vmatprep.subr.mxu1 %v1108_v4  ;;  %v853_v6 = vunpack.c.h.bf16 %v854_v2  ;;  %v852_v7 = vunpack.c.l.bf16 %v854_v2  ;;  %v849_v10 = vunpack.c.h.bf16 %v847_v3  ;;  %p839_p8 = scmp.ne.s32.totalorder %s1089_s15, 3 }
  0x1b   : > { %vm1109_vm1 = vmmov 0   ;;  %v848_v12 = vunpack.c.l.bf16 %v847_v3  ;;  %vm246_vm2 = vcmask 293888   ;;  %v1110_v15 = vmov 1.0  }
  0x1c   : > { %908 = vmatpush3.msk.msra.mxu0 %vm250_vm0, %v244_v5  ;;  %v331_v8 = vmul.f32 %v244_v5, %v244_v5  ;;  %v330_v9 = vmul.f32 %v853_v6, %v853_v6  ;;  %917 = vmatprep.mubr.msk.f32.mxu0 %vm1109_vm1, %v1108_v4  ;;  %v329_v11 = vmul.f32 %v852_v7, %v852_v7 }
  0x1d   : > { %909 = vmatprep.subr.mxu0 %v1108_v4  ;;  %930 = vmatprep.mubr.msk.f32.mxu1 %vm1109_vm1, %v1108_v4  ;;  %v328_v13 = vmul.f32 %v849_v10, %v849_v10  ;;  %v327_v14 = vmul.f32 %v848_v12, %v848_v12 }
  0x1e   : > { %910 = vmatpush3.msra.mxu0 %v853_v6  ;;  %921 = vmatpush3.msk.msra.mxu1 %vm250_vm0, %v331_v8 }
  0x1f   : > { %911 = vmatprep.subr.mxu0 %v1108_v4  ;;  %922 = vmatprep.subr.mxu1 %v1108_v4  ;;  %v245_v16 = vld [vmem:[#allocation2] sm:$0x1]  ;;  %v326_v18 = vld [vmem:[#allocation3] sm:$0x1] }
  0x20   : > { %912 = vmatpush3.msra.mxu0 %v852_v7  ;;  %923 = vmatpush3.msra.mxu1 %v330_v9 }
  0x21   : > { %913 = vmatprep.subr.mxu0 %v1108_v4  ;;  %924 = vmatprep.subr.mxu1 %v1108_v4 }
  0x22   : > { %914 = vmatpush3.msra.mxu0 %v849_v10  ;;  %925 = vmatpush3.msra.mxu1 %v329_v11 }
  0x23   : > { %915 = vmatprep.subr.mxu0 %v1108_v4  ;;  %926 = vmatprep.subr.mxu1 %v1108_v4 }
  0x24   : > { %916 = vmatpush3.msra.mxu0 %v848_v12  ;;  %927 = vmatpush3.msra.mxu1 %v328_v13 }
  0x25   : > { %918 = vmatmul.mubr.msk.f32.vlgmr.msra.gmra.mxu0 %vm246_vm2, %v1110_v15  ;;  %928 = vmatprep.subr.mxu1 %v1108_v4 }
  0x26   : > { %929 = vmatpush3.msra.mxu1 %v327_v14 }
  0x27   : > { %931 = vmatmul.mubr.msk.f32.vlgmr.msra.gmra.mxu1 %vm246_vm2, %v1110_v15 }
  0xe5   : > { %v320_v17 = vpop.f32.mrf.mxu0 }
  0xe6   : > { %v324_v19 = vadd.f32 %v320_v17, %v245_v16  ;;  %410 = sbr.rel (%p839_p8) target bundleno = 681 (0x2a9), region = 40 }
  0xe7   : > { %v919_v20 = vpop.f32.mrf.mxu0  ;;  %v401_v21 = vpop.f32.mrf.mxu1 }
  0xe8   : > { %325 = vst [vmem:[#allocation2] sm:$0x1] %v324_v19  ;;  %v405_v22 = vadd.f32 %v401_v21, %v326_v18 }
  0xe9   : > { %v932_v23 = vpop.f32.mrf.mxu1 }
  0xea   : > { %406 = vst [vmem:[#allocation3] sm:$0x1] %v405_v22 }
  0xeb   : > { %v427_v24 = vld [vmem:[%s1313_s1 + $0x78] sm:$0xff]  ;;  %v1111_v25 = vmov 0.0   ;;  %v426_v26 = vld [vmem:[%s1313_s1 + $0x70] sm:$0xff]  ;;  %v425_v27 = vld [vmem:[%s1313_s1 + $0x68] sm:$0xff]  ;;  %vm1112_vm3 = vmmov 0   ;;  %vm582_vm4 = vcmask 1046528  }
  0xec   : > { %933 = vmatprep.subr.mxu0 %v1111_v25  ;;  %968 = vmatprep.subr.mxu1 %v1111_v25  ;;  %v424_v28 = vld [vmem:[%s1313_s1 + $0x60] sm:$0xff]  ;;  %v423_v29 = vld [vmem:[%s1313_s1 + $0x58] sm:$0xff]  ;;  %v422_v30 = vld [vmem:[%s1313_s1 + $0x50] sm:$0xff]  ;;  %vm578_vm5 = vcmask 121856  }
  0xed   : > { %934 = vmatpush3.msra.mxu0 %v427_v24  ;;  %969 = vmatpush3.msra.mxu1 %v427_v24  ;;  %v421_v31 = vld [vmem:[%s1313_s1 + $0x48] sm:$0xff]  ;;  %v420_v32 = vld [vmem:[%s1313_s1 + $0x40] sm:$0xff]  ;;  %v419_v33 = vld [vmem:[%s1313_s1 + $0x38] sm:$0xff] }
  0xee   : > { %935 = vmatprep.subr.mxu0 %v1111_v25  ;;  %970 = vmatprep.subr.mxu1 %v1111_v25  ;;  %v418_v34 = vld [vmem:[%s1313_s1 + $0x30] sm:$0xff]  ;;  %v417_v35 = vld [vmem:[%s1313_s1 + $0x28] sm:$0xff]  ;;  %v416_v36 = vld [vmem:[%s1313_s1 + $0x20] sm:$0xff] }
  0xef   : > { %936 = vmatpush3.msra.mxu0 %v426_v26  ;;  %971 = vmatpush3.msra.mxu1 %v426_v26  ;;  %v415_v37 = vld [vmem:[%s1313_s1 + $0x18] sm:$0xff]  ;;  %v414_v38 = vld [vmem:[%s1313_s1 + $0x10] sm:$0xff]  ;;  %v413_v39 = vld [vmem:[%s1313_s1 + $0x8] sm:$0xff] }
  0xf0   : > { %937 = vmatprep.subr.mxu0 %v1111_v25  ;;  %972 = vmatprep.subr.mxu1 %v1111_v25  ;;  %v412_v40 = vld [vmem:[%s1313_s1] sm:$0xff]  ;;  %v577_v43 = vld [vmem:[%s1314_s2 + $0x8] sm:$0x7f] }
  0xf1   : > { %938 = vmatpush3.msra.mxu0 %v425_v27  ;;  %973 = vmatpush3.msra.mxu1 %v425_v27  ;;  %v411_v41 = vld [vmem:[#allocation2] sm:$0x1]  ;;  %v498_v42 = vld [vmem:[#allocation3] sm:$0x1]  ;;  %v658_v45 = vld [vmem:[%s1314_s2 + $0x8] sm:$0x7f] }
  0xf2   : > { %939 = vmatprep.subr.mxu0 %v1111_v25  ;;  %974 = vmatprep.subr.mxu1 %v1111_v25  ;;  %v576_v44 = vld [vmem:[%s1314_s2] sm:$0xff] }
  0xf3   : > { %940 = vmatpush3.msra.mxu0 %v424_v28  ;;  %975 = vmatpush3.msra.mxu1 %v424_v28 }
  0xf4   : > { %941 = vmatprep.subr.mxu0 %v1111_v25  ;;  %976 = vmatprep.subr.mxu1 %v1111_v25 }
  0xf5   : > { %942 = vmatpush3.msra.mxu0 %v423_v29  ;;  %977 = vmatpush3.msra.mxu1 %v423_v29 }
  0xf6   : > { %943 = vmatprep.subr.mxu0 %v1111_v25  ;;  %978 = vmatprep.subr.mxu1 %v1111_v25 }
  0xf7   : > { %944 = vmatpush3.msra.mxu0 %v422_v30  ;;  %979 = vmatpush3.msra.mxu1 %v422_v30 }
  0xf8   : > { %945 = vmatprep.subr.mxu0 %v1111_v25  ;;  %980 = vmatprep.subr.mxu1 %v1111_v25 }
  0xf9   : > { %946 = vmatpush3.msra.mxu0 %v421_v31  ;;  %981 = vmatpush3.msra.mxu1 %v421_v31 }
  0xfa   : > { %947 = vmatprep.subr.mxu0 %v1111_v25  ;;  %982 = vmatprep.subr.mxu1 %v1111_v25 }
  0xfb   : > { %948 = vmatpush3.msra.mxu0 %v420_v32  ;;  %983 = vmatpush3.msra.mxu1 %v420_v32 }
  0xfc   : > { %949 = vmatprep.subr.mxu0 %v1111_v25  ;;  %984 = vmatprep.subr.mxu1 %v1111_v25 }
  0xfd   : > { %950 = vmatpush3.msra.mxu0 %v419_v33  ;;  %985 = vmatpush3.msra.mxu1 %v419_v33 }
  0xfe   : > { %951 = vmatprep.subr.mxu0 %v1111_v25  ;;  %986 = vmatprep.subr.mxu1 %v1111_v25 }
  0xff   : > { %952 = vmatpush3.msra.mxu0 %v418_v34  ;;  %987 = vmatpush3.msra.mxu1 %v418_v34 }
 0x100   : > { %953 = vmatprep.subr.mxu0 %v1111_v25  ;;  %988 = vmatprep.subr.mxu1 %v1111_v25 }
 0x101   : > { %954 = vmatpush3.msra.mxu0 %v417_v35  ;;  %989 = vmatpush3.msra.mxu1 %v417_v35 }
 0x102   : > { %955 = vmatprep.subr.mxu0 %v1111_v25  ;;  %990 = vmatprep.subr.mxu1 %v1111_v25 }
 0x103   : > { %956 = vmatpush3.msra.mxu0 %v416_v36  ;;  %991 = vmatpush3.msra.mxu1 %v416_v36 }
 0x104   : > { %957 = vmatprep.subr.mxu0 %v1111_v25  ;;  %992 = vmatprep.subr.mxu1 %v1111_v25 }
 0x105   : > { %958 = vmatpush3.msra.mxu0 %v415_v37  ;;  %993 = vmatpush3.msra.mxu1 %v415_v37 }
 0x106   : > { %959 = vmatprep.subr.mxu0 %v1111_v25  ;;  %994 = vmatprep.subr.mxu1 %v1111_v25 }
 0x107   : > { %960 = vmatpush3.msra.mxu0 %v414_v38  ;;  %995 = vmatpush3.msra.mxu1 %v414_v38 }
 0x108   : > { %961 = vmatprep.subr.mxu0 %v1111_v25  ;;  %996 = vmatprep.subr.mxu1 %v1111_v25 }
 0x109   : > { %962 = vmatpush3.msra.mxu0 %v413_v39  ;;  %997 = vmatpush3.msra.mxu1 %v413_v39 }
 0x10a   : > { %963 = vmatprep.subr.mxu0 %v1111_v25  ;;  %998 = vmatprep.subr.mxu1 %v1111_v25 }
 0x10b   : > { %964 = vmatpush3.msra.mxu0 %v412_v40  ;;  %965 = vmatprep.mubr.msk.f32.mxu0 %vm1112_vm3, %v1111_v25 }
 0x10c   : > { %999 = vmatpush3.msra.mxu1 %v412_v40  ;;  %1000 = vmatprep.mubr.msk.f32.mxu1 %vm1112_vm3, %v1111_v25 }
 0x10d   : > { %966 = vmatmul.mubr.f32.vlgmr.msra.gmra.mxu0 %v411_v41  ;;  %1001 = vmatmul.mubr.f32.vlgmr.msra.gmra.mxu1 %v498_v42 }
 0x10e   : > { %1003 = vmatprep.subr.mxu0 %v1111_v25  ;;  %1007 = vmatprep.mubr.msk.f32.mxu0 %vm1112_vm3, %v1111_v25 }
 0x10f   : > { %1010 = vmatprep.subr.mxu1 %v1111_v25  ;;  %1014 = vmatprep.mubr.msk.f32.mxu1 %vm1112_vm3, %v1111_v25 }
 0x110   : > { %1004 = vmatpush3.msk.msra.mxu0 %vm582_vm4, %v577_v43  ;;  %1011 = vmatpush3.msk.msra.mxu1 %vm582_vm4, %v658_v45 }
 0x111   : > { %1005 = vmatprep.subr.mxu0 %v1111_v25  ;;  %1012 = vmatprep.subr.mxu1 %v1111_v25 }
 0x112   : > { %1006 = vmatpush3.msra.mxu0 %v576_v44  ;;  %1013 = vmatpush3.msra.mxu1 %v576_v44 }
 0x1cd   : > { %v494_v46 = vpop.f32.mrf.mxu0  ;;  %v565_v47 = vpop.f32.mrf.mxu1 }
 0x1ce   : > { %v569_v48 = vmul.f32 0.0078125, %v494_v46  ;;  %v570_v49 = vmul.f32 0.0078125, %v565_v47 }
 0x1cf   : > { %v967_v50 = vpop.f32.mrf.mxu0  ;;  %v1002_v51 = vpop.f32.mrf.mxu1 }
 0x1d0   : > { %v571_v52 = vmul.f32 %v569_v48, %v569_v48  ;;  %1008 = vmatmul.mubr.msk.f32.vlgmr.msra.gmra.mxu0 %vm578_vm5, %v569_v48 }
 0x1d2   : > { %v572_v53 = vsub.f32 %v570_v49, %v571_v52 }
 0x1d4   : > { %v573_v54 = vmax.f32 %v572_v53, 0.0 }
 0x1d6   : > { %v574_v55 = vadd.f32 1e-05, %v573_v54 }
 0x1d8   : > { %1065 = vrsqrt.f32 %v574_v55 }
 0x1e5   : > { %v1066_v56 = vpop.eup %1065 }
 0x1e6   : > { %1015 = vmatmul.mubr.msk.f32.vlgmr.msra.gmra.mxu1 %vm578_vm5, %v1066_v56 }
 0x290   : > { %v652_v57 = vpop.f32.mrf.mxu0 }
 0x291   : > { %656 = vst [vmem:[%s225_s26] sm:$0x1] %v652_v57 }
 0x292   : > { %v1009_v58 = vpop.f32.mrf.mxu0 }
 0x2a6   : > { %v731_v59 = vpop.f32.mrf.mxu1 }
 0x2a7   : > { %735 = vst [vmem:[%s228_s30] sm:$0x1] %v731_v59 }
 0x2a8   : > { %v1016_v60 = vpop.f32.mrf.mxu1 }
 0x2a9 PF: > { %s15_s19 = sadd.s32 1, %s1105_s19   ;;  %s1317_s15 = smov %s1097_s17 }
 0x2aa   : > { %p12_p9 = scmp.ge.s32.totalorder %s15_s19, 10   ;;  %s1318_s16 = smov %s1101_s18 }
 0x2ab   : > { %s1319_s17 = smov %s1322_s20  ;;  %s1320_s18 = smov %s1326_s21 }
 0x2ac   :  { %14 = sbr.rel (!%p12_p9) target bundleno = 3 (0x3), region = 82 }

// kernel: decoder_forward.9
= control target key start
LH: loop header
LB: loop body
LE: loop exit
PB: predicated region body
PF: predicated region fallthrough
CT: control target
= control target key end

     0   :  { %s1110_s1 = inlined_call_operand.vmem [shape: bf16[128,128], index: 1, kind: input, shape index: {}]   ;;  %s1111_s0 = inlined_call_operand.vmem [shape: bf16[288,128], index: 0, kind: input, shape index: {}]   ;;  %s1112_s2 = inlined_call_operand.vmem [shape: f32[1,128], index: 2, kind: input, shape index: {}]   ;;  %s1113_s3 = inlined_call_operand.vmem [shape: bf16[288,128], index: 3, kind: output, shape index: {}]  }
   0x1   :  { %v891_v0 = vld [vmem:[%s1110_s1 + $0x38] sm:$0xff]   ;;  %v892_v1 = vld [vmem:[%s1110_s1 + $0x30] sm:$0xff]   ;;  %v893_v2 = vld [vmem:[%s1110_s1 + $0x28] sm:$0xff]  }
   0x2   :  { %823 = vmatprep.subr.bf16.mxu0 %v891_v0  ;;  %875 = vmatprep.subr.bf16.mxu1 %v891_v0  ;;  %v894_v3 = vld [vmem:[%s1110_s1 + $0x20] sm:$0xff]   ;;  %v901_v5 = vld [vmem:[%s1111_s0 + $0x50] sm:$0xff]   ;;  %v895_v6 = vld [vmem:[%s1110_s1 + $0x18] sm:$0xff]  }
   0x3   :  { %824 = vmatpush3.bf16.msra.mxu0 %v891_v0  ;;  %883 = vmatpush3.bf16.msra.mxu1 %v891_v0  ;;  %v899_v4 = vld [vmem:[%s1111_s0] sm:$0xff]   ;;  %v896_v7 = vld [vmem:[%s1110_s1 + $0x10] sm:$0xff]   ;;  %v897_v8 = vld [vmem:[%s1110_s1 + $0x8] sm:$0xff]  }
   0x4   :  { %825 = vmatprep.subr.bf16.mxu0 %v892_v1  ;;  %876 = vmatprep.subr.bf16.mxu1 %v892_v1  ;;  %v898_v9 = vld [vmem:[%s1110_s1] sm:$0xff]   ;;  %v900_v10 = vld [vmem:[%s1111_s0 + $0x8] sm:$0xff]   ;;  %v902_v11 = vld [vmem:[%s1111_s0 + $0x58] sm:$0xff]  }
   0x5   :  { %839 = vmatprep.mubr.bf16.mxu0 %v899_v4  ;;  %859 = vmatprep.mubr.bf16.mxu1 %v901_v5  ;;  %v903_v12 = vld [vmem:[%s1111_s0 + $0x10] sm:$0xff]   ;;  %v905_v13 = vld [vmem:[%s1111_s0 + $0x60] sm:$0xff]   ;;  %v904_v14 = vld [vmem:[%s1111_s0 + $0x18] sm:$0xff]  }
   0x6   :  { %v906_v15 = vld [vmem:[%s1111_s0 + $0x68] sm:$0xff]   ;;  %v907_v16 = vld [vmem:[%s1111_s0 + $0x20] sm:$0xff]   ;;  %v909_v17 = vld [vmem:[%s1111_s0 + $0x70] sm:$0xff]  }
   0x7   :  { %826 = vmatpush3.bf16.msra.mxu0 %v892_v1  ;;  %884 = vmatpush3.bf16.msra.mxu1 %v892_v1  ;;  %v908_v18 = vld [vmem:[%s1111_s0 + $0x28] sm:$0xff]   ;;  %v910_v19 = vld [vmem:[%s1111_s0 + $0x78] sm:$0xff]   ;;  %v911_v20 = vld [vmem:[%s1111_s0 + $0x30] sm:$0xff]  }
   0x8   :  { %827 = vmatprep.subr.bf16.mxu0 %v893_v2  ;;  %877 = vmatprep.subr.bf16.mxu1 %v893_v2  ;;  %v913_v21 = vld [vmem:[%s1111_s0 + $0x80] sm:$0xff]   ;;  %v912_v22 = vld [vmem:[%s1111_s0 + $0x38] sm:$0xff]   ;;  %v914_v23 = vld [vmem:[%s1111_s0 + $0x88] sm:$0xff]  }
   0x9   :  { %v915_v24 = vld [vmem:[%s1111_s0 + $0x40] sm:$0xff]   ;;  %v916_v25 = vld [vmem:[%s1111_s0 + $0x48] sm:$0xff]  }
   0xa   :  { %v1018_v28 = vld [vmem:[%s1112_s2] ss:$0 sm:$0xff] }
   0xb   :  { %828 = vmatpush3.bf16.msra.mxu0 %v893_v2  ;;  %885 = vmatpush3.bf16.msra.mxu1 %v893_v2 }
   0xc   :  { %829 = vmatprep.subr.bf16.mxu0 %v894_v3  ;;  %878 = vmatprep.subr.bf16.mxu1 %v894_v3 }
   0xf   :  { %830 = vmatpush3.bf16.msra.mxu0 %v894_v3  ;;  %886 = vmatpush3.bf16.msra.mxu1 %v894_v3 }
  0x10   :  { %831 = vmatprep.subr.bf16.mxu0 %v895_v6  ;;  %879 = vmatprep.subr.bf16.mxu1 %v895_v6 }
  0x13   :  { %832 = vmatpush3.bf16.msra.mxu0 %v895_v6  ;;  %887 = vmatpush3.bf16.msra.mxu1 %v895_v6 }
  0x14   :  { %833 = vmatprep.subr.bf16.mxu0 %v896_v7  ;;  %880 = vmatprep.subr.bf16.mxu1 %v896_v7 }
  0x17   :  { %834 = vmatpush3.bf16.msra.mxu0 %v896_v7  ;;  %888 = vmatpush3.bf16.msra.mxu1 %v896_v7 }
  0x18   :  { %835 = vmatprep.subr.bf16.mxu0 %v897_v8  ;;  %881 = vmatprep.subr.bf16.mxu1 %v897_v8 }
  0x1b   :  { %836 = vmatpush3.bf16.msra.mxu0 %v897_v8  ;;  %889 = vmatpush3.bf16.msra.mxu1 %v897_v8 }
  0x1c   :  { %837 = vmatprep.subr.bf16.mxu0 %v898_v9  ;;  %882 = vmatprep.subr.bf16.mxu1 %v898_v9 }
  0x1f   :  { %838 = vmatpush3.bf16.msra.mxu0 %v898_v9  ;;  %890 = vmatpush3.bf16.msra.mxu1 %v898_v9 }
  0x22   :  { %840 = vmatmul.mubr.bf16.vlgmr.msra.gmra.mxu0 %v900_v10  ;;  %860 = vmatmul.mubr.bf16.vlgmr.msra.gmra.mxu1 %v902_v11 }
  0x23   :  { %843 = vmatprep.mubr.bf16.mxu0 %v903_v12  ;;  %863 = vmatprep.mubr.bf16.mxu1 %v905_v13 }
  0x2a   :  { %844 = vmatmul.mubr.bf16.gmra.mxu0 %v904_v14  ;;  %864 = vmatmul.mubr.bf16.gmra.mxu1 %v906_v15 }
  0x2b   :  { %847 = vmatprep.mubr.bf16.mxu0 %v907_v16  ;;  %867 = vmatprep.mubr.bf16.mxu1 %v909_v17 }
  0x32   :  { %848 = vmatmul.mubr.bf16.gmra.mxu0 %v908_v18  ;;  %868 = vmatmul.mubr.bf16.gmra.mxu1 %v910_v19 }
  0x33   :  { %851 = vmatprep.mubr.bf16.mxu0 %v911_v20  ;;  %871 = vmatprep.mubr.bf16.mxu1 %v913_v21 }
  0x3a   :  { %852 = vmatmul.mubr.bf16.gmra.mxu0 %v912_v22  ;;  %872 = vmatmul.mubr.bf16.gmra.mxu1 %v914_v23 }
  0x3b   :  { %855 = vmatprep.mubr.bf16.mxu0 %v915_v24 }
  0x42   :  { %856 = vmatmul.mubr.bf16.gmra.mxu0 %v916_v25 }
  0xe2   :  { %v841_v26 = vpop.f32.mrf.mxu0  ;;  %v861_v27 = vpop.f32.mrf.mxu1 }
  0xe3   :  { %v353_v31 = vadd.f32 %v861_v27, %v1018_v28  ;;  %v273_v34 = vadd.f32 %v841_v26, %v1018_v28 }
  0xe4   :  { %v264_v29 = vpop.f32.mrf.mxu0  ;;  %v344_v30 = vpop.f32.mrf.mxu1 }
  0xe5   :  { %v345_v36 = vadd.f32 %v1018_v28, %v344_v30  ;;  %v265_v38 = vadd.f32 %v1018_v28, %v264_v29 }
  0xe6   :  { %v842_v32 = vpop.f32.mrf.mxu0  ;;  %v862_v33 = vpop.f32.mrf.mxu1 }
  0xe7   :  { %v276_v35 = vadd.f32 %v842_v32, %v1018_v28  ;;  %v356_v37 = vadd.f32 %v862_v33, %v1018_v28 }
  0xe8   :  { %v267_v39 = vpop.f32.mrf.mxu0  ;;  %v347_v40 = vpop.f32.mrf.mxu1 }
  0xe9   :  { %v698_v41 = vpack.c.bf16 %v276_v35, %v273_v34  ;;  %v268_v42 = vadd.f32 %v1018_v28, %v267_v39  ;;  %v748_v43 = vpack.c.bf16 %v356_v37, %v353_v31  ;;  %v348_v44 = vadd.f32 %v1018_v28, %v347_v40 }
  0xea   :  { %v845_v45 = vpop.f32.mrf.mxu0  ;;  %v865_v46 = vpop.f32.mrf.mxu1 }
  0xeb   :  { %780 = vst [vmem:[%s1113_s3 + $0x8] sm:$0xff] %v698_v41   ;;  %v693_v47 = vpack.c.bf16 %v268_v42, %v265_v38  ;;  %790 = vst [vmem:[%s1113_s3 + $0x58] sm:$0xff] %v748_v43   ;;  %v743_v48 = vpack.c.bf16 %v348_v44, %v345_v36  ;;  %v369_v51 = vadd.f32 %v865_v46, %v1018_v28 }
  0xec   :  { %v280_v49 = vpop.f32.mrf.mxu0  ;;  %v360_v50 = vpop.f32.mrf.mxu1  ;;  %v289_v54 = vadd.f32 %v845_v45, %v1018_v28 }
  0xed   :  { %694 = vst [vmem:[%s1113_s3] sm:$0xff] %v693_v47   ;;  %789 = vst [vmem:[%s1113_s3 + $0x50] sm:$0xff] %v743_v48   ;;  %v361_v56 = vadd.f32 %v1018_v28, %v360_v50  ;;  %v281_v58 = vadd.f32 %v1018_v28, %v280_v49 }
  0xee   :  { %v846_v52 = vpop.f32.mrf.mxu0  ;;  %v866_v53 = vpop.f32.mrf.mxu1 }
  0xef   :  { %v292_v55 = vadd.f32 %v846_v52, %v1018_v28  ;;  %v372_v57 = vadd.f32 %v866_v53, %v1018_v28 }
  0xf0   :  { %v283_v59 = vpop.f32.mrf.mxu0  ;;  %v363_v60 = vpop.f32.mrf.mxu1 }
  0xf1   :  { %v708_v61 = vpack.c.bf16 %v292_v55, %v289_v54  ;;  %v284_v62 = vadd.f32 %v1018_v28, %v283_v59  ;;  %v758_v63 = vpack.c.bf16 %v372_v57, %v369_v51  ;;  %v364_v0 = vadd.f32 %v1018_v28, %v363_v60 }
  0xf2   :  { %v849_v1 = vpop.f32.mrf.mxu0  ;;  %v869_v2 = vpop.f32.mrf.mxu1 }
  0xf3   :  { %782 = vst [vmem:[%s1113_s3 + $0x18] sm:$0xff] %v708_v61   ;;  %v703_v3 = vpack.c.bf16 %v284_v62, %v281_v58  ;;  %792 = vst [vmem:[%s1113_s3 + $0x68] sm:$0xff] %v758_v63   ;;  %v753_v4 = vpack.c.bf16 %v364_v0, %v361_v56  ;;  %v385_v7 = vadd.f32 %v869_v2, %v1018_v28 }
  0xf4   :  { %v296_v5 = vpop.f32.mrf.mxu0  ;;  %v376_v6 = vpop.f32.mrf.mxu1  ;;  %v305_v10 = vadd.f32 %v849_v1, %v1018_v28 }
  0xf5   :  { %781 = vst [vmem:[%s1113_s3 + $0x10] sm:$0xff] %v703_v3   ;;  %791 = vst [vmem:[%s1113_s3 + $0x60] sm:$0xff] %v753_v4   ;;  %v377_v12 = vadd.f32 %v1018_v28, %v376_v6  ;;  %v297_v14 = vadd.f32 %v1018_v28, %v296_v5 }
  0xf6   :  { %v850_v8 = vpop.f32.mrf.mxu0  ;;  %v870_v9 = vpop.f32.mrf.mxu1 }
  0xf7   :  { %v308_v11 = vadd.f32 %v850_v8, %v1018_v28  ;;  %v388_v13 = vadd.f32 %v870_v9, %v1018_v28 }
  0xf8   :  { %v299_v15 = vpop.f32.mrf.mxu0  ;;  %v379_v16 = vpop.f32.mrf.mxu1 }
  0xf9   :  { %v718_v17 = vpack.c.bf16 %v308_v11, %v305_v10  ;;  %v300_v18 = vadd.f32 %v1018_v28, %v299_v15  ;;  %v768_v19 = vpack.c.bf16 %v388_v13, %v385_v7  ;;  %v380_v20 = vadd.f32 %v1018_v28, %v379_v16 }
  0xfa   :  { %v853_v21 = vpop.f32.mrf.mxu0  ;;  %v873_v22 = vpop.f32.mrf.mxu1 }
  0xfb   :  { %784 = vst [vmem:[%s1113_s3 + $0x28] sm:$0xff] %v718_v17   ;;  %v713_v23 = vpack.c.bf16 %v300_v18, %v297_v14  ;;  %794 = vst [vmem:[%s1113_s3 + $0x78] sm:$0xff] %v768_v19   ;;  %v763_v24 = vpack.c.bf16 %v380_v20, %v377_v12  ;;  %v401_v27 = vadd.f32 %v873_v22, %v1018_v28 }
  0xfc   :  { %v312_v25 = vpop.f32.mrf.mxu0  ;;  %v392_v26 = vpop.f32.mrf.mxu1  ;;  %v321_v31 = vadd.f32 %v853_v21, %v1018_v28 }
  0xfd   :  { %783 = vst [vmem:[%s1113_s3 + $0x20] sm:$0xff] %v713_v23   ;;  %793 = vst [vmem:[%s1113_s3 + $0x70] sm:$0xff] %v763_v24   ;;  %v393_v33 = vadd.f32 %v1018_v28, %v392_v26  ;;  %v313_v35 = vadd.f32 %v1018_v28, %v312_v25 }
  0xfe   :  { %v854_v29 = vpop.f32.mrf.mxu0  ;;  %v874_v30 = vpop.f32.mrf.mxu1 }
  0xff   :  { %v324_v32 = vadd.f32 %v854_v29, %v1018_v28  ;;  %v404_v34 = vadd.f32 %v874_v30, %v1018_v28 }
 0x100   :  { %v315_v36 = vpop.f32.mrf.mxu0  ;;  %v395_v37 = vpop.f32.mrf.mxu1 }
 0x101   :  { %v728_v38 = vpack.c.bf16 %v324_v32, %v321_v31  ;;  %v316_v39 = vadd.f32 %v1018_v28, %v315_v36  ;;  %v778_v40 = vpack.c.bf16 %v404_v34, %v401_v27  ;;  %v396_v41 = vadd.f32 %v1018_v28, %v395_v37 }
 0x102   :  { %v857_v42 = vpop.f32.mrf.mxu0 }
 0x103   :  { %786 = vst [vmem:[%s1113_s3 + $0x38] sm:$0xff] %v728_v38   ;;  %v723_v43 = vpack.c.bf16 %v316_v39, %v313_v35  ;;  %796 = vst [vmem:[%s1113_s3 + $0x88] sm:$0xff] %v778_v40   ;;  %v773_v44 = vpack.c.bf16 %v396_v41, %v393_v33  ;;  %v337_v47 = vadd.f32 %v857_v42, %v1018_v28 }
 0x104   :  { %v328_v45 = vpop.f32.mrf.mxu0 }
 0x105   :  { %785 = vst [vmem:[%s1113_s3 + $0x30] sm:$0xff] %v723_v43   ;;  %795 = vst [vmem:[%s1113_s3 + $0x80] sm:$0xff] %v773_v44   ;;  %v329_v50 = vadd.f32 %v1018_v28, %v328_v45 }
 0x106   :  { %v858_v46 = vpop.f32.mrf.mxu0 }
 0x107   :  { %v340_v48 = vadd.f32 %v858_v46, %v1018_v28 }
 0x108   :  { %v331_v49 = vpop.f32.mrf.mxu0 }
 0x109   :  { %v738_v51 = vpack.c.bf16 %v340_v48, %v337_v47  ;;  %v332_v52 = vadd.f32 %v1018_v28, %v331_v49 }
 0x10b   :  { %788 = vst [vmem:[%s1113_s3 + $0x48] sm:$0xff] %v738_v51   ;;  %v733_v53 = vpack.c.bf16 %v332_v52, %v329_v50 }
 0x10d   :  { %787 = vst [vmem:[%s1113_s3 + $0x40] sm:$0xff] %v733_v53  }

// kernel: decoder_forward.8
= control target key start
LH: loop header
LB: loop body
LE: loop exit
PB: predicated region body
PF: predicated region fallthrough
CT: control target
= control target key end

     0   :  { %s2964_s27 = smov 0   ;;  %s2966_s28 = smov 0   ;;  %s3238_s0 = inlined_call_operand.vmem [shape: bf16[2,4,36,128], index: 0, kind: input, shape index: {}]   ;;  %s3239_s1 = inlined_call_operand.vmem [shape: f32[2,1,128], index: 1, kind: input, shape index: {}]   ;;  %s3240_s2 = inlined_call_operand.vmem [shape: f32[2,1,128], index: 2, kind: input, shape index: {}]   ;;  %s3241_s3 = inlined_call_operand.vmem [shape: f32[1,128], index: 3, kind: input, shape index: {}]   ;;  %s3242_s4 = inlined_call_operand.vmem [shape: f32[1,128], index: 4, kind: input, shape index: {}]   ;;  %s3243_s5 = inlined_call_operand.vmem [shape: f32[36,1], index: 5, kind: input, shape index: {}]   ;;  %s3244_s6 = inlined_call_operand.vmem [shape: f32[22,1], index: 6, kind: input, shape index: {}]   ;;  %s3245_s7 = inlined_call_operand.vmem [shape: bf16[3,9,128,128], index: 7, kind: input, shape index: {}]   ;;  %s3246_s8 = inlined_call_operand.vmem [shape: bf16[2,4,36,128], index: 8, kind: output, shape index: {}]  }
   0x1   :  { %s2968_s29 = smov 0   ;;  %s2970_s30 = smov 0  }
   0x2   :  { %s2972_s9 = smov 0   ;;  %s2974_s10 = smov 0  }
   0x3   :  { %s2976_s11 = smov 0  }
   0x4 LB: > { %3249 = sst [smem:[#allocation4_spill]] %s2906_s9  ;;  %s30_s12 = sadd.s32 1, %s2902_s30  ;;  %s2914_s11 = sphi %s2976_s11, %s18_s11   ;;  %s2910_s10 = sphi %s2974_s10, %s3259_s10   ;;  %s2906_s9 = sphi %s2972_s9, %s3258_s9   ;;  %s2902_s30 = sphi %s2970_s30, %s3261_s30   ;;  %s2898_s29 = sphi %s2968_s29, %s3256_s29   ;;  %s2894_s28 = sphi %s2966_s28, %s3255_s28   ;;  %s2890_s27 = sphi %s2964_s27, %s3260_s27  }
   0x5   : > { %3250 = sst [smem:[#allocation5_spill]] %s2910_s10  ;;  %p31_p0 = scmp.ge.s32.totalorder %s30_s12, 3 }
   0x6   : > { %s33_s13 = sadd.s32 1, %s2906_s9  ;;  %p2146_p1 = scmp.ge.s32.totalorder %s2914_s11, 1 }
   0x7   : > { %p329_p2 = scmp.lt.s32.totalorder %s2914_s11, 25  ;;  %s3263_s12 = smov (%p31_p0, %s30_s12), 0 }
   0x8   : > { %3251 = sst [smem:[#allocation6_spill]] %s3263_s12  ;;  %s3265_s13 = smov (!%p31_p0, %s33_s13), %s2906_s9 }
   0x9   : > { %p330_p3 = pnand %p2146_p1, %p329_p2  ;;  %p35_p4 = scmp.ge.s32.totalorder %s3265_s13, 4 }
   0xa   : > { %s37_s14 = sadd.s32 1, %s2910_s10  ;;  %s383_s15 = sadd.s32 (!%p330_p3), %s2890_s27, %s2894_s28 }
   0xb   : > { %s3267_s13 = smov (%p35_p4, %s3265_s13), 0  ;;  %s3269_s14 = smov (!%p35_p4, %s37_s14), %s2910_s10 }
   0xc   : > { %3252 = sst [smem:[#allocation7_spill]] %s3267_s13  ;;  %p39_p5 = scmp.ge.s32.totalorder %s3269_s14, 2 }
   0xd   : > { %333 = sbr.rel (%p330_p3) target bundleno = 668 (0x29c), region = 52  ;;  %p389_p6 = scmp.lt.s32.totalorder (!%p330_p3), %s2898_s29, 1 }
   0xe   : > { %s3271_s14 = smov (%p39_p5, %s3269_s14), 0  ;;  %s3012_s16 = sadd.s32 (!%p330_p3), 4294967295, %s383_s15 }
   0xf   : > { %3253 = sst [smem:[#allocation8_spill]] %s3271_s14  ;;  %p385_p7 = scmp.gt.s32.totalorder (!%p330_p3), %s3012_s16, 0 }
  0x10   : > { %p2148_p8 = scmp.lt.s32.totalorder (!%p330_p3), %s3012_s16, 3  ;;  %p412_p9 = scmp.lt.s32.totalorder (!%p330_p3), %s2894_s28, 3 }
  0x11   : > { %p2155_p11 = scmp.ne.s32.totalorder (!%p330_p3), %s2890_s27, 0 }
  0x12   : > { %s3273_s29 = smov (!%p389_p6, %s2898_s29), 1  ;;  %s3277_s28 = smov (!%p412_p9, %s2894_s28), 3 }
  0x13   : > { %s386_s17 = scalar_select %p385_p7, %s3012_s16, 0 }
  0x14   : > { %s409_s23 = scalar_lea.vmem %s3240_s2, %s3273_s29  ;;  %s2705_s24 = smul.u32 20, %s3273_s29 }
  0x15   : > { %s3275_s17 = smov (!%p2148_p8, %s386_s17), 3  ;;  %s2706_s25 = smul.u32 5, %s3277_s28 }
  0x16   : > { %p391_p10 = scmp.lt.s32.totalorder %s3275_s17, 3 }
  0x17   : > { %s416_s15 = sadd.s32 %s2706_s25, %s2705_s24 }
  0x18   : > { %s3279_s17 = smov (!%p391_p10, %s3275_s17), 3  ;;  %s2154_s13 = sshll.u32 %s416_s15, 2 }
  0x19   : > { %s2704_s26 = smul.u32 5, %s3279_s17  ;;  %s3033_s18 = scalar_lea.vmem %s3246_s8, %s2154_s13 }
  0x1a   : > { %423 = sbr.rel (%p2155_p11) target bundleno = 34 (0x22), region = 56 }
  0x1b   : > { %s395_s14 = sadd.s32 %s2705_s24, %s2704_s26 }
  0x1c   : > { %s2153_s12 = sshll.u32 %s395_s14, 2 }
  0x1d   : > { %s3038_s21 = scalar_lea.vmem %s3238_s0, %s2153_s12 }
  0x1f   : > { %v2916_v0 = vmov 0.0  }
  0x20   : > { %424 = vst [vmem:[#allocation3 + $0x10] sm:$0xff] %v2916_v0  ;;  %425 = vst [vmem:[#allocation3] sm:$0xff] %v2916_v0 }
  0x21   : > { %426 = vst [vmem:[#allocation3 + $0x8] sm:$0x3f] %v2916_v0 }
  0x22 PF: > { %p429_p12 = scmp.ge.s32.totalorder %s3012_s16, 0  ;;  %p430_p13 = scmp.le.s32.totalorder %s3012_s16, 3 }
  0x24   : > { %p431_p0 = pnand %p430_p13, %p429_p12 }
  0x25   : > { %s2410_s13 = smul.u32 (!%p431_p0), 576, %s2890_s27  ;;  %s3254_s9 = scalar_lea.vmem (!%p431_p0), %s3239_s1, %s3273_s29 }
  0x26   : > { %434 = sbr.rel (%p431_p0) target bundleno = 516 (0x204), region = 60 }
  0x27   : > { %s3059_s25 = scalar_lea.vmem (!%p431_p0), %s3245_s7, %s2410_s13 }
  0x2b   : > { %v510_v1 = vld [vmem:[%s3243_s5 + $0x10] sm:$0xff]  ;;  %v508_v2 = vld [vmem:[%s3243_s5] sm:$0xff]  ;;  %v2917_v3 = vmov 0   ;;  %v511_v4 = vld [vmem:[%s3243_s5 + $0x18] sm:$0xff]  ;;  %vm892_vm5 = vcmask 1046528   ;;  %vm1036_vm7 = vcmask 1044480  }
  0x2c   : > { %2767 = vset.pattern.permute.xlu1 %v2917_v3  ;;  %2766 = vset.pattern.permute.xlu0 %v2917_v3  ;;  %v509_v5 = vld [vmem:[%s3243_s5 + $0x8] sm:$0xff]  ;;  %v2768_v6 = vld [vmem:[%s3059_s25 + $0x38] sm:$0xff]   ;;  %v2769_v7 = vld [vmem:[%s3059_s25 + $0x30] sm:$0xff]   ;;  %vm739_vm6 = vsmask.f32 7424  ;;  %vm1475_vm9 = vcmask 1045504  }
  0x2d   : > { %525 = vperm.xlu1 %2767, %v510_v1   ;;  %515 = vperm.xlu0 %2766, %v508_v2   ;;  %v2770_v8 = vld [vmem:[%s3059_s25 + $0x78] sm:$0xff]   ;;  %v512_v9 = vld [vmem:[%s3243_s5 + $0x20] sm:$0xf]  ;;  %v2772_v10 = vld [vmem:[%s3059_s25 + $0x70] sm:$0xff]   ;;  %vm1180_vm8 = vsmask.f32 4352 }
  0x2e   : > { %2524 = vmatprep.subr.bf16.mxu0 %v2768_v6  ;;  %2544 = vmatprep.subr.bf16.mxu1 %v2770_v8  ;;  %v2771_v11 = vld [vmem:[%s3059_s25 + $0x28] sm:$0xff]   ;;  %v2773_v13 = vld [vmem:[%s3059_s25 + $0x20] sm:$0xff]   ;;  %v2775_v15 = vld [vmem:[%s3059_s25 + $0x18] sm:$0xff]   ;;  %vm1619_vm10 = vsmask.f32 5376 }
  0x2f   : > { %2525 = vmatpush3.bf16.msra.mxu0 %v2768_v6  ;;  %2545 = vmatpush3.bf16.msra.mxu1 %v2770_v8  ;;  %v2774_v12 = vld [vmem:[%s3059_s25 + $0x68] sm:$0xff]   ;;  %v2776_v14 = vld [vmem:[%s3059_s25 + $0x60] sm:$0xff]   ;;  %v2778_v16 = vld [vmem:[%s3059_s25 + $0x58] sm:$0xff]  }
  0x30   : > { %2526 = vmatprep.subr.bf16.mxu0 %v2769_v7  ;;  %2546 = vmatprep.subr.bf16.mxu1 %v2772_v10  ;;  %v2777_v17 = vld [vmem:[%s3059_s25 + $0x10] sm:$0xff]   ;;  %v2779_v19 = vld [vmem:[%s3059_s25 + $0x8] sm:$0xff]   ;;  %v2781_v21 = vld [vmem:[%s3059_s25] sm:$0xff]  }
  0x31   : > { %530 = vperm.xlu1 %2767, %v511_v4   ;;  %520 = vperm.xlu0 %2766, %v509_v5   ;;  %v2780_v18 = vld [vmem:[%s3059_s25 + $0x50] sm:$0xff]   ;;  %v2782_v20 = vld [vmem:[%s3059_s25 + $0x48] sm:$0xff]   ;;  %v2786_v22 = vld [vmem:[%s3059_s25 + $0x40] sm:$0xff]  }
  0x32   : > { %v3081_v23 = vld [vmem:[%s3059_s25 + $0xb8] sm:$0xff]   ;;  %v2432_v25 = vld [vmem:[%s3038_s21 + $0x8] sm:$0xff]   ;;  %v2415_v26 = vld [vmem:[%s3038_s21] sm:$0xff]  }
  0x33   : > { %2527 = vmatpush3.bf16.msra.mxu0 %v2769_v7  ;;  %2547 = vmatpush3.bf16.msra.mxu1 %v2772_v10  ;;  %v3084_v24 = vld [vmem:[%s3059_s25 + $0xf8] sm:$0xff]   ;;  %v2420_v27 = vunpack.c.l.bf16 %v2432_v25  ;;  %v2157_v28 = vld [vmem:[%s3254_s9] ss:$0 sm:$0xff]  ;;  %v2416_v29 = vunpack.c.l.bf16 %v2415_v26  ;;  %v2421_v30 = vunpack.c.h.bf16 %v2432_v25  ;;  %v2417_v31 = vunpack.c.h.bf16 %v2415_v26  ;;  %v439_v32 = vld [vmem:[%s3038_s21 + $0x10] sm:$0x3] }
  0x34   : > { %2528 = vmatprep.subr.bf16.mxu0 %v2771_v11  ;;  %2548 = vmatprep.subr.bf16.mxu1 %v2774_v12  ;;  %v2158_v34 = vld [vmem:[%s409_s23] ss:$0 sm:$0xff]  ;;  %v444_v38 = vunpack.c.l.bf16 %v439_v32 }
  0x35   : > { %535 = vperm.xlu0 %2766, %v512_v9   ;;  %v454_v33 = vsub.f32 %v2420_v27, %v2157_v28  ;;  %v452_v35 = vsub.f32 %v2416_v29, %v2157_v28  ;;  %v455_v36 = vsub.f32 %v2421_v30, %v2157_v28  ;;  %v453_v37 = vsub.f32 %v2417_v31, %v2157_v28  ;;  %v2159_v40 = vld [vmem:[%s3241_s3] ss:$0 sm:$0xff] }
  0x36   : > { %v456_v44 = vsub.f32 %v444_v38, %v2157_v28  ;;  %v2160_v46 = vld [vmem:[%s3242_s4] ss:$0 sm:$0xff]  ;;  %v2793_v28 = vld [vmem:[%s3059_s25 + $0xa8] sm:$0xff]  }
  0x37   : > { %2529 = vmatpush3.bf16.msra.mxu0 %v2771_v11  ;;  %2549 = vmatpush3.bf16.msra.mxu1 %v2774_v12  ;;  %v466_v39 = vmul.f32 %v2158_v34, %v454_v33  ;;  %v464_v41 = vmul.f32 %v2158_v34, %v452_v35  ;;  %v467_v42 = vmul.f32 %v2158_v34, %v455_v36  ;;  %v2797_v35 = vld [vmem:[%s3059_s25 + $0xa0] sm:$0xff]  }
  0x38   : > { %2530 = vmatprep.subr.bf16.mxu0 %v2773_v13  ;;  %2550 = vmatprep.subr.bf16.mxu1 %v2776_v14  ;;  %v465_v43 = vmul.f32 %v2158_v34, %v453_v37  ;;  %v468_v50 = vmul.f32 %v2158_v34, %v456_v44  ;;  %v2799_v44 = vld [vmem:[%s3059_s25 + $0x98] sm:$0xff]  }
  0x39   : > { %v478_v45 = vmul.f32 %v2159_v40, %v466_v39  ;;  %v476_v47 = vmul.f32 %v2159_v40, %v464_v41  ;;  %v479_v48 = vmul.f32 %v2159_v40, %v467_v42  ;;  %v2796_v42 = vld [vmem:[%s3059_s25 + $0xf0] sm:$0xff]  }
  0x3a   : > { %v477_v49 = vmul.f32 %v2159_v40, %v465_v43  ;;  %v480_v55 = vmul.f32 %v2159_v40, %v468_v50  ;;  %v2803_v50 = vld [vmem:[%s3059_s25 + $0x88] sm:$0xff]  }
  0x3b   : > { %2531 = vmatpush3.bf16.msra.mxu0 %v2773_v13  ;;  %2551 = vmatpush3.bf16.msra.mxu1 %v2776_v14  ;;  %v490_v51 = vadd.f32 %v2160_v46, %v478_v45  ;;  %v488_v52 = vadd.f32 %v2160_v46, %v476_v47  ;;  %v491_v53 = vadd.f32 %v2160_v46, %v479_v48  ;;  %v2798_v45 = vld [vmem:[%s3059_s25 + $0xe8] sm:$0xff]   ;;  %v2800_v47 = vld [vmem:[%s3059_s25 + $0xe0] sm:$0xff]  }
  0x3c   : > { %2532 = vmatprep.subr.bf16.mxu0 %v2775_v15  ;;  %2552 = vmatprep.subr.bf16.mxu1 %v2778_v16  ;;  %v489_v54 = vadd.f32 %v2160_v46, %v477_v49  ;;  %v492_v60 = vadd.f32 %v2160_v46, %v480_v55  ;;  %v2801_v46 = vld [vmem:[%s3059_s25 + $0x90] sm:$0xff]   ;;  %v2805_v55 = vld [vmem:[%s3059_s25 + $0x80] sm:$0xff]  }
  0x3d   : > { %vm495_vm0 = vcmp.gt.f32.partialorder %v490_v51, 0.0  ;;  %v500_v56 = vmul.f32 0.01, %v490_v51  ;;  %v498_v57 = vmul.f32 0.01, %v488_v52  ;;  %vm493_vm1 = vcmp.gt.f32.partialorder %v488_v52, 0.0 }
  0x3e   : > { %v501_v58 = vmul.f32 0.01, %v491_v53  ;;  %v499_v59 = vmul.f32 0.01, %v489_v54  ;;  %vm496_vm2 = vcmp.gt.f32.partialorder %v491_v53, 0.0  ;;  %vm494_vm3 = vcmp.gt.f32.partialorder %v489_v54, 0.0 }
  0x3f   : > { %2533 = vmatpush3.bf16.msra.mxu0 %v2775_v15  ;;  %2553 = vmatpush3.bf16.msra.mxu1 %v2778_v16  ;;  %v505_v63 = vsel %vm495_vm0, %v490_v51, %v500_v56  ;;  %v503_v0 = vsel %vm493_vm1, %v488_v52, %v498_v57  ;;  %v502_v3 = vmul.f32 0.01, %v492_v60  ;;  %vm497_vm4 = vcmp.gt.f32.partialorder %v492_v60, 0.0  ;;  %v2789_v16 = vld [vmem:[%s3059_s25 + $0xb0] sm:$0xff]  }
  0x40   : > { %2534 = vmatprep.subr.bf16.mxu0 %v2777_v17  ;;  %2554 = vmatprep.subr.bf16.mxu1 %v2780_v18  ;;  %v506_v1 = vsel %vm496_vm2, %v491_v53, %v501_v58  ;;  %v504_v2 = vsel %vm494_vm3, %v489_v54, %v499_v59  ;;  %v2804_v56 = vld [vmem:[%s3059_s25 + $0xd0] sm:$0xff]  }
  0x41   : > { %v507_v10 = vsel %vm497_vm4, %v492_v60, %v502_v3  ;;  %v2810_v3 = vld [vmem:[%s3059_s25 + $0xc0] sm:$0xff]  }
  0x43   : > { %2535 = vmatpush3.bf16.msra.mxu0 %v2777_v17  ;;  %2555 = vmatpush3.bf16.msra.mxu1 %v2780_v18 }
  0x44   : > { %2536 = vmatprep.subr.bf16.mxu0 %v2779_v19  ;;  %2556 = vmatprep.subr.bf16.mxu1 %v2782_v20 }
  0x47   : > { %2537 = vmatpush3.bf16.msra.mxu0 %v2779_v19  ;;  %2557 = vmatpush3.bf16.msra.mxu1 %v2782_v20 }
  0x48   : > { %2538 = vmatprep.subr.bf16.mxu0 %v2781_v21  ;;  %2558 = vmatprep.subr.bf16.mxu1 %v2786_v22 }
  0x4b   : > { %2539 = vmatpush3.bf16.msra.mxu0 %v2781_v21  ;;  %2559 = vmatpush3.bf16.msra.mxu1 %v2786_v22 }
  0x4c   : > { %2564 = vmatprep.subr.bf16.mxu0 %v3081_v23  ;;  %2584 = vmatprep.subr.bf16.mxu1 %v3084_v24 }
  0xa8   : > { %v526_v61 = vpop.permute.xlu1 %525  ;;  %v516_v62 = vpop.permute.xlu0 %515 }
  0xa9   : > { %v540_v6 = vmul.f32 %v526_v61, %v505_v63  ;;  %v538_v7 = vmul.f32 %v516_v62, %v503_v0  ;;  %v2807_v61 = vld [vmem:[%s3059_s25 + $0x138] sm:$0xff]   ;;  %v2806_v62 = vld [vmem:[%s3059_s25 + $0xc8] sm:$0xff]  }
  0xac   : > { %v531_v4 = vpop.permute.xlu1 %530  ;;  %v521_v5 = vpop.permute.xlu0 %520 }
  0xad   : > { %v541_v8 = vmul.f32 %v531_v4, %v506_v1  ;;  %v539_v9 = vmul.f32 %v521_v5, %v504_v2  ;;  %v2811_v1 = vld [vmem:[%s3059_s25 + $0x130] sm:$0xff]   ;;  %v2813_v4 = vld [vmem:[%s3059_s25 + $0x128] sm:$0xff]   ;;  %v2812_v5 = vld [vmem:[%s3059_s25 + $0x178] sm:$0xff]  }
  0xaf   : > { %v2430_v11 = vpack.c.bf16 %v541_v8, %v540_v6  ;;  %v2425_v12 = vpack.c.bf16 %v539_v9, %v538_v7  ;;  %v2816_v6 = vld [vmem:[%s3059_s25 + $0x120] sm:$0xff]   ;;  %v2815_v7 = vld [vmem:[%s3059_s25 + $0x170] sm:$0xff]   ;;  %v2818_v9 = vld [vmem:[%s3059_s25 + $0x118] sm:$0xff]  }
  0xb0   : > { %v536_v13 = vpop.permute.xlu0 %535 }
  0xb1   : > { %2433 = vst [vmem:[#allocation2 + $0x8] sm:$0xff] %v2430_v11   ;;  %2426 = vst [vmem:[#allocation2] sm:$0xff] %v2425_v12   ;;  %v542_v14 = vmul.f32 %v536_v13, %v507_v10  ;;  %v2817_v10 = vld [vmem:[%s3059_s25 + $0x168] sm:$0xff]   ;;  %v2820_v11 = vld [vmem:[%s3059_s25 + $0x110] sm:$0xff]  }
  0xb2   : > { %v2819_v12 = vld [vmem:[%s3059_s25 + $0x160] sm:$0xff]   ;;  %v2822_v13 = vld [vmem:[%s3059_s25 + $0x108] sm:$0xff]  }
  0xb3   : > { %v2409_v15 = vpack.c.bf16 %v542_v14, %v542_v14  ;;  %v2821_v14 = vld [vmem:[%s3059_s25 + $0x158] sm:$0xff]  }
  0xb5   : > { %568 = vst [vmem:[#allocation2 + $0x10] sm:$0x3] %v2409_v15  ;;  %v2824_v15 = vld [vmem:[%s3059_s25 + $0x100] sm:$0xff]  }
  0xb8   : > { %v2783_v17 = vld [vmem:[#allocation2] sm:$0xff]   ;;  %v2785_v18 = vld [vmem:[#allocation2 + $0x8] ss:$0 sps:$4 sm:$0x77]  }
  0xb9   : > { %v2790_v19 = vld [vmem:[#allocation2] sm:$0xff]   ;;  %2540 = vmatprep.mubr.bf16.mxu0 %v2783_v17  ;;  %v3108_v21 = vld [vmem:[#allocation2 + $0x8] ss:$0 sps:$4 sm:$0xff]  }
  0xba   : > { %2541 = vmatmul.mubr.bf16.vlgmr.msra.gmra.mxu0 %v2785_v18  ;;  %v2787_v20 = vld [vmem:[#allocation2] sm:$0xfe]   ;;  %v2791_v22 = vld [vmem:[#allocation2 + $0x8] ss:$0 sps:$4 sm:$0xff]   ;;  %v894_v26 = vrot.slane %v3108_v21, 1  ;;  %v743_v27 = vshll.u32 %v2790_v19, 16 }
  0xbb   : > { %2565 = vmatpush3.bf16.msra.mxu0 %v3081_v23  ;;  %v893_v25 = vrot.slane %v2787_v20, 1  ;;  %v748_v29 = vshll.u32 %v2791_v22, 16  ;;  %v741_v31 = vshrl.u32 %v2790_v19, 16  ;;  %v2794_v33 = vld [vmem:[#allocation2] sm:$0xf8]   ;;  %v752_v37 = vshrl.u32 %v2791_v22, 16 }
  0xbc   : > { %2566 = vmatprep.subr.bf16.mxu0 %v2789_v16  ;;  %v745_v32 = vrot.slane %v743_v27, 1  ;;  %v3116_v34 = vld [vmem:[#allocation2 + $0x8] sm:$0x3f]   ;;  %v1037_v38 = vrot.slane %v2794_v33, 3  ;;  %v2808_v48 = vld [vmem:[#allocation2] sm:$0xf8]  }
  0xbd   : > { %v895_v30 = vsel %vm892_vm5, %v893_v25, %v894_v26  ;;  %v750_v23 = vrot.slane %v748_v29, 1  ;;  %v1038_v39 = vrot.slane %v3116_v34, 3  ;;  %v2809_v49 = vld [vmem:[#allocation2 + $0x8] sm:$0x7f]   ;;  %v1182_v51 = vshrl.u32 %v2808_v48, 16  ;;  %v2826_v18 = vld [vmem:[%s3059_s25 + $0x1b8] sm:$0xff]  }
  0xbe   : > { %2580 = vmatprep.mubr.bf16.mxu0 %v895_v30  ;;  %v746_v36 = vor.u32 %v745_v32, %v741_v31  ;;  %v1185_v52 = vshll.u32 %v2808_v48, 16  ;;  %v1190_v53 = vshrl.u32 %v2809_v49, 16  ;;  %v1193_v54 = vshll.u32 %v2809_v49, 16  ;;  %v2814_v8 = vld [vmem:[#allocation2 + $0x4] sm:$0xff]   ;;  %v3157_v17 = vld [vmem:[#allocation2 + $0xc] sm:$0x1f]  }
  0xbf   : > { %2567 = vmatpush3.bf16.msra.mxu0 %v2789_v16  ;;  %v754_v41 = vor.u32 %v752_v37, %v750_v23  ;;  %v1039_v43 = vsel %vm1036_vm7, %v1037_v38, %v1038_v39  ;;  %v1184_v57 = vrot.slane %v1182_v51, 3  ;;  %v2823_v16 = vld [vmem:[%s3059_s25 + $0x150] sm:$0xff]   ;;  %v2827_v19 = vld [vmem:[#allocation2 + $0x4] sm:$0xfc]   ;;  %v1477_v22 = vrot.slane %v3157_v17, 2 }
  0xc0   : > { %2568 = vmatprep.subr.bf16.mxu0 %v2793_v28  ;;  %v751_v40 = vsel %vm739_vm6, %v746_v36, %v750_v23  ;;  %v1187_v58 = vrot.slane %v1185_v52, 4  ;;  %v1192_v59 = vrot.slane %v1190_v53, 3  ;;  %v1195_v60 = vrot.slane %v1193_v54, 4  ;;  %v2835_v20 = vld [vmem:[#allocation2 + $0xc] sm:$0x3f]   ;;  %v2829_v31 = vld [vmem:[%s3059_s25 + $0x140] sm:$0xff]  }
  0xc1   : > { %2560 = vmatprep.mubr.bf16.mxu1 %v751_v40  ;;  %v2825_v21 = vld [vmem:[%s3059_s25 + $0x148] sm:$0xff]   ;;  %v2830_v27 = vld [vmem:[%s3059_s25 + $0x1b0] sm:$0xff]   ;;  %v1632_v29 = vshll.u32 %v2835_v20, 16  ;;  %v2832_v36 = vld [vmem:[%s3059_s25 + $0x1f8] sm:$0xff]  }
  0xc2   : > { %2561 = vmatmul.mubr.bf16.vlgmr.msra.gmra.mxu1 %v754_v41  ;;  %v1188_v63 = vor.u32 %v1187_v58, %v1184_v57  ;;  %v3136_v0 = vor.u32 %v1195_v60, %v1192_v59  ;;  %v2834_v25 = vld [vmem:[#allocation2 + $0x4] sm:$0xfc]   ;;  %v2831_v41 = vld [vmem:[#allocation2 + $0xc] ss:$0 sps:$4 sm:$0x77]   ;;  %v2844_v51 = vld [vmem:[%s3059_s25 + $0x1d0] sm:$0xff]  }
  0xc3   : > { %2569 = vmatpush3.bf16.msra.mxu0 %v2793_v28  ;;  %2585 = vmatpush3.bf16.msra.mxu1 %v3084_v24  ;;  %v2802_v24 = vld [vmem:[%s3059_s25 + $0xd8] sm:$0xff]   ;;  %v1629_v28 = vshrl.u32 %v2835_v20, 16  ;;  %v1621_v32 = vshrl.u32 %v2834_v25, 16  ;;  %v1624_v33 = vshll.u32 %v2834_v25, 16  ;;  %v2833_v23 = vld [vmem:[%s3059_s25 + $0x1a8] sm:$0xff]   ;;  %v2837_v40 = vld [vmem:[%s3059_s25 + $0x1a0] sm:$0xff]  }
  0xc4   : > { %2570 = vmatprep.subr.bf16.mxu0 %v2797_v35  ;;  %2600 = vmatprep.mubr.bf16.mxu1 %v1039_v43  ;;  %v1197_v2 = vsel %vm1180_vm8, %v1188_v63, %v3136_v0  ;;  %v2836_v43 = vld [vmem:[%s3059_s25 + $0x1f0] sm:$0xff]   ;;  %v2840_v48 = vld [vmem:[%s3059_s25 + $0x1e0] sm:$0xff]   ;;  %v2843_v49 = vld [vmem:[%s3059_s25 + $0x188] sm:$0xff]  }
  0xc5   : > { %2586 = vmatprep.subr.bf16.mxu1 %v2796_v42  ;;  %v1631_v34 = vrot.slane %v1629_v28, 2  ;;  %v1623_v37 = vrot.slane %v1621_v32, 2  ;;  %v1626_v38 = vrot.slane %v1624_v33, 3  ;;  %v2849_v52 = vld [vmem:[#allocation2 + $0xc] sm:$0x3f]   ;;  %v2847_v53 = vld [vmem:[%s3059_s25 + $0x238] sm:$0xff]  }
  0xc6   : > { %v2848_v54 = vld [vmem:[#allocation2 + $0x4] sm:$0xf8]   ;;  %v2851_v58 = vld [vmem:[%s3059_s25 + $0x230] sm:$0xff]   ;;  %v2854_v63 = vld [vmem:[%s3059_s25 + $0x218] sm:$0xff]  }
  0xc7   : > { %2571 = vmatpush3.bf16.msra.mxu0 %v2797_v35  ;;  %2587 = vmatpush3.bf16.msra.mxu1 %v2796_v42  ;;  %v1634_v35 = vrot.slane %v1632_v29, 3  ;;  %v1627_v42 = vor.u32 %v1626_v38, %v1623_v37  ;;  %v1777_v57 = vrot.slane %v2848_v54, 3  ;;  %v2850_v60 = vld [vmem:[%s3059_s25 + $0x1c0] sm:$0xff]  }
  0xc8   : > { %2572 = vmatprep.subr.bf16.mxu0 %v2799_v44  ;;  %2588 = vmatprep.subr.bf16.mxu1 %v2798_v45 }
  0xcb   : > { %2573 = vmatpush3.bf16.msra.mxu0 %v2799_v44  ;;  %2589 = vmatpush3.bf16.msra.mxu1 %v2798_v45  ;;  %v2839_v45 = vld [vmem:[%s3059_s25 + $0x198] sm:$0xff]  }
  0xcc   : > { %2574 = vmatprep.subr.bf16.mxu0 %v2801_v46  ;;  %2590 = vmatprep.subr.bf16.mxu1 %v2800_v47 }
  0xcf   : > { %2575 = vmatpush3.bf16.msra.mxu0 %v2801_v46  ;;  %2591 = vmatpush3.bf16.msra.mxu1 %v2800_v47  ;;  %v2838_v46 = vld [vmem:[%s3059_s25 + $0x1e8] sm:$0xff]   ;;  %v2841_v47 = vld [vmem:[%s3059_s25 + $0x190] sm:$0xff]  }
  0xd0   : > { %2576 = vmatprep.subr.bf16.mxu0 %v2803_v50  ;;  %2592 = vmatprep.subr.bf16.mxu1 %v2802_v24 }
  0xd3   : > { %2577 = vmatpush3.bf16.msra.mxu0 %v2803_v50  ;;  %2593 = vmatpush3.bf16.msra.mxu1 %v2802_v24  ;;  %v2842_v50 = vld [vmem:[%s3059_s25 + $0x1d8] sm:$0xff]   ;;  %v2845_v24 = vld [vmem:[%s3059_s25 + $0x180] sm:$0xff]  }
  0xd4   : > { %2578 = vmatprep.subr.bf16.mxu0 %v2805_v55  ;;  %2594 = vmatprep.subr.bf16.mxu1 %v2804_v56 }
  0xd7   : > { %2579 = vmatpush3.bf16.msra.mxu0 %v2805_v55  ;;  %2595 = vmatpush3.bf16.msra.mxu1 %v2804_v56  ;;  %v2846_v55 = vld [vmem:[%s3059_s25 + $0x1c8] sm:$0xff]   ;;  %v1778_v56 = vrot.slane %v2849_v52, 3 }
  0xd8   : > { %2604 = vmatprep.subr.bf16.mxu0 %v2807_v61  ;;  %2596 = vmatprep.subr.bf16.mxu1 %v2806_v62 }
  0xd9   : > { %v1779_v59 = vsel %vm1036_vm7, %v1777_v57, %v1778_v56 }
  0xda   : > { %2581 = vmatmul.mubr.bf16.vlgmr.msra.gmra.mxu0 %v894_v26  ;;  %v1476_v26 = vrot.slane %v2827_v19, 2 }
  0xdb   : > { %2605 = vmatpush3.bf16.msra.mxu0 %v2807_v61  ;;  %2620 = vmatprep.mubr.bf16.mxu0 %v1197_v2  ;;  %v2852_v61 = vld [vmem:[%s3059_s25 + $0x228] sm:$0xff]   ;;  %v2857_v2 = vld [vmem:[%s3059_s25 + $0x200] sm:$0xff]  }
  0xdc   : > { %2606 = vmatprep.subr.bf16.mxu0 %v2811_v1  ;;  %2597 = vmatpush3.bf16.msra.mxu1 %v2806_v62  ;;  %v1478_v30 = vsel %vm1475_vm9, %v1476_v26, %v1477_v22  ;;  %v2853_v62 = vld [vmem:[%s3059_s25 + $0x220] sm:$0xff]  }
  0xdd   : > { %2598 = vmatprep.subr.bf16.mxu1 %v2810_v3 }
  0xdf   : > { %2607 = vmatpush3.bf16.msra.mxu0 %v2811_v1  ;;  %v2856_v1 = vld [vmem:[%s3059_s25 + $0x208] sm:$0xff]  }
  0xe0   : > { %2608 = vmatprep.subr.bf16.mxu0 %v2813_v4  ;;  %2599 = vmatpush3.bf16.msra.mxu1 %v2810_v3  ;;  %v590_v3 = vld [vmem:[#allocation3 + $0x8] sm:$0x3f] }
  0xe1   : > { %2624 = vmatprep.subr.bf16.mxu1 %v2812_v5 }
  0xe3   : > { %2609 = vmatpush3.bf16.msra.mxu0 %v2813_v4  ;;  %2601 = vmatmul.mubr.bf16.vlgmr.msra.gmra.mxu1 %v1038_v39  ;;  %v3169_v39 = vor.u32 %v1634_v35, %v1631_v34 }
  0xe4   : > { %2610 = vmatprep.subr.bf16.mxu0 %v2816_v6  ;;  %2625 = vmatpush3.bf16.msra.mxu1 %v2812_v5 }
  0xe5   : > { %2640 = vmatprep.mubr.bf16.mxu1 %v2814_v8  ;;  %2626 = vmatprep.subr.bf16.mxu1 %v2815_v7  ;;  %v1636_v44 = vsel %vm1619_vm10, %v1627_v42, %v3169_v39  ;;  %v588_v8 = vld [vmem:[#allocation3 + $0x10] sm:$0xff] }
  0xe7   : > { %2611 = vmatpush3.bf16.msra.mxu0 %v2816_v6 }
  0xe8   : > { %2612 = vmatprep.subr.bf16.mxu0 %v2818_v9  ;;  %2627 = vmatpush3.bf16.msra.mxu1 %v2815_v7 }
  0xe9   : > { %2628 = vmatprep.subr.bf16.mxu1 %v2817_v10 }
  0xeb   : > { %2613 = vmatpush3.bf16.msra.mxu0 %v2818_v9 }
  0xec   : > { %2614 = vmatprep.subr.bf16.mxu0 %v2820_v11  ;;  %2629 = vmatpush3.bf16.msra.mxu1 %v2817_v10 }
  0xed   : > { %2630 = vmatprep.subr.bf16.mxu1 %v2819_v12 }
  0xef   : > { %2615 = vmatpush3.bf16.msra.mxu0 %v2820_v11 }
  0xf0   : > { %2616 = vmatprep.subr.bf16.mxu0 %v2822_v13  ;;  %2631 = vmatpush3.bf16.msra.mxu1 %v2819_v12 }
  0xf1   : > { %2632 = vmatprep.subr.bf16.mxu1 %v2821_v14 }
  0xf3   : > { %2617 = vmatpush3.bf16.msra.mxu0 %v2822_v13  ;;  %v589_v13 = vld [vmem:[#allocation3] sm:$0xff] }
  0xf4   : > { %2618 = vmatprep.subr.bf16.mxu0 %v2824_v15  ;;  %2633 = vmatpush3.bf16.msra.mxu1 %v2821_v14 }
  0xf5   : > { %2634 = vmatprep.subr.bf16.mxu1 %v2823_v16 }
  0xf7   : > { %2619 = vmatpush3.bf16.msra.mxu0 %v2824_v15 }
  0xf8   : > { %2644 = vmatprep.subr.bf16.mxu0 %v2826_v18  ;;  %2635 = vmatpush3.bf16.msra.mxu1 %v2823_v16 }
  0xf9   : > { %2636 = vmatprep.subr.bf16.mxu1 %v2825_v21 }
  0xfa   : > { %2621 = vmatmul.mubr.bf16.vlgmr.msra.gmra.mxu0 %v3136_v0  ;;  %v2855_v0 = vld [vmem:[%s3059_s25 + $0x210] sm:$0xff]  }
  0xfb   : > { %2645 = vmatpush3.bf16.msra.mxu0 %v2826_v18  ;;  %2660 = vmatprep.mubr.bf16.mxu0 %v1478_v30 }
  0xfc   : > { %2646 = vmatprep.subr.bf16.mxu0 %v2830_v27  ;;  %2637 = vmatpush3.bf16.msra.mxu1 %v2825_v21 }
  0xfd   : > { %2638 = vmatprep.subr.bf16.mxu1 %v2829_v31 }
  0xff   : > { %2647 = vmatpush3.bf16.msra.mxu0 %v2830_v27 }
 0x100   : > { %2648 = vmatprep.subr.bf16.mxu0 %v2833_v23  ;;  %2639 = vmatpush3.bf16.msra.mxu1 %v2829_v31 }
 0x101   : > { %2664 = vmatprep.subr.bf16.mxu1 %v2832_v36 }
 0x103   : > { %2649 = vmatpush3.bf16.msra.mxu0 %v2833_v23  ;;  %2641 = vmatmul.mubr.bf16.vlgmr.msra.gmra.mxu1 %v2831_v41 }
 0x104   : > { %2650 = vmatprep.subr.bf16.mxu0 %v2837_v40  ;;  %2665 = vmatpush3.bf16.msra.mxu1 %v2832_v36 }
 0x105   : > { %2680 = vmatprep.mubr.bf16.mxu1 %v1636_v44  ;;  %2666 = vmatprep.subr.bf16.mxu1 %v2836_v43 }
 0x107   : > { %2651 = vmatpush3.bf16.msra.mxu0 %v2837_v40 }
 0x108   : > { %2652 = vmatprep.subr.bf16.mxu0 %v2839_v45  ;;  %2667 = vmatpush3.bf16.msra.mxu1 %v2836_v43 }
 0x109   : > { %2668 = vmatprep.subr.bf16.mxu1 %v2838_v46 }
 0x10b   : > { %2653 = vmatpush3.bf16.msra.mxu0 %v2839_v45 }
 0x10c   : > { %2654 = vmatprep.subr.bf16.mxu0 %v2841_v47  ;;  %2669 = vmatpush3.bf16.msra.mxu1 %v2838_v46 }
 0x10d   : > { %2670 = vmatprep.subr.bf16.mxu1 %v2840_v48 }
 0x10f   : > { %2655 = vmatpush3.bf16.msra.mxu0 %v2841_v47 }
 0x110   : > { %2656 = vmatprep.subr.bf16.mxu0 %v2843_v49  ;;  %2671 = vmatpush3.bf16.msra.mxu1 %v2840_v48 }
 0x111   : > { %2672 = vmatprep.subr.bf16.mxu1 %v2842_v50 }
 0x113   : > { %2657 = vmatpush3.bf16.msra.mxu0 %v2843_v49 }
 0x114   : > { %2658 = vmatprep.subr.bf16.mxu0 %v2845_v24  ;;  %2673 = vmatpush3.bf16.msra.mxu1 %v2842_v50 }
 0x115   : > { %2674 = vmatprep.subr.bf16.mxu1 %v2844_v51 }
 0x117   : > { %2659 = vmatpush3.bf16.msra.mxu0 %v2845_v24 }
 0x118   : > { %2684 = vmatprep.subr.bf16.mxu0 %v2847_v53  ;;  %2675 = vmatpush3.bf16.msra.mxu1 %v2844_v51 }
 0x119   : > { %2676 = vmatprep.subr.bf16.mxu1 %v2846_v55 }
 0x11a   : > { %2661 = vmatmul.mubr.bf16.vlgmr.msra.gmra.mxu0 %v1477_v22 }
 0x11b   : > { %2685 = vmatpush3.bf16.msra.mxu0 %v2847_v53  ;;  %2700 = vmatprep.mubr.bf16.mxu0 %v1779_v59 }
 0x11c   : > { %2686 = vmatprep.subr.bf16.mxu0 %v2851_v58  ;;  %2677 = vmatpush3.bf16.msra.mxu1 %v2846_v55 }
 0x11d   : > { %2678 = vmatprep.subr.bf16.mxu1 %v2850_v60 }
 0x11f   : > { %2687 = vmatpush3.bf16.msra.mxu0 %v2851_v58 }
 0x120   : > { %2688 = vmatprep.subr.bf16.mxu0 %v2852_v61  ;;  %2679 = vmatpush3.bf16.msra.mxu1 %v2850_v60 }
 0x123   : > { %2689 = vmatpush3.bf16.msra.mxu0 %v2852_v61  ;;  %2681 = vmatmul.mubr.bf16.vlgmr.msra.gmra.mxu1 %v3169_v39 }
 0x124   : > { %2690 = vmatprep.subr.bf16.mxu0 %v2853_v62 }
 0x127   : > { %2691 = vmatpush3.bf16.msra.mxu0 %v2853_v62 }
 0x128   : > { %2692 = vmatprep.subr.bf16.mxu0 %v2854_v63 }
 0x12b   : > { %2693 = vmatpush3.bf16.msra.mxu0 %v2854_v63 }
 0x12c   : > { %2694 = vmatprep.subr.bf16.mxu0 %v2855_v0 }
 0x12f   : > { %2695 = vmatpush3.bf16.msra.mxu0 %v2855_v0 }
 0x130   : > { %2696 = vmatprep.subr.bf16.mxu0 %v2856_v1 }
 0x133   : > { %2697 = vmatpush3.bf16.msra.mxu0 %v2856_v1 }
 0x134   : > { %2698 = vmatprep.subr.bf16.mxu0 %v2857_v2 }
 0x137   : > { %2699 = vmatpush3.bf16.msra.mxu0 %v2857_v2 }
 0x13a   : > { %2701 = vmatmul.mubr.bf16.vlgmr.msra.gmra.mxu0 %v1778_v56 }
 0x17a   : > { %v2542_v4 = vpop.f32.mrf.mxu0 }
 0x17b   : > { %v702_v5 = vadd.f32 %v2542_v4, %v590_v3 }
 0x17c   : > { %v686_v6 = vpop.f32.mrf.mxu0 }
 0x17d   : > { %705 = vst [vmem:[#allocation3 + $0x8] sm:$0x3f] %v702_v5  ;;  %v700_v11 = vadd.f32 %v686_v6, %v588_v8 }
 0x17e   : > { %v2543_v7 = vpop.f32.mrf.mxu0 }
 0x180   : > { %v689_v14 = vpop.f32.mrf.mxu0 }
 0x181   : > { %v701_v18 = vadd.f32 %v689_v14, %v589_v13 }
 0x182   : > { %v2562_v10 = vpop.f32.mrf.mxu1 }
 0x184   : > { %v727_v9 = vld [vmem:[#allocation3 + $0x8] sm:$0x3f]  ;;  %v839_v15 = vpop.f32.mrf.mxu1 }
 0x185   : > { %v855_v12 = vadd.f32 %v2562_v10, %v727_v9  ;;  %v853_v16 = vadd.f32 %v839_v15, %v700_v11 }
 0x186   : > { %v2563_v17 = vpop.f32.mrf.mxu1 }
 0x187   : > { %858 = vst [vmem:[#allocation3 + $0x8] sm:$0x3f] %v855_v12 }
 0x188   : > { %v842_v19 = vpop.f32.mrf.mxu1 }
 0x189   : > { %v854_v20 = vadd.f32 %v842_v19, %v701_v18 }
 0x18e   : > { %v880_v21 = vld [vmem:[#allocation3 + $0x8] sm:$0x3f] }
 0x19a   : > { %v2582_v22 = vpop.f32.mrf.mxu0 }
 0x19b   : > { %v996_v25 = vadd.f32 %v2582_v22, %v880_v21 }
 0x19c   : > { %v980_v26 = vpop.f32.mrf.mxu0 }
 0x19d   : > { %999 = vst [vmem:[#allocation3 + $0x8] sm:$0x3f] %v996_v25  ;;  %v994_v27 = vadd.f32 %v980_v26, %v853_v16 }
 0x19e   : > { %v2583_v28 = vpop.f32.mrf.mxu0 }
 0x1a0   : > { %v983_v34 = vpop.f32.mrf.mxu0 }
 0x1a1   : > { %v995_v57 = vadd.f32 %v983_v34, %v854_v20 }
 0x1a3   : > { %v2602_v30 = vpop.f32.mrf.mxu1 }
 0x1a4   : > { %v1021_v29 = vld [vmem:[#allocation3 + $0x8] sm:$0x3f] }
 0x1a5   : > { %v1140_v31 = vadd.f32 %v2602_v30, %v1021_v29  ;;  %v1124_v32 = vpop.f32.mrf.mxu1 }
 0x1a6   : > { %v1138_v33 = vadd.f32 %v1124_v32, %v994_v27 }
 0x1a7   : > { %1143 = vst [vmem:[#allocation3 + $0x8] sm:$0x3f] %v1140_v31  ;;  %v2603_v23 = vpop.f32.mrf.mxu1 }
 0x1a9   : > { %v1127_v40 = vpop.f32.mrf.mxu1 }
 0x1aa   : > { %v1139_v59 = vadd.f32 %v1127_v40, %v995_v57 }
 0x1ae   : > { %v1165_v35 = vld [vmem:[#allocation3 + $0x8] sm:$0x3f] }
 0x1ba   : > { %v2622_v36 = vpop.f32.mrf.mxu0 }
 0x1bb   : > { %v1298_v37 = vadd.f32 %v2622_v36, %v1165_v35 }
 0x1bc   : > { %v1282_v38 = vpop.f32.mrf.mxu0 }
 0x1bd   : > { %1301 = vst [vmem:[#allocation3 + $0x8] sm:$0x3f] %v1298_v37  ;;  %v1296_v58 = vadd.f32 %v1282_v38, %v1138_v33 }
 0x1be   : > { %v2623_v39 = vpop.f32.mrf.mxu0 }
 0x1c0   : > { %v1285_v46 = vpop.f32.mrf.mxu0 }
 0x1c1   : > { %v1297_v62 = vadd.f32 %v1285_v46, %v1139_v59 }
 0x1c3   : > { %v2642_v42 = vpop.f32.mrf.mxu1 }
 0x1c4   : > { %v1323_v41 = vld [vmem:[#allocation3 + $0x8] sm:$0x3f] }
 0x1c5   : > { %v1435_v43 = vadd.f32 %v2642_v42, %v1323_v41  ;;  %v1419_v44 = vpop.f32.mrf.mxu1 }
 0x1c6   : > { %v1433_v60 = vadd.f32 %v1419_v44, %v1296_v58 }
 0x1c7   : > { %1438 = vst [vmem:[#allocation3 + $0x8] sm:$0x3f] %v1435_v43  ;;  %v2643_v45 = vpop.f32.mrf.mxu1 }
 0x1c9   : > { %v1422_v51 = vpop.f32.mrf.mxu1 }
 0x1ca   : > { %v1434_v2 = vadd.f32 %v1422_v51, %v1297_v62 }
 0x1ce   : > { %v1460_v47 = vld [vmem:[#allocation3 + $0x8] sm:$0x3f] }
 0x1da   : > { %v2662_v48 = vpop.f32.mrf.mxu0 }
 0x1db   : > { %v1579_v49 = vadd.f32 %v2662_v48, %v1460_v47 }
 0x1dc   : > { %v1563_v50 = vpop.f32.mrf.mxu0 }
 0x1dd   : > { %1582 = vst [vmem:[#allocation3 + $0x8] sm:$0x3f] %v1579_v49  ;;  %v1577_v63 = vadd.f32 %v1563_v50, %v1433_v60 }
 0x1de   : > { %v2663_v24 = vpop.f32.mrf.mxu0 }
 0x1e0   : > { %v1566_v61 = vpop.f32.mrf.mxu0 }
 0x1e1   : > { %v1578_v7 = vadd.f32 %v1566_v61, %v1434_v2 }
 0x1e3   : > { %v2682_v53 = vpop.f32.mrf.mxu1 }
 0x1e4   : > { %v1604_v52 = vld [vmem:[#allocation3 + $0x8] sm:$0x3f] }
 0x1e5   : > { %v1737_v54 = vadd.f32 %v2682_v53, %v1604_v52  ;;  %v1721_v55 = vpop.f32.mrf.mxu1 }
 0x1e6   : > { %v1735_v3 = vadd.f32 %v1721_v55, %v1577_v63 }
 0x1e7   : > { %1740 = vst [vmem:[#allocation3 + $0x8] sm:$0x3f] %v1737_v54  ;;  %v2683_v56 = vpop.f32.mrf.mxu1 }
 0x1e9   : > { %v1724_v5 = vpop.f32.mrf.mxu1 }
 0x1ea   : > { %v1736_v10 = vadd.f32 %v1724_v5, %v1578_v7 }
 0x1ee   : > { %v1762_v0 = vld [vmem:[#allocation3 + $0x8] sm:$0x3f] }
 0x1fa   : > { %v2702_v1 = vpop.f32.mrf.mxu0 }
 0x1fb   : > { %v1880_v4 = vadd.f32 %v2702_v1, %v1762_v0 }
 0x1fc   : > { %v1864_v6 = vpop.f32.mrf.mxu0 }
 0x1fd   : > { %1883 = vst [vmem:[#allocation3 + $0x8] sm:$0x3f] %v1880_v4  ;;  %v1878_v8 = vadd.f32 %v1864_v6, %v1735_v3 }
 0x1fe   : > { %v2703_v9 = vpop.f32.mrf.mxu0 }
 0x1ff   : > { %1881 = vst [vmem:[#allocation3 + $0x10] sm:$0xff] %v1878_v8 }
 0x200   : > { %v1867_v11 = vpop.f32.mrf.mxu0 }
 0x201   : > { %v1879_v12 = vadd.f32 %v1867_v11, %v1736_v10 }
 0x203   : > { %1882 = vst [vmem:[#allocation3] sm:$0xff] %v1879_v12 }
 0x204 PF: > { %p2393_p1 = scmp.ne.s32.totalorder %s2890_s27, 2 }
 0x206   : > { %1887 = sbr.rel (%p2393_p1) target bundleno = 668 (0x29c), region = 64 }
 0x20b   : > { %v1896_v13 = vld [vmem:[%s3244_s6] sm:$0xff]  ;;  %v1898_v14 = vld [vmem:[%s3244_s6 + $0x10] sm:$0x3f]  ;;  %v2918_v15 = vmov 0   ;;  %v1897_v16 = vld [vmem:[%s3244_s6 + $0x8] sm:$0xff]  ;;  %vm1963_vm11 = vcmask 1043459  }
 0x20c   : > { %2858 = vset.pattern.permute.xlu0 %v2918_v15  ;;  %1892 = vst [vmem:[%s3033_s18 + $0x10] sm:$0x3] %v2918_v15  ;;  %1888 = vst [vmem:[%s3033_s18] sm:$0xf] %v2918_v15  ;;  %2859 = vset.pattern.permute.xlu1 %v2918_v15  ;;  %v1893_v17 = vld [vmem:[#allocation3 + $0x10] sm:$0xff]  ;;  %v1895_v18 = vld [vmem:[#allocation3 + $0x8] sm:$0x3f] }
 0x20d   : > { %1889 = vst [vmem:[%s3033_s18 + $0x4] sm:$0xf] %v2918_v15  ;;  %1890 = vst [vmem:[%s3033_s18 + $0x8] sm:$0xf] %v2918_v15  ;;  %1901 = vperm.xlu0 %2858, %v1896_v13   ;;  %1911 = vperm.xlu1 %2859, %v1898_v14   ;;  %vm1964_vm12 = vsmask.f32 7950 }
 0x20e   : > { %1891 = vst [vmem:[%s3033_s18 + $0xc] sm:$0xf] %v2918_v15  ;;  %v1894_v27 = vld [vmem:[#allocation3] sm:$0xff]  ;;  %vm1965_vm13 = vmand %vm1963_vm11, %vm1964_vm12  ;;  %vm1971_vm14 = vcmask 1042432   ;;  %vm1972_vm15 = vsmask.f32 2304 }
 0x20f   : > { %vm1927_vm0 = vsmask.f32 3328  ;;  %vm1928_vm1 = vsmask.f32 7440  ;;  %vm1973_vm2 = vmand %vm1971_vm14, %vm1972_vm15 }
 0x210   : > { %vm1929_vm3 = vmor %vm1927_vm0, %vm1928_vm1 }
 0x211   : > { %1906 = vperm.xlu0 %2858, %v1897_v16  }
 0x213   : > { %v1966_v33 = vld [vmem:[%s3033_s18] sm:$0x8] }
 0x215   : > { %v1974_v42 = vld [vmem:[%s3033_s18 + $0xc] sm:$0x7] }
 0x288   : > { %v1902_v19 = vpop.permute.xlu0 %1901  ;;  %v1912_v20 = vpop.permute.xlu1 %1911 }
 0x289   : > { %v1914_v21 = vmul.f32 %v1902_v19, %v1893_v17  ;;  %v1916_v22 = vmul.f32 %v1912_v20, %v1895_v18 }
 0x28b   : > { %v2411_v25 = vpack.c.bf16 %v1914_v21, %v1914_v21  ;;  %v2413_v26 = vpack.c.bf16 %v1916_v22, %v1916_v22 }
 0x28c   : > { %v1907_v28 = vpop.permute.xlu0 %1906 }
 0x28d   : > { %v1931_v29 = vshll.u32 %v2411_v25, 16  ;;  %v1934_v30 = vshrl.u32 %v2411_v25, 16  ;;  %v1950_v31 = vshll.u32 %v2413_v26, 16  ;;  %v1954_v32 = vshrl.u32 %v2413_v26, 16 }
 0x28e   : > { %v1915_v23 = vmul.f32 %v1907_v28, %v1894_v27 }
 0x28f   : > { %v1933_v34 = vrot.slane %v1931_v29, 5  ;;  %v1936_v35 = vrot.slane %v1934_v30, 4  ;;  %v1952_v36 = vrot.slane %v1950_v31, 5  ;;  %v1956_v37 = vrot.slane %v1954_v32, 4 }
 0x290   : > { %v2412_v38 = vpack.c.bf16 %v1915_v23, %v1915_v23 }
 0x291   : > { %v1937_v39 = vor.u32 %v1936_v35, %v1933_v34  ;;  %v1967_v40 = vsel %vm1965_vm13, %v1933_v34, %v1966_v33  ;;  %v1957_v41 = vor.u32 %v1956_v37, %v1952_v36 }
 0x292   : > { %1968 = vst [vmem:[%s3033_s18] sm:$0x8] %v1967_v40  ;;  %v1940_v43 = vshll.u32 %v2412_v38, 16  ;;  %v1944_v44 = vshrl.u32 %v2412_v38, 16 }
 0x293   : > { %v1938_v45 = vrot.slane %v1937_v39, 4  ;;  %v1958_v46 = vrot.slane %v1957_v41, 4 }
 0x294   : > { %v1942_v47 = vrot.slane %v1940_v43, 5  ;;  %v1946_v48 = vrot.slane %v1944_v44, 4 }
 0x295   : > { %v1975_v49 = vsel %vm1973_vm2, %v1958_v46, %v1974_v42 }
 0x296   : > { %1976 = vst [vmem:[%s3033_s18 + $0xc] sm:$0x7] %v1975_v49  ;;  %v1943_v50 = vsel %vm1929_vm3, %v1938_v45, %v1942_v47  ;;  %v1947_v24 = vor.u32 %v1946_v48, %v1942_v47 }
 0x297   : > { %1969 = vst [vmem:[%s3033_s18 + $0x4] sm:$0xf] %v1943_v50 }
 0x298   : > { %v1948_v51 = vrot.slane %v1947_v24, 4 }
 0x29a   : > { %v1953_v52 = vsel %vm1929_vm3, %v1948_v51, %v1952_v36 }
 0x29b   : > { %1970 = vst [vmem:[%s3033_s18 + $0x8] sm:$0xf] %v1953_v52 }
 0x29c PF: > { %s18_s11 = sadd.s32 1, %s2914_s11   ;;  %s3255_s28 = sld [smem:[#allocation4_spill]] }
 0x29d   : > { %p15_p2 = scmp.ge.s32.totalorder %s18_s11, 26   ;;  %s3256_s29 = sld [smem:[#allocation5_spill]] }
 0x29e   : > { %s3257_s24 = sld [smem:[#allocation6_spill]]  ;;  %s3260_s27 = smov %s2902_s30 }
 0x29f   : > { %s3258_s9 = sld [smem:[#allocation7_spill]] }
 0x2a0   : > { %s3259_s10 = sld [smem:[#allocation8_spill]]  ;;  %17 = sbr.rel (!%p15_p2) target bundleno = 4 (0x4), region = 109 }
 0x2a4   : > { %s3261_s30 = smov %s3257_s24 }

// kernel: decoder_forward.6
= control target key start
LH: loop header
LB: loop body
LE: loop exit
PB: predicated region body
PF: predicated region fallthrough
CT: control target
= control target key end

     0   :  { %s3345_s0 = inlined_call_operand.vmem [shape: bf16[2,4,36,128], index: 0, kind: input, shape index: {}]   ;;  %s3346_s1 = inlined_call_operand.vmem [shape: f32[2,1,128], index: 1, kind: input, shape index: {}]   ;;  %s3347_s2 = inlined_call_operand.vmem [shape: f32[2,1,128], index: 2, kind: input, shape index: {}]   ;;  %s3348_s3 = inlined_call_operand.vmem [shape: f32[1,128], index: 3, kind: input, shape index: {}]   ;;  %s3349_s4 = inlined_call_operand.vmem [shape: f32[1,128], index: 4, kind: input, shape index: {}]   ;;  %s3350_s5 = inlined_call_operand.vmem [shape: f32[36,1], index: 5, kind: input, shape index: {}]   ;;  %s3351_s6 = inlined_call_operand.vmem [shape: f32[22,1], index: 6, kind: input, shape index: {}]   ;;  %s3352_s7 = inlined_call_operand.hbm [shape: bf16[3,9,128,128], index: 7, kind: input, shape index: {}]   ;;  %s3353_s8 = inlined_call_operand.vmem [shape: bf16[2,4,36,128], index: 8, kind: output, shape index: {}]  }
   0x1   :  { %3355 = sst [smem:[#allocation11_spill]] %s3352_s7 }
   0x2   :  { %13 = vsyncpa [#allocation5], 0  ;;  %s3040_s27 = smov 0   ;;  %s3042_s28 = smov 0  }
   0x3   :  { %s3044_s29 = smov 0   ;;  %s3046_s30 = smov 0  }
   0x4   :  { %s3048_s9 = smov 0   ;;  %s3050_s10 = smov 0  }
   0x5   :  { %s3052_s11 = smov 0  }
   0x6 LB: > { %3356 = sst [smem:[#allocation7_spill]] %s2983_s10  ;;  %s2158_s12 = sadd.s32 4294967295, %s2987_s11   ;;  %s2987_s11 = sphi %s3052_s11, %s19_s11   ;;  %s2983_s10 = sphi %s3050_s10, %s3368_s10   ;;  %s2979_s9 = sphi %s3048_s9, %s3372_s9   ;;  %s2975_s30 = sphi %s3046_s30, %s3371_s30   ;;  %s2971_s29 = sphi %s3044_s29, %s3365_s29   ;;  %s2967_s28 = sphi %s3042_s28, %s3370_s28   ;;  %s2963_s27 = sphi %s3040_s27, %s3369_s27  }
   0x7   : > { %s31_s13 = sadd.s32 1, %s2975_s30  ;;  %s34_s14 = sadd.s32 1, %s2979_s9 }
   0x8   : > { %p32_p0 = scmp.ge.s32.totalorder %s31_s13, 3  ;;  %s38_s15 = sadd.s32 1, %s2983_s10 }
   0x9   : > { %p2172_p1 = scmp.ge.s32.totalorder %s2987_s11, 1  ;;  %p268_p2 = scmp.lt.s32.totalorder %s2987_s11, 25 }
   0xa   : > { %s3374_s13 = smov (%p32_p0, %s31_s13), 0  ;;  %s3376_s14 = smov (!%p32_p0, %s34_s14), %s2979_s9 }
   0xb   : > { %3357 = sst [smem:[#allocation8_spill]] %s3374_s13  ;;  %p36_p3 = scmp.ge.s32.totalorder %s3376_s14, 4 }
   0xc   : > { %p3084_p4 = scmp.eq.s32.totalorder %s2158_s12, 0  ;;  %p3088_p5 = pnand %p2172_p1, %p268_p2 }
   0xd   : > { %s3378_s14 = smov (%p36_p3, %s3376_s14), 0  ;;  %s3380_s15 = smov (!%p36_p3, %s38_s15), %s2983_s10 }
   0xe   : > { %3360 = sst [smem:[#allocation9_spill]] %s3378_s14  ;;  %p2741_p6 = pneg %p3088_p5 }
   0xf   : > { %s2989_s18 = smov [#allocation4]   ;;  %p40_p7 = scmp.ge.s32.totalorder %s3380_s15, 2 }
  0x10   : > { %s292_s19 = sshll.u32 %s2989_s18, 4  ;;  %p3099_p8 = pnand %p3084_p4, %p2741_p6  ;;  %s293_s19 = int_to_ptr.vmem [resolvable:$true] %s292_s19 }
  0x11   : > { %s3382_s15 = smov (%p40_p7, %s3380_s15), 0  ;;  %s2914_s21 = scalar_lea.vmem %s293_s19, 27648 }
  0x12   : > { %3362 = sst [smem:[#allocation10_spill]] %s3382_s15  ;;  %p2905_p9 = pneg %p3099_p8 }
  0x13   : > { %p2915_p10 = scmp.ne.s32.totalorder %s293_s19, %s2914_s21  ;;  %p2922_p13 = scmp.lt.s32.totalorder %s293_s19, %s293_s19 }
  0x14   : > { %p2923_p0 = scmp.lt.s32.totalorder %s2914_s21, %s2914_s21 }
  0x15   : > { %p2917_p11 = pnand %p2915_p10, %p2905_p9 }
  0x16   : > { %p2924_p1 = por %p2923_p0, %p2922_p13 }
  0x17   : > { %p2918_p12 = pneg %p2917_p11 }
  0x19   : > { %p2925_p2 = pnand %p2924_p1, %p2918_p12 }
  0x1b   : > { %2928 = shalt.err (!%p2925_p2)
}
  0x1c   : > { %s2990_s22 = smov 64   ;;  %s2991_s23 = smov 4  }
  0x1d   : > { %s3363_s7 = sld [smem:[#allocation11_spill]] }
  0x1f   : > { %344 = sbr.rel (%p3088_p5) target bundleno = 690 (0x2b2), region = 52 }
  0x23   : > { %2744 = dma.hbm_to_vmem [thread:$0]  (!%p3099_p8), %s3363_s7, 27648, %s293_s19, [#allocation5], %s2990_s22, %s2990_s22, %s2991_s23  }
  0x24   : > { %2958 = dma.done.wait (%p3084_p4), [#allocation5], 27648  }
  0x25   : > { %2960 = vsyncadd (%p3084_p4), [#allocation5], 4294939648  ;;  %s398_s26 = sadd.s32 %s2963_s27, %s2967_s28  ;;  %p404_p3 = scmp.lt.s32.totalorder %s2971_s29, 1 }
  0x26   : > { %s3121_s12 = sadd.s32 4294967295, %s398_s26  ;;  %p427_p4 = scmp.lt.s32.totalorder %s2967_s28, 3 }
  0x27   : > { %p400_p5 = scmp.gt.s32.totalorder %s3121_s12, 0  ;;  %p2178_p6 = scmp.lt.s32.totalorder %s3121_s12, 3 }
  0x28   : > { %s3384_s29 = smov (!%p404_p3, %s2971_s29), 1  ;;  %s3388_s28 = smov (!%p427_p4, %s2967_s28), 3 }
  0x29   : > { %s401_s16 = scalar_select %p400_p5, %s3121_s12, 0 }
  0x2a   : > { %s424_s22 = scalar_lea.vmem %s3347_s2, %s3384_s29  ;;  %s2735_s23 = smul.u32 20, %s3384_s29 }
  0x2b   : > { %s3386_s16 = smov (!%p2178_p6, %s401_s16), 3  ;;  %s2736_s24 = smul.u32 5, %s3388_s28 }
  0x2c   : > { %p406_p7 = scmp.lt.s32.totalorder %s3386_s16, 3  ;;  %p2185_p8 = scmp.ne.s32.totalorder %s2963_s27, 0 }
  0x2d   : > { %s431_s26 = sadd.s32 %s2736_s24, %s2735_s23 }
  0x2e   : > { %s3390_s16 = smov (!%p406_p7, %s3386_s16), 3  ;;  %s2184_s15 = sshll.u32 %s431_s26, 2 }
  0x2f   : > { %s2734_s25 = smul.u32 5, %s3390_s16  ;;  %s3143_s17 = scalar_lea.vmem %s3353_s8, %s2184_s15 }
  0x30   : > { %438 = sbr.rel (%p2185_p8) target bundleno = 56 (0x38), region = 60 }
  0x31   : > { %s410_s7 = sadd.s32 %s2735_s23, %s2734_s25 }
  0x32   : > { %s2183_s14 = sshll.u32 %s410_s7, 2 }
  0x33   : > { %s3148_s20 = scalar_lea.vmem %s3345_s0, %s2183_s14 }
  0x35   : > { %v2992_v0 = vmov 0.0  }
  0x36   : > { %439 = vst [vmem:[#allocation3 + $0x10] sm:$0xff] %v2992_v0  ;;  %440 = vst [vmem:[#allocation3] sm:$0xff] %v2992_v0 }
  0x37   : > { %441 = vst [vmem:[#allocation3 + $0x8] sm:$0x3f] %v2992_v0 }
  0x38 PF: > { %p444_p9 = scmp.ge.s32.totalorder %s3121_s12, 0  ;;  %p445_p10 = scmp.le.s32.totalorder %s3121_s12, 3 }
  0x3a   : > { %p446_p11 = pnand %p445_p10, %p444_p9 }
  0x3b   : > { %s2440_s14 = smul.u32 (!%p446_p11), 576, %s2963_s27  ;;  %s3364_s18 = scalar_lea.vmem (!%p446_p11), %s3346_s1, %s3384_s29 }
  0x3c   : > { %449 = sbr.rel (%p446_p11) target bundleno = 538 (0x21a), region = 64 }
  0x3d   : > { %s3166_s21 = scalar_lea.vmem (!%p446_p11), [#allocation4], %s2440_s14 }
  0x41   : > { %v525_v1 = vld [vmem:[%s3350_s5 + $0x10] sm:$0xff]  ;;  %v523_v2 = vld [vmem:[%s3350_s5] sm:$0xff]  ;;  %v2993_v3 = vmov 0   ;;  %v526_v4 = vld [vmem:[%s3350_s5 + $0x18] sm:$0xff]  ;;  %vm907_vm5 = vcmask 1046528   ;;  %vm1051_vm7 = vcmask 1044480  }
  0x42   : > { %2810 = vset.pattern.permute.xlu1 %v2993_v3  ;;  %2809 = vset.pattern.permute.xlu0 %v2993_v3  ;;  %v524_v5 = vld [vmem:[%s3350_s5 + $0x8] sm:$0xff]  ;;  %v2811_v6 = vld [vmem:[%s3166_s21 + $0x38] sm:$0xff]   ;;  %v2812_v7 = vld [vmem:[%s3166_s21 + $0x30] sm:$0xff]   ;;  %vm754_vm6 = vsmask.f32 7424  ;;  %vm1490_vm9 = vcmask 1045504  }
  0x43   : > { %540 = vperm.xlu1 %2810, %v525_v1   ;;  %530 = vperm.xlu0 %2809, %v523_v2   ;;  %v2813_v8 = vld [vmem:[%s3166_s21 + $0x78] sm:$0xff]   ;;  %v527_v9 = vld [vmem:[%s3350_s5 + $0x20] sm:$0xf]  ;;  %v2815_v10 = vld [vmem:[%s3166_s21 + $0x70] sm:$0xff]   ;;  %vm1195_vm8 = vsmask.f32 4352 }
  0x44   : > { %2554 = vmatprep.subr.bf16.mxu0 %v2811_v6  ;;  %2574 = vmatprep.subr.bf16.mxu1 %v2813_v8  ;;  %v2814_v11 = vld [vmem:[%s3166_s21 + $0x28] sm:$0xff]   ;;  %v2816_v13 = vld [vmem:[%s3166_s21 + $0x20] sm:$0xff]   ;;  %v2818_v15 = vld [vmem:[%s3166_s21 + $0x18] sm:$0xff]   ;;  %vm1634_vm10 = vsmask.f32 5376 }
  0x45   : > { %2555 = vmatpush3.bf16.msra.mxu0 %v2811_v6  ;;  %2575 = vmatpush3.bf16.msra.mxu1 %v2813_v8  ;;  %v2817_v12 = vld [vmem:[%s3166_s21 + $0x68] sm:$0xff]   ;;  %v2819_v14 = vld [vmem:[%s3166_s21 + $0x60] sm:$0xff]   ;;  %v2821_v16 = vld [vmem:[%s3166_s21 + $0x58] sm:$0xff]  }
  0x46   : > { %2556 = vmatprep.subr.bf16.mxu0 %v2812_v7  ;;  %2576 = vmatprep.subr.bf16.mxu1 %v2815_v10  ;;  %v2820_v17 = vld [vmem:[%s3166_s21 + $0x10] sm:$0xff]   ;;  %v2822_v19 = vld [vmem:[%s3166_s21 + $0x8] sm:$0xff]   ;;  %v2824_v21 = vld [vmem:[%s3166_s21] sm:$0xff]  }
  0x47   : > { %545 = vperm.xlu1 %2810, %v526_v4   ;;  %535 = vperm.xlu0 %2809, %v524_v5   ;;  %v2823_v18 = vld [vmem:[%s3166_s21 + $0x50] sm:$0xff]   ;;  %v2825_v20 = vld [vmem:[%s3166_s21 + $0x48] sm:$0xff]   ;;  %v2829_v22 = vld [vmem:[%s3166_s21 + $0x40] sm:$0xff]  }
  0x48   : > { %v3188_v23 = vld [vmem:[%s3166_s21 + $0xb8] sm:$0xff]   ;;  %v2462_v25 = vld [vmem:[%s3148_s20 + $0x8] sm:$0xff]   ;;  %v2445_v26 = vld [vmem:[%s3148_s20] sm:$0xff]  }
  0x49   : > { %2557 = vmatpush3.bf16.msra.mxu0 %v2812_v7  ;;  %2577 = vmatpush3.bf16.msra.mxu1 %v2815_v10  ;;  %v3191_v24 = vld [vmem:[%s3166_s21 + $0xf8] sm:$0xff]   ;;  %v2450_v27 = vunpack.c.l.bf16 %v2462_v25  ;;  %v2187_v28 = vld [vmem:[%s3364_s18] ss:$0 sm:$0xff]  ;;  %v2446_v29 = vunpack.c.l.bf16 %v2445_v26  ;;  %v2451_v30 = vunpack.c.h.bf16 %v2462_v25  ;;  %v2447_v31 = vunpack.c.h.bf16 %v2445_v26  ;;  %v454_v32 = vld [vmem:[%s3148_s20 + $0x10] sm:$0x3] }
  0x4a   : > { %2558 = vmatprep.subr.bf16.mxu0 %v2814_v11  ;;  %2578 = vmatprep.subr.bf16.mxu1 %v2817_v12  ;;  %v2188_v34 = vld [vmem:[%s424_s22] ss:$0 sm:$0xff]  ;;  %v459_v38 = vunpack.c.l.bf16 %v454_v32 }
  0x4b   : > { %550 = vperm.xlu0 %2809, %v527_v9   ;;  %v469_v33 = vsub.f32 %v2450_v27, %v2187_v28  ;;  %v467_v35 = vsub.f32 %v2446_v29, %v2187_v28  ;;  %v470_v36 = vsub.f32 %v2451_v30, %v2187_v28  ;;  %v468_v37 = vsub.f32 %v2447_v31, %v2187_v28  ;;  %v2189_v40 = vld [vmem:[%s3348_s3] ss:$0 sm:$0xff] }
  0x4c   : > { %v471_v44 = vsub.f32 %v459_v38, %v2187_v28  ;;  %v2190_v46 = vld [vmem:[%s3349_s4] ss:$0 sm:$0xff]  ;;  %v2836_v28 = vld [vmem:[%s3166_s21 + $0xa8] sm:$0xff]  }
  0x4d   : > { %2559 = vmatpush3.bf16.msra.mxu0 %v2814_v11  ;;  %2579 = vmatpush3.bf16.msra.mxu1 %v2817_v12  ;;  %v481_v39 = vmul.f32 %v2188_v34, %v469_v33  ;;  %v479_v41 = vmul.f32 %v2188_v34, %v467_v35  ;;  %v482_v42 = vmul.f32 %v2188_v34, %v470_v36  ;;  %v2840_v35 = vld [vmem:[%s3166_s21 + $0xa0] sm:$0xff]  }
  0x4e   : > { %2560 = vmatprep.subr.bf16.mxu0 %v2816_v13  ;;  %2580 = vmatprep.subr.bf16.mxu1 %v2819_v14  ;;  %v480_v43 = vmul.f32 %v2188_v34, %v468_v37  ;;  %v483_v50 = vmul.f32 %v2188_v34, %v471_v44  ;;  %v2842_v44 = vld [vmem:[%s3166_s21 + $0x98] sm:$0xff]  }
  0x4f   : > { %v493_v45 = vmul.f32 %v2189_v40, %v481_v39  ;;  %v491_v47 = vmul.f32 %v2189_v40, %v479_v41  ;;  %v494_v48 = vmul.f32 %v2189_v40, %v482_v42  ;;  %v2839_v42 = vld [vmem:[%s3166_s21 + $0xf0] sm:$0xff]  }
  0x50   : > { %v492_v49 = vmul.f32 %v2189_v40, %v480_v43  ;;  %v495_v55 = vmul.f32 %v2189_v40, %v483_v50  ;;  %v2846_v50 = vld [vmem:[%s3166_s21 + $0x88] sm:$0xff]  }
  0x51   : > { %2561 = vmatpush3.bf16.msra.mxu0 %v2816_v13  ;;  %2581 = vmatpush3.bf16.msra.mxu1 %v2819_v14  ;;  %v505_v51 = vadd.f32 %v2190_v46, %v493_v45  ;;  %v503_v52 = vadd.f32 %v2190_v46, %v491_v47  ;;  %v506_v53 = vadd.f32 %v2190_v46, %v494_v48  ;;  %v2841_v45 = vld [vmem:[%s3166_s21 + $0xe8] sm:$0xff]   ;;  %v2843_v47 = vld [vmem:[%s3166_s21 + $0xe0] sm:$0xff]  }
  0x52   : > { %2562 = vmatprep.subr.bf16.mxu0 %v2818_v15  ;;  %2582 = vmatprep.subr.bf16.mxu1 %v2821_v16  ;;  %v504_v54 = vadd.f32 %v2190_v46, %v492_v49  ;;  %v507_v60 = vadd.f32 %v2190_v46, %v495_v55  ;;  %v2844_v46 = vld [vmem:[%s3166_s21 + $0x90] sm:$0xff]   ;;  %v2848_v55 = vld [vmem:[%s3166_s21 + $0x80] sm:$0xff]  }
  0x53   : > { %vm510_vm0 = vcmp.gt.f32.partialorder %v505_v51, 0.0  ;;  %v515_v56 = vmul.f32 0.01, %v505_v51  ;;  %v513_v57 = vmul.f32 0.01, %v503_v52  ;;  %vm508_vm1 = vcmp.gt.f32.partialorder %v503_v52, 0.0 }
  0x54   : > { %v516_v58 = vmul.f32 0.01, %v506_v53  ;;  %v514_v59 = vmul.f32 0.01, %v504_v54  ;;  %vm511_vm2 = vcmp.gt.f32.partialorder %v506_v53, 0.0  ;;  %vm509_vm3 = vcmp.gt.f32.partialorder %v504_v54, 0.0 }
  0x55   : > { %2563 = vmatpush3.bf16.msra.mxu0 %v2818_v15  ;;  %2583 = vmatpush3.bf16.msra.mxu1 %v2821_v16  ;;  %v520_v63 = vsel %vm510_vm0, %v505_v51, %v515_v56  ;;  %v518_v0 = vsel %vm508_vm1, %v503_v52, %v513_v57  ;;  %v517_v3 = vmul.f32 0.01, %v507_v60  ;;  %vm512_vm4 = vcmp.gt.f32.partialorder %v507_v60, 0.0  ;;  %v2832_v16 = vld [vmem:[%s3166_s21 + $0xb0] sm:$0xff]  }
  0x56   : > { %2564 = vmatprep.subr.bf16.mxu0 %v2820_v17  ;;  %2584 = vmatprep.subr.bf16.mxu1 %v2823_v18  ;;  %v521_v1 = vsel %vm511_vm2, %v506_v53, %v516_v58  ;;  %v519_v2 = vsel %vm509_vm3, %v504_v54, %v514_v59  ;;  %v2847_v56 = vld [vmem:[%s3166_s21 + $0xd0] sm:$0xff]  }
  0x57   : > { %v522_v10 = vsel %vm512_vm4, %v507_v60, %v517_v3  ;;  %v2853_v3 = vld [vmem:[%s3166_s21 + $0xc0] sm:$0xff]  }
  0x59   : > { %2565 = vmatpush3.bf16.msra.mxu0 %v2820_v17  ;;  %2585 = vmatpush3.bf16.msra.mxu1 %v2823_v18 }
  0x5a   : > { %2566 = vmatprep.subr.bf16.mxu0 %v2822_v19  ;;  %2586 = vmatprep.subr.bf16.mxu1 %v2825_v20 }
  0x5d   : > { %2567 = vmatpush3.bf16.msra.mxu0 %v2822_v19  ;;  %2587 = vmatpush3.bf16.msra.mxu1 %v2825_v20 }
  0x5e   : > { %2568 = vmatprep.subr.bf16.mxu0 %v2824_v21  ;;  %2588 = vmatprep.subr.bf16.mxu1 %v2829_v22 }
  0x61   : > { %2569 = vmatpush3.bf16.msra.mxu0 %v2824_v21  ;;  %2589 = vmatpush3.bf16.msra.mxu1 %v2829_v22 }
  0x62   : > { %2594 = vmatprep.subr.bf16.mxu0 %v3188_v23  ;;  %2614 = vmatprep.subr.bf16.mxu1 %v3191_v24 }
  0xbe   : > { %v541_v61 = vpop.permute.xlu1 %540  ;;  %v531_v62 = vpop.permute.xlu0 %530 }
  0xbf   : > { %v555_v6 = vmul.f32 %v541_v61, %v520_v63  ;;  %v553_v7 = vmul.f32 %v531_v62, %v518_v0  ;;  %v2850_v61 = vld [vmem:[%s3166_s21 + $0x138] sm:$0xff]   ;;  %v2849_v62 = vld [vmem:[%s3166_s21 + $0xc8] sm:$0xff]  }
  0xc2   : > { %v546_v4 = vpop.permute.xlu1 %545  ;;  %v536_v5 = vpop.permute.xlu0 %535 }
  0xc3   : > { %v556_v8 = vmul.f32 %v546_v4, %v521_v1  ;;  %v554_v9 = vmul.f32 %v536_v5, %v519_v2  ;;  %v2854_v1 = vld [vmem:[%s3166_s21 + $0x130] sm:$0xff]   ;;  %v2856_v4 = vld [vmem:[%s3166_s21 + $0x128] sm:$0xff]   ;;  %v2855_v5 = vld [vmem:[%s3166_s21 + $0x178] sm:$0xff]  }
  0xc5   : > { %v2460_v11 = vpack.c.bf16 %v556_v8, %v555_v6  ;;  %v2455_v12 = vpack.c.bf16 %v554_v9, %v553_v7  ;;  %v2859_v6 = vld [vmem:[%s3166_s21 + $0x120] sm:$0xff]   ;;  %v2858_v7 = vld [vmem:[%s3166_s21 + $0x170] sm:$0xff]   ;;  %v2861_v9 = vld [vmem:[%s3166_s21 + $0x118] sm:$0xff]  }
  0xc6   : > { %v551_v13 = vpop.permute.xlu0 %550 }
  0xc7   : > { %2463 = vst [vmem:[#allocation2 + $0x8] sm:$0xff] %v2460_v11   ;;  %2456 = vst [vmem:[#allocation2] sm:$0xff] %v2455_v12   ;;  %v557_v14 = vmul.f32 %v551_v13, %v522_v10  ;;  %v2860_v10 = vld [vmem:[%s3166_s21 + $0x168] sm:$0xff]   ;;  %v2863_v11 = vld [vmem:[%s3166_s21 + $0x110] sm:$0xff]  }
  0xc8   : > { %v2862_v12 = vld [vmem:[%s3166_s21 + $0x160] sm:$0xff]   ;;  %v2865_v13 = vld [vmem:[%s3166_s21 + $0x108] sm:$0xff]  }
  0xc9   : > { %v2439_v15 = vpack.c.bf16 %v557_v14, %v557_v14  ;;  %v2864_v14 = vld [vmem:[%s3166_s21 + $0x158] sm:$0xff]  }
  0xcb   : > { %583 = vst [vmem:[#allocation2 + $0x10] sm:$0x3] %v2439_v15  ;;  %v2867_v15 = vld [vmem:[%s3166_s21 + $0x100] sm:$0xff]  }
  0xce   : > { %v2826_v17 = vld [vmem:[#allocation2] sm:$0xff]   ;;  %v2828_v18 = vld [vmem:[#allocation2 + $0x8] ss:$0 sps:$4 sm:$0x77]  }
  0xcf   : > { %v2833_v19 = vld [vmem:[#allocation2] sm:$0xff]   ;;  %2570 = vmatprep.mubr.bf16.mxu0 %v2826_v17  ;;  %v3215_v21 = vld [vmem:[#allocation2 + $0x8] ss:$0 sps:$4 sm:$0xff]  }
  0xd0   : > { %2571 = vmatmul.mubr.bf16.vlgmr.msra.gmra.mxu0 %v2828_v18  ;;  %v2830_v20 = vld [vmem:[#allocation2] sm:$0xfe]   ;;  %v2834_v22 = vld [vmem:[#allocation2 + $0x8] ss:$0 sps:$4 sm:$0xff]   ;;  %v909_v26 = vrot.slane %v3215_v21, 1  ;;  %v758_v27 = vshll.u32 %v2833_v19, 16 }
  0xd1   : > { %2595 = vmatpush3.bf16.msra.mxu0 %v3188_v23  ;;  %v908_v25 = vrot.slane %v2830_v20, 1  ;;  %v763_v29 = vshll.u32 %v2834_v22, 16  ;;  %v756_v31 = vshrl.u32 %v2833_v19, 16  ;;  %v2837_v33 = vld [vmem:[#allocation2] sm:$0xf8]   ;;  %v767_v37 = vshrl.u32 %v2834_v22, 16 }
  0xd2   : > { %2596 = vmatprep.subr.bf16.mxu0 %v2832_v16  ;;  %v760_v32 = vrot.slane %v758_v27, 1  ;;  %v3223_v34 = vld [vmem:[#allocation2 + $0x8] sm:$0x3f]   ;;  %v1052_v38 = vrot.slane %v2837_v33, 3  ;;  %v2851_v48 = vld [vmem:[#allocation2] sm:$0xf8]  }
  0xd3   : > { %v910_v30 = vsel %vm907_vm5, %v908_v25, %v909_v26  ;;  %v765_v23 = vrot.slane %v763_v29, 1  ;;  %v1053_v39 = vrot.slane %v3223_v34, 3  ;;  %v2852_v49 = vld [vmem:[#allocation2 + $0x8] sm:$0x7f]   ;;  %v1197_v51 = vshrl.u32 %v2851_v48, 16  ;;  %v2869_v18 = vld [vmem:[%s3166_s21 + $0x1b8] sm:$0xff]  }
  0xd4   : > { %2610 = vmatprep.mubr.bf16.mxu0 %v910_v30  ;;  %v761_v36 = vor.u32 %v760_v32, %v756_v31  ;;  %v1200_v52 = vshll.u32 %v2851_v48, 16  ;;  %v1205_v53 = vshrl.u32 %v2852_v49, 16  ;;  %v1208_v54 = vshll.u32 %v2852_v49, 16  ;;  %v2857_v8 = vld [vmem:[#allocation2 + $0x4] sm:$0xff]   ;;  %v3264_v17 = vld [vmem:[#allocation2 + $0xc] sm:$0x1f]  }
  0xd5   : > { %2597 = vmatpush3.bf16.msra.mxu0 %v2832_v16  ;;  %v769_v41 = vor.u32 %v767_v37, %v765_v23  ;;  %v1054_v43 = vsel %vm1051_vm7, %v1052_v38, %v1053_v39  ;;  %v1199_v57 = vrot.slane %v1197_v51, 3  ;;  %v2866_v16 = vld [vmem:[%s3166_s21 + $0x150] sm:$0xff]   ;;  %v2870_v19 = vld [vmem:[#allocation2 + $0x4] sm:$0xfc]   ;;  %v1492_v22 = vrot.slane %v3264_v17, 2 }
  0xd6   : > { %2598 = vmatprep.subr.bf16.mxu0 %v2836_v28  ;;  %v766_v40 = vsel %vm754_vm6, %v761_v36, %v765_v23  ;;  %v1202_v58 = vrot.slane %v1200_v52, 4  ;;  %v1207_v59 = vrot.slane %v1205_v53, 3  ;;  %v1210_v60 = vrot.slane %v1208_v54, 4  ;;  %v2878_v20 = vld [vmem:[#allocation2 + $0xc] sm:$0x3f]   ;;  %v2872_v31 = vld [vmem:[%s3166_s21 + $0x140] sm:$0xff]  }
  0xd7   : > { %2590 = vmatprep.mubr.bf16.mxu1 %v766_v40  ;;  %v2868_v21 = vld [vmem:[%s3166_s21 + $0x148] sm:$0xff]   ;;  %v2873_v27 = vld [vmem:[%s3166_s21 + $0x1b0] sm:$0xff]   ;;  %v1647_v29 = vshll.u32 %v2878_v20, 16  ;;  %v2875_v36 = vld [vmem:[%s3166_s21 + $0x1f8] sm:$0xff]  }
  0xd8   : > { %2591 = vmatmul.mubr.bf16.vlgmr.msra.gmra.mxu1 %v769_v41  ;;  %v1203_v63 = vor.u32 %v1202_v58, %v1199_v57  ;;  %v3243_v0 = vor.u32 %v1210_v60, %v1207_v59  ;;  %v2877_v25 = vld [vmem:[#allocation2 + $0x4] sm:$0xfc]   ;;  %v2874_v41 = vld [vmem:[#allocation2 + $0xc] ss:$0 sps:$4 sm:$0x77]   ;;  %v2887_v51 = vld [vmem:[%s3166_s21 + $0x1d0] sm:$0xff]  }
  0xd9   : > { %2599 = vmatpush3.bf16.msra.mxu0 %v2836_v28  ;;  %2615 = vmatpush3.bf16.msra.mxu1 %v3191_v24  ;;  %v2845_v24 = vld [vmem:[%s3166_s21 + $0xd8] sm:$0xff]   ;;  %v1644_v28 = vshrl.u32 %v2878_v20, 16  ;;  %v1636_v32 = vshrl.u32 %v2877_v25, 16  ;;  %v1639_v33 = vshll.u32 %v2877_v25, 16  ;;  %v2876_v23 = vld [vmem:[%s3166_s21 + $0x1a8] sm:$0xff]   ;;  %v2880_v40 = vld [vmem:[%s3166_s21 + $0x1a0] sm:$0xff]  }
  0xda   : > { %2600 = vmatprep.subr.bf16.mxu0 %v2840_v35  ;;  %2630 = vmatprep.mubr.bf16.mxu1 %v1054_v43  ;;  %v1212_v2 = vsel %vm1195_vm8, %v1203_v63, %v3243_v0  ;;  %v2879_v43 = vld [vmem:[%s3166_s21 + $0x1f0] sm:$0xff]   ;;  %v2883_v48 = vld [vmem:[%s3166_s21 + $0x1e0] sm:$0xff]   ;;  %v2886_v49 = vld [vmem:[%s3166_s21 + $0x188] sm:$0xff]  }
  0xdb   : > { %2616 = vmatprep.subr.bf16.mxu1 %v2839_v42  ;;  %v1646_v34 = vrot.slane %v1644_v28, 2  ;;  %v1638_v37 = vrot.slane %v1636_v32, 2  ;;  %v1641_v38 = vrot.slane %v1639_v33, 3  ;;  %v2892_v52 = vld [vmem:[#allocation2 + $0xc] sm:$0x3f]   ;;  %v2890_v53 = vld [vmem:[%s3166_s21 + $0x238] sm:$0xff]  }
  0xdc   : > { %v2891_v54 = vld [vmem:[#allocation2 + $0x4] sm:$0xf8]   ;;  %v2894_v58 = vld [vmem:[%s3166_s21 + $0x230] sm:$0xff]   ;;  %v2897_v63 = vld [vmem:[%s3166_s21 + $0x218] sm:$0xff]  }
  0xdd   : > { %2601 = vmatpush3.bf16.msra.mxu0 %v2840_v35  ;;  %2617 = vmatpush3.bf16.msra.mxu1 %v2839_v42  ;;  %v1649_v35 = vrot.slane %v1647_v29, 3  ;;  %v1642_v42 = vor.u32 %v1641_v38, %v1638_v37  ;;  %v1792_v57 = vrot.slane %v2891_v54, 3  ;;  %v2893_v60 = vld [vmem:[%s3166_s21 + $0x1c0] sm:$0xff]  }
  0xde   : > { %2602 = vmatprep.subr.bf16.mxu0 %v2842_v44  ;;  %2618 = vmatprep.subr.bf16.mxu1 %v2841_v45 }
  0xe1   : > { %2603 = vmatpush3.bf16.msra.mxu0 %v2842_v44  ;;  %2619 = vmatpush3.bf16.msra.mxu1 %v2841_v45  ;;  %v2882_v45 = vld [vmem:[%s3166_s21 + $0x198] sm:$0xff]  }
  0xe2   : > { %2604 = vmatprep.subr.bf16.mxu0 %v2844_v46  ;;  %2620 = vmatprep.subr.bf16.mxu1 %v2843_v47 }
  0xe5   : > { %2605 = vmatpush3.bf16.msra.mxu0 %v2844_v46  ;;  %2621 = vmatpush3.bf16.msra.mxu1 %v2843_v47  ;;  %v2881_v46 = vld [vmem:[%s3166_s21 + $0x1e8] sm:$0xff]   ;;  %v2884_v47 = vld [vmem:[%s3166_s21 + $0x190] sm:$0xff]  }
  0xe6   : > { %2606 = vmatprep.subr.bf16.mxu0 %v2846_v50  ;;  %2622 = vmatprep.subr.bf16.mxu1 %v2845_v24 }
  0xe9   : > { %2607 = vmatpush3.bf16.msra.mxu0 %v2846_v50  ;;  %2623 = vmatpush3.bf16.msra.mxu1 %v2845_v24  ;;  %v2885_v50 = vld [vmem:[%s3166_s21 + $0x1d8] sm:$0xff]   ;;  %v2888_v24 = vld [vmem:[%s3166_s21 + $0x180] sm:$0xff]  }
  0xea   : > { %2608 = vmatprep.subr.bf16.mxu0 %v2848_v55  ;;  %2624 = vmatprep.subr.bf16.mxu1 %v2847_v56 }
  0xed   : > { %2609 = vmatpush3.bf16.msra.mxu0 %v2848_v55  ;;  %2625 = vmatpush3.bf16.msra.mxu1 %v2847_v56  ;;  %v2889_v55 = vld [vmem:[%s3166_s21 + $0x1c8] sm:$0xff]   ;;  %v1793_v56 = vrot.slane %v2892_v52, 3 }
  0xee   : > { %2634 = vmatprep.subr.bf16.mxu0 %v2850_v61  ;;  %2626 = vmatprep.subr.bf16.mxu1 %v2849_v62 }
  0xef   : > { %v1794_v59 = vsel %vm1051_vm7, %v1792_v57, %v1793_v56 }
  0xf0   : > { %2611 = vmatmul.mubr.bf16.vlgmr.msra.gmra.mxu0 %v909_v26  ;;  %v1491_v26 = vrot.slane %v2870_v19, 2 }
  0xf1   : > { %2635 = vmatpush3.bf16.msra.mxu0 %v2850_v61  ;;  %2650 = vmatprep.mubr.bf16.mxu0 %v1212_v2  ;;  %v2895_v61 = vld [vmem:[%s3166_s21 + $0x228] sm:$0xff]   ;;  %v2900_v2 = vld [vmem:[%s3166_s21 + $0x200] sm:$0xff]  }
  0xf2   : > { %2636 = vmatprep.subr.bf16.mxu0 %v2854_v1  ;;  %2627 = vmatpush3.bf16.msra.mxu1 %v2849_v62  ;;  %v1493_v30 = vsel %vm1490_vm9, %v1491_v26, %v1492_v22  ;;  %v2896_v62 = vld [vmem:[%s3166_s21 + $0x220] sm:$0xff]  }
  0xf3   : > { %2628 = vmatprep.subr.bf16.mxu1 %v2853_v3 }
  0xf5   : > { %2637 = vmatpush3.bf16.msra.mxu0 %v2854_v1  ;;  %v2899_v1 = vld [vmem:[%s3166_s21 + $0x208] sm:$0xff]  }
  0xf6   : > { %2638 = vmatprep.subr.bf16.mxu0 %v2856_v4  ;;  %2629 = vmatpush3.bf16.msra.mxu1 %v2853_v3  ;;  %v605_v3 = vld [vmem:[#allocation3 + $0x8] sm:$0x3f] }
  0xf7   : > { %2654 = vmatprep.subr.bf16.mxu1 %v2855_v5 }
  0xf9   : > { %2639 = vmatpush3.bf16.msra.mxu0 %v2856_v4  ;;  %2631 = vmatmul.mubr.bf16.vlgmr.msra.gmra.mxu1 %v1053_v39  ;;  %v3276_v39 = vor.u32 %v1649_v35, %v1646_v34 }
  0xfa   : > { %2640 = vmatprep.subr.bf16.mxu0 %v2859_v6  ;;  %2655 = vmatpush3.bf16.msra.mxu1 %v2855_v5 }
  0xfb   : > { %2670 = vmatprep.mubr.bf16.mxu1 %v2857_v8  ;;  %2656 = vmatprep.subr.bf16.mxu1 %v2858_v7  ;;  %v1651_v44 = vsel %vm1634_vm10, %v1642_v42, %v3276_v39  ;;  %v603_v8 = vld [vmem:[#allocation3 + $0x10] sm:$0xff] }
  0xfd   : > { %2641 = vmatpush3.bf16.msra.mxu0 %v2859_v6 }
  0xfe   : > { %2642 = vmatprep.subr.bf16.mxu0 %v2861_v9  ;;  %2657 = vmatpush3.bf16.msra.mxu1 %v2858_v7 }
  0xff   : > { %2658 = vmatprep.subr.bf16.mxu1 %v2860_v10 }
 0x101   : > { %2643 = vmatpush3.bf16.msra.mxu0 %v2861_v9 }
 0x102   : > { %2644 = vmatprep.subr.bf16.mxu0 %v2863_v11  ;;  %2659 = vmatpush3.bf16.msra.mxu1 %v2860_v10 }
 0x103   : > { %2660 = vmatprep.subr.bf16.mxu1 %v2862_v12 }
 0x105   : > { %2645 = vmatpush3.bf16.msra.mxu0 %v2863_v11 }
 0x106   : > { %2646 = vmatprep.subr.bf16.mxu0 %v2865_v13  ;;  %2661 = vmatpush3.bf16.msra.mxu1 %v2862_v12 }
 0x107   : > { %2662 = vmatprep.subr.bf16.mxu1 %v2864_v14 }
 0x109   : > { %2647 = vmatpush3.bf16.msra.mxu0 %v2865_v13  ;;  %v604_v13 = vld [vmem:[#allocation3] sm:$0xff] }
 0x10a   : > { %2648 = vmatprep.subr.bf16.mxu0 %v2867_v15  ;;  %2663 = vmatpush3.bf16.msra.mxu1 %v2864_v14 }
 0x10b   : > { %2664 = vmatprep.subr.bf16.mxu1 %v2866_v16 }
 0x10d   : > { %2649 = vmatpush3.bf16.msra.mxu0 %v2867_v15 }
 0x10e   : > { %2674 = vmatprep.subr.bf16.mxu0 %v2869_v18  ;;  %2665 = vmatpush3.bf16.msra.mxu1 %v2866_v16 }
 0x10f   : > { %2666 = vmatprep.subr.bf16.mxu1 %v2868_v21 }
 0x110   : > { %2651 = vmatmul.mubr.bf16.vlgmr.msra.gmra.mxu0 %v3243_v0  ;;  %v2898_v0 = vld [vmem:[%s3166_s21 + $0x210] sm:$0xff]  }
 0x111   : > { %2675 = vmatpush3.bf16.msra.mxu0 %v2869_v18  ;;  %2690 = vmatprep.mubr.bf16.mxu0 %v1493_v30 }
 0x112   : > { %2676 = vmatprep.subr.bf16.mxu0 %v2873_v27  ;;  %2667 = vmatpush3.bf16.msra.mxu1 %v2868_v21 }
 0x113   : > { %2668 = vmatprep.subr.bf16.mxu1 %v2872_v31 }
 0x115   : > { %2677 = vmatpush3.bf16.msra.mxu0 %v2873_v27 }
 0x116   : > { %2678 = vmatprep.subr.bf16.mxu0 %v2876_v23  ;;  %2669 = vmatpush3.bf16.msra.mxu1 %v2872_v31 }
 0x117   : > { %2694 = vmatprep.subr.bf16.mxu1 %v2875_v36 }
 0x119   : > { %2679 = vmatpush3.bf16.msra.mxu0 %v2876_v23  ;;  %2671 = vmatmul.mubr.bf16.vlgmr.msra.gmra.mxu1 %v2874_v41 }
 0x11a   : > { %2680 = vmatprep.subr.bf16.mxu0 %v2880_v40  ;;  %2695 = vmatpush3.bf16.msra.mxu1 %v2875_v36 }
 0x11b   : > { %2710 = vmatprep.mubr.bf16.mxu1 %v1651_v44  ;;  %2696 = vmatprep.subr.bf16.mxu1 %v2879_v43 }
 0x11d   : > { %2681 = vmatpush3.bf16.msra.mxu0 %v2880_v40 }
 0x11e   : > { %2682 = vmatprep.subr.bf16.mxu0 %v2882_v45  ;;  %2697 = vmatpush3.bf16.msra.mxu1 %v2879_v43 }
 0x11f   : > { %2698 = vmatprep.subr.bf16.mxu1 %v2881_v46 }
 0x121   : > { %2683 = vmatpush3.bf16.msra.mxu0 %v2882_v45 }
 0x122   : > { %2684 = vmatprep.subr.bf16.mxu0 %v2884_v47  ;;  %2699 = vmatpush3.bf16.msra.mxu1 %v2881_v46 }
 0x123   : > { %2700 = vmatprep.subr.bf16.mxu1 %v2883_v48 }
 0x125   : > { %2685 = vmatpush3.bf16.msra.mxu0 %v2884_v47 }
 0x126   : > { %2686 = vmatprep.subr.bf16.mxu0 %v2886_v49  ;;  %2701 = vmatpush3.bf16.msra.mxu1 %v2883_v48 }
 0x127   : > { %2702 = vmatprep.subr.bf16.mxu1 %v2885_v50 }
 0x129   : > { %2687 = vmatpush3.bf16.msra.mxu0 %v2886_v49 }
 0x12a   : > { %2688 = vmatprep.subr.bf16.mxu0 %v2888_v24  ;;  %2703 = vmatpush3.bf16.msra.mxu1 %v2885_v50 }
 0x12b   : > { %2704 = vmatprep.subr.bf16.mxu1 %v2887_v51 }
 0x12d   : > { %2689 = vmatpush3.bf16.msra.mxu0 %v2888_v24 }
 0x12e   : > { %2714 = vmatprep.subr.bf16.mxu0 %v2890_v53  ;;  %2705 = vmatpush3.bf16.msra.mxu1 %v2887_v51 }
 0x12f   : > { %2706 = vmatprep.subr.bf16.mxu1 %v2889_v55 }
 0x130   : > { %2691 = vmatmul.mubr.bf16.vlgmr.msra.gmra.mxu0 %v1492_v22 }
 0x131   : > { %2715 = vmatpush3.bf16.msra.mxu0 %v2890_v53  ;;  %2730 = vmatprep.mubr.bf16.mxu0 %v1794_v59 }
 0x132   : > { %2716 = vmatprep.subr.bf16.mxu0 %v2894_v58  ;;  %2707 = vmatpush3.bf16.msra.mxu1 %v2889_v55 }
 0x133   : > { %2708 = vmatprep.subr.bf16.mxu1 %v2893_v60 }
 0x135   : > { %2717 = vmatpush3.bf16.msra.mxu0 %v2894_v58 }
 0x136   : > { %2718 = vmatprep.subr.bf16.mxu0 %v2895_v61  ;;  %2709 = vmatpush3.bf16.msra.mxu1 %v2893_v60 }
 0x139   : > { %2719 = vmatpush3.bf16.msra.mxu0 %v2895_v61  ;;  %2711 = vmatmul.mubr.bf16.vlgmr.msra.gmra.mxu1 %v3276_v39 }
 0x13a   : > { %2720 = vmatprep.subr.bf16.mxu0 %v2896_v62 }
 0x13d   : > { %2721 = vmatpush3.bf16.msra.mxu0 %v2896_v62 }
 0x13e   : > { %2722 = vmatprep.subr.bf16.mxu0 %v2897_v63 }
 0x141   : > { %2723 = vmatpush3.bf16.msra.mxu0 %v2897_v63 }
 0x142   : > { %2724 = vmatprep.subr.bf16.mxu0 %v2898_v0 }
 0x145   : > { %2725 = vmatpush3.bf16.msra.mxu0 %v2898_v0 }
 0x146   : > { %2726 = vmatprep.subr.bf16.mxu0 %v2899_v1 }
 0x149   : > { %2727 = vmatpush3.bf16.msra.mxu0 %v2899_v1 }
 0x14a   : > { %2728 = vmatprep.subr.bf16.mxu0 %v2900_v2 }
 0x14d   : > { %2729 = vmatpush3.bf16.msra.mxu0 %v2900_v2 }
 0x150   : > { %2731 = vmatmul.mubr.bf16.vlgmr.msra.gmra.mxu0 %v1793_v56 }
 0x190   : > { %v2572_v4 = vpop.f32.mrf.mxu0 }
 0x191   : > { %v717_v5 = vadd.f32 %v2572_v4, %v605_v3 }
 0x192   : > { %v701_v6 = vpop.f32.mrf.mxu0 }
 0x193   : > { %720 = vst [vmem:[#allocation3 + $0x8] sm:$0x3f] %v717_v5  ;;  %v715_v11 = vadd.f32 %v701_v6, %v603_v8 }
 0x194   : > { %v2573_v7 = vpop.f32.mrf.mxu0 }
 0x196   : > { %v704_v14 = vpop.f32.mrf.mxu0 }
 0x197   : > { %v716_v18 = vadd.f32 %v704_v14, %v604_v13 }
 0x198   : > { %v2592_v10 = vpop.f32.mrf.mxu1 }
 0x19a   : > { %v742_v9 = vld [vmem:[#allocation3 + $0x8] sm:$0x3f]  ;;  %v854_v15 = vpop.f32.mrf.mxu1 }
 0x19b   : > { %v870_v12 = vadd.f32 %v2592_v10, %v742_v9  ;;  %v868_v16 = vadd.f32 %v854_v15, %v715_v11 }
 0x19c   : > { %v2593_v17 = vpop.f32.mrf.mxu1 }
 0x19d   : > { %873 = vst [vmem:[#allocation3 + $0x8] sm:$0x3f] %v870_v12 }
 0x19e   : > { %v857_v19 = vpop.f32.mrf.mxu1 }
 0x19f   : > { %v869_v20 = vadd.f32 %v857_v19, %v716_v18 }
 0x1a4   : > { %v895_v21 = vld [vmem:[#allocation3 + $0x8] sm:$0x3f] }
 0x1b0   : > { %v2612_v22 = vpop.f32.mrf.mxu0 }
 0x1b1   : > { %v1011_v25 = vadd.f32 %v2612_v22, %v895_v21 }
 0x1b2   : > { %v995_v26 = vpop.f32.mrf.mxu0 }
 0x1b3   : > { %1014 = vst [vmem:[#allocation3 + $0x8] sm:$0x3f] %v1011_v25  ;;  %v1009_v27 = vadd.f32 %v995_v26, %v868_v16 }
 0x1b4   : > { %v2613_v28 = vpop.f32.mrf.mxu0 }
 0x1b6   : > { %v998_v34 = vpop.f32.mrf.mxu0 }
 0x1b7   : > { %v1010_v57 = vadd.f32 %v998_v34, %v869_v20 }
 0x1b9   : > { %v2632_v30 = vpop.f32.mrf.mxu1 }
 0x1ba   : > { %v1036_v29 = vld [vmem:[#allocation3 + $0x8] sm:$0x3f] }
 0x1bb   : > { %v1155_v31 = vadd.f32 %v2632_v30, %v1036_v29  ;;  %v1139_v32 = vpop.f32.mrf.mxu1 }
 0x1bc   : > { %v1153_v33 = vadd.f32 %v1139_v32, %v1009_v27 }
 0x1bd   : > { %1158 = vst [vmem:[#allocation3 + $0x8] sm:$0x3f] %v1155_v31  ;;  %v2633_v23 = vpop.f32.mrf.mxu1 }
 0x1bf   : > { %v1142_v40 = vpop.f32.mrf.mxu1 }
 0x1c0   : > { %v1154_v59 = vadd.f32 %v1142_v40, %v1010_v57 }
 0x1c4   : > { %v1180_v35 = vld [vmem:[#allocation3 + $0x8] sm:$0x3f] }
 0x1d0   : > { %v2652_v36 = vpop.f32.mrf.mxu0 }
 0x1d1   : > { %v1313_v37 = vadd.f32 %v2652_v36, %v1180_v35 }
 0x1d2   : > { %v1297_v38 = vpop.f32.mrf.mxu0 }
 0x1d3   : > { %1316 = vst [vmem:[#allocation3 + $0x8] sm:$0x3f] %v1313_v37  ;;  %v1311_v58 = vadd.f32 %v1297_v38, %v1153_v33 }
 0x1d4   : > { %v2653_v39 = vpop.f32.mrf.mxu0 }
 0x1d6   : > { %v1300_v46 = vpop.f32.mrf.mxu0 }
 0x1d7   : > { %v1312_v62 = vadd.f32 %v1300_v46, %v1154_v59 }
 0x1d9   : > { %v2672_v42 = vpop.f32.mrf.mxu1 }
 0x1da   : > { %v1338_v41 = vld [vmem:[#allocation3 + $0x8] sm:$0x3f] }
 0x1db   : > { %v1450_v43 = vadd.f32 %v2672_v42, %v1338_v41  ;;  %v1434_v44 = vpop.f32.mrf.mxu1 }
 0x1dc   : > { %v1448_v60 = vadd.f32 %v1434_v44, %v1311_v58 }
 0x1dd   : > { %1453 = vst [vmem:[#allocation3 + $0x8] sm:$0x3f] %v1450_v43  ;;  %v2673_v45 = vpop.f32.mrf.mxu1 }
 0x1df   : > { %v1437_v51 = vpop.f32.mrf.mxu1 }
 0x1e0   : > { %v1449_v2 = vadd.f32 %v1437_v51, %v1312_v62 }
 0x1e4   : > { %v1475_v47 = vld [vmem:[#allocation3 + $0x8] sm:$0x3f] }
 0x1f0   : > { %v2692_v48 = vpop.f32.mrf.mxu0 }
 0x1f1   : > { %v1594_v49 = vadd.f32 %v2692_v48, %v1475_v47 }
 0x1f2   : > { %v1578_v50 = vpop.f32.mrf.mxu0 }
 0x1f3   : > { %1597 = vst [vmem:[#allocation3 + $0x8] sm:$0x3f] %v1594_v49  ;;  %v1592_v63 = vadd.f32 %v1578_v50, %v1448_v60 }
 0x1f4   : > { %v2693_v24 = vpop.f32.mrf.mxu0 }
 0x1f6   : > { %v1581_v61 = vpop.f32.mrf.mxu0 }
 0x1f7   : > { %v1593_v7 = vadd.f32 %v1581_v61, %v1449_v2 }
 0x1f9   : > { %v2712_v53 = vpop.f32.mrf.mxu1 }
 0x1fa   : > { %v1619_v52 = vld [vmem:[#allocation3 + $0x8] sm:$0x3f] }
 0x1fb   : > { %v1752_v54 = vadd.f32 %v2712_v53, %v1619_v52  ;;  %v1736_v55 = vpop.f32.mrf.mxu1 }
 0x1fc   : > { %v1750_v3 = vadd.f32 %v1736_v55, %v1592_v63 }
 0x1fd   : > { %1755 = vst [vmem:[#allocation3 + $0x8] sm:$0x3f] %v1752_v54  ;;  %v2713_v56 = vpop.f32.mrf.mxu1 }
 0x1ff   : > { %v1739_v5 = vpop.f32.mrf.mxu1 }
 0x200   : > { %v1751_v10 = vadd.f32 %v1739_v5, %v1593_v7 }
 0x204   : > { %v1777_v0 = vld [vmem:[#allocation3 + $0x8] sm:$0x3f] }
 0x210   : > { %v2732_v1 = vpop.f32.mrf.mxu0 }
 0x211   : > { %v1895_v4 = vadd.f32 %v2732_v1, %v1777_v0 }
 0x212   : > { %v1879_v6 = vpop.f32.mrf.mxu0 }
 0x213   : > { %1898 = vst [vmem:[#allocation3 + $0x8] sm:$0x3f] %v1895_v4  ;;  %v1893_v8 = vadd.f32 %v1879_v6, %v1750_v3 }
 0x214   : > { %v2733_v9 = vpop.f32.mrf.mxu0 }
 0x215   : > { %1896 = vst [vmem:[#allocation3 + $0x10] sm:$0xff] %v1893_v8 }
 0x216   : > { %v1882_v11 = vpop.f32.mrf.mxu0 }
 0x217   : > { %v1894_v12 = vadd.f32 %v1882_v11, %v1751_v10 }
 0x219   : > { %1897 = vst [vmem:[#allocation3] sm:$0xff] %v1894_v12 }
 0x21a PF: > { %p2423_p12 = scmp.ne.s32.totalorder %s2963_s27, 2 }
 0x21c   : > { %1902 = sbr.rel (%p2423_p12) target bundleno = 690 (0x2b2), region = 68 }
 0x221   : > { %v1911_v13 = vld [vmem:[%s3351_s6] sm:$0xff]  ;;  %v1913_v14 = vld [vmem:[%s3351_s6 + $0x10] sm:$0x3f]  ;;  %v2994_v15 = vmov 0   ;;  %v1912_v16 = vld [vmem:[%s3351_s6 + $0x8] sm:$0xff]  ;;  %vm1978_vm11 = vcmask 1043459  }
 0x222   : > { %2901 = vset.pattern.permute.xlu0 %v2994_v15  ;;  %1907 = vst [vmem:[%s3143_s17 + $0x10] sm:$0x3] %v2994_v15  ;;  %1903 = vst [vmem:[%s3143_s17] sm:$0xf] %v2994_v15  ;;  %2902 = vset.pattern.permute.xlu1 %v2994_v15  ;;  %v1908_v17 = vld [vmem:[#allocation3 + $0x10] sm:$0xff]  ;;  %v1910_v18 = vld [vmem:[#allocation3 + $0x8] sm:$0x3f] }
 0x223   : > { %1904 = vst [vmem:[%s3143_s17 + $0x4] sm:$0xf] %v2994_v15  ;;  %1905 = vst [vmem:[%s3143_s17 + $0x8] sm:$0xf] %v2994_v15  ;;  %1916 = vperm.xlu0 %2901, %v1911_v13   ;;  %1926 = vperm.xlu1 %2902, %v1913_v14   ;;  %vm1979_vm12 = vsmask.f32 7950 }
 0x224   : > { %1906 = vst [vmem:[%s3143_s17 + $0xc] sm:$0xf] %v2994_v15  ;;  %v1909_v27 = vld [vmem:[#allocation3] sm:$0xff]  ;;  %vm1980_vm13 = vmand %vm1978_vm11, %vm1979_vm12  ;;  %vm1986_vm14 = vcmask 1042432   ;;  %vm1987_vm15 = vsmask.f32 2304 }
 0x225   : > { %vm1942_vm0 = vsmask.f32 3328  ;;  %vm1943_vm1 = vsmask.f32 7440  ;;  %vm1988_vm2 = vmand %vm1986_vm14, %vm1987_vm15 }
 0x226   : > { %vm1944_vm3 = vmor %vm1942_vm0, %vm1943_vm1 }
 0x227   : > { %1921 = vperm.xlu0 %2901, %v1912_v16  }
 0x229   : > { %v1981_v33 = vld [vmem:[%s3143_s17] sm:$0x8] }
 0x22b   : > { %v1989_v42 = vld [vmem:[%s3143_s17 + $0xc] sm:$0x7] }
 0x29e   : > { %v1917_v19 = vpop.permute.xlu0 %1916  ;;  %v1927_v20 = vpop.permute.xlu1 %1926 }
 0x29f   : > { %v1929_v21 = vmul.f32 %v1917_v19, %v1908_v17  ;;  %v1931_v22 = vmul.f32 %v1927_v20, %v1910_v18 }
 0x2a1   : > { %v2441_v25 = vpack.c.bf16 %v1929_v21, %v1929_v21  ;;  %v2443_v26 = vpack.c.bf16 %v1931_v22, %v1931_v22 }
 0x2a2   : > { %v1922_v28 = vpop.permute.xlu0 %1921 }
 0x2a3   : > { %v1946_v29 = vshll.u32 %v2441_v25, 16  ;;  %v1949_v30 = vshrl.u32 %v2441_v25, 16  ;;  %v1965_v31 = vshll.u32 %v2443_v26, 16  ;;  %v1969_v32 = vshrl.u32 %v2443_v26, 16 }
 0x2a4   : > { %v1930_v23 = vmul.f32 %v1922_v28, %v1909_v27 }
 0x2a5   : > { %v1948_v34 = vrot.slane %v1946_v29, 5  ;;  %v1951_v35 = vrot.slane %v1949_v30, 4  ;;  %v1967_v36 = vrot.slane %v1965_v31, 5  ;;  %v1971_v37 = vrot.slane %v1969_v32, 4 }
 0x2a6   : > { %v2442_v38 = vpack.c.bf16 %v1930_v23, %v1930_v23 }
 0x2a7   : > { %v1952_v39 = vor.u32 %v1951_v35, %v1948_v34  ;;  %v1982_v40 = vsel %vm1980_vm13, %v1948_v34, %v1981_v33  ;;  %v1972_v41 = vor.u32 %v1971_v37, %v1967_v36 }
 0x2a8   : > { %1983 = vst [vmem:[%s3143_s17] sm:$0x8] %v1982_v40  ;;  %v1955_v43 = vshll.u32 %v2442_v38, 16  ;;  %v1959_v44 = vshrl.u32 %v2442_v38, 16 }
 0x2a9   : > { %v1953_v45 = vrot.slane %v1952_v39, 4  ;;  %v1973_v46 = vrot.slane %v1972_v41, 4 }
 0x2aa   : > { %v1957_v47 = vrot.slane %v1955_v43, 5  ;;  %v1961_v48 = vrot.slane %v1959_v44, 4 }
 0x2ab   : > { %v1990_v49 = vsel %vm1988_vm2, %v1973_v46, %v1989_v42 }
 0x2ac   : > { %1991 = vst [vmem:[%s3143_s17 + $0xc] sm:$0x7] %v1990_v49  ;;  %v1958_v50 = vsel %vm1944_vm3, %v1953_v45, %v1957_v47  ;;  %v1962_v24 = vor.u32 %v1961_v48, %v1957_v47 }
 0x2ad   : > { %1984 = vst [vmem:[%s3143_s17 + $0x4] sm:$0xf] %v1958_v50 }
 0x2ae   : > { %v1963_v51 = vrot.slane %v1962_v24, 4 }
 0x2b0   : > { %v1968_v52 = vsel %vm1944_vm3, %v1963_v51, %v1967_v36 }
 0x2b1   : > { %1985 = vst [vmem:[%s3143_s17 + $0x8] sm:$0xf] %v1968_v52 }
 0x2b2 PF: > { %s19_s11 = sadd.s32 1, %s2987_s11   ;;  %s3365_s29 = sld [smem:[#allocation7_spill]] }
 0x2b3   : > { %p16_p13 = scmp.ge.s32.totalorder %s19_s11, 26   ;;  %s3366_s19 = sld [smem:[#allocation8_spill]] }
 0x2b4   : > { %s3367_s21 = sld [smem:[#allocation9_spill]]  ;;  %s3369_s27 = smov %s2975_s30 }
 0x2b5   : > { %s3368_s10 = sld [smem:[#allocation10_spill]]  ;;  %s3370_s28 = smov %s2979_s9 }
 0x2b6   :  { %18 = sbr.rel (!%p16_p13) target bundleno = 6 (0x6), region = 114 }
 0x2b9   : > { %s3371_s30 = smov %s3366_s19 }
 0x2ba   : > { %s3372_s9 = smov %s3367_s21 }
 0x2bb   :  { %2021 = vsyncpa [#allocation5], 1 }
 0x2bc   :  { %2023 = vsyncpa [#allocation5 + $0x1], 1 }

</bundles_post_ra>
